<compile_context>
chip_gen: v6e
topology: v6e:2x2x1
jax: 0.10.0
libtpu: 0.0.40
codegen_flags: <defaults>
</compile_context>

<pallas_src>
import functools

import jax
import jax.numpy as jnp
from jax.experimental import pallas as pl
from jax.experimental.pallas import tpu as pltpu

LANE = 128


def _round_up(a: int, m: int) -> int:
    return (a + m - 1) // m * m


def _mlp_lora_kernel(
    x_ref,
    p1_ref, c1_ref,
    p2_ref, c2_ref,
    o_ref,
    *,
    d_hid_p: int,
    d_out_p: int,
):
    # In-kernel cast: x arrives f32, MXU eats bf16 (cast hides on the VPU).
    x = x_ref[...].astype(p1_ref.dtype)                        # [tm, d_in] bf16

    # ---- fc1: one wide MXU matmul over packed [W1 | gateW1 | W_lora1] ----
    z1 = jnp.dot(x, p1_ref[...], preferred_element_type=jnp.float32) + c1_ref[...]
    base1 = z1[:, :d_hid_p]
    gate1 = jax.nn.sigmoid(z1[:, d_hid_p:2 * d_hid_p])
    lora1 = z1[:, 2 * d_hid_p:]                                # LoRA rides the packed N dim
    h = jnp.tanh(base1 + lora1 * gate1)                        # f32 epilogue

    # ---- fc2: one wide MXU matmul over packed [W2 | gateW2 | W_lora2] ----
    hb = h.astype(p2_ref.dtype)
    z2 = jnp.dot(hb, p2_ref[...], preferred_element_type=jnp.float32) + c2_ref[...]
    base2 = z2[:, :d_out_p]
    gate2 = jax.nn.sigmoid(z2[:, d_out_p:2 * d_out_p])
    lora2 = z2[:, 2 * d_out_p:]
    o_ref[...] = (base2 + lora2 * gate2).astype(o_ref.dtype)


def pack_params(params, *, lora_alpha: int, lora_rank: int,
                weight_dtype=jnp.bfloat16):
    """Pack + lane-pad weights once (host side).

    Per layer: one RHS [W | gate_W | W_lora] (bf16) where
    W_lora = lora_A @ lora_B * (alpha/rank) is fused in f32 (single bf16
    rounding), plus a packed f32 bias row [b | gate_b | 0].  All segment
    widths are multiples of 128 lanes so in-kernel slices are layout-cheap
    and the output store is lane-dense.
    """
    d_in, d_hid = params["w1"].shape
    d_out = params["w2"].shape[1]
    scaling = lora_alpha / lora_rank

    d_hid_p = _round_up(d_hid, LANE)
    d_out_p = _round_up(d_out, LANE)

    def pad2(a, rows, cols):
        return jnp.pad(a, ((0, rows - a.shape[0]), (0, cols - a.shape[1])))

    # Host-side LoRA fusion (f32), scaling pre-folded.
    wl1 = (params["a1"] @ params["bb1"]) * scaling             # [d_in, d_hid]
    wl2 = (params["a2"] @ params["bb2"]) * scaling             # [d_hid, d_out]

    # Layer 1 (input_dim -> hidden_dim)
    p1 = jnp.concatenate(
        [pad2(params["w1"], d_in, d_hid_p),
         pad2(params["gw1"], d_in, d_hid_p),
         pad2(wl1, d_in, d_hid_p)], axis=1).astype(weight_dtype)
    c1 = jnp.concatenate(
        [pad2(params["b1"], 1, d_hid_p),
         pad2(params["gb1"], 1, d_hid_p),
         jnp.zeros((1, d_hid_p), jnp.float32)], axis=1).astype(jnp.float32)

    # Layer 2 (hidden_dim -> output_dim); K rows padded to d_hid_p to match h.
    p2 = jnp.concatenate(
        [pad2(params["w2"], d_hid_p, d_out_p),
         pad2(params["gw2"], d_hid_p, d_out_p),
         pad2(wl2, d_hid_p, d_out_p)], axis=1).astype(weight_dtype)
    c2 = jnp.concatenate(
        [pad2(params["b2"], 1, d_out_p),
         pad2(params["gb2"], 1, d_out_p),
         jnp.zeros((1, d_out_p), jnp.float32)], axis=1).astype(jnp.float32)

    return dict(p1=p1, c1=c1, p2=p2, c2=c2,
                d_hid_p=d_hid_p, d_out_p=d_out_p, d_out=d_out)


def mlp_lora_forward(x, packed, *, tile_b: int | None = None,
                     max_tile_b: int = 256,
                     out_dtype=jnp.bfloat16,
                     single_buffer_weights: bool = True,
                     vmem_limit_bytes: int = 48 * 1024 * 1024):
    """x: [B, D_in] float32 (cast to bf16 inside the kernel).

    packed: output of pack_params.  Returns [B, d_out] in out_dtype.
    Note: for scaled-up hidden dims on v7x (64 MiB VMEM) prefer max_tile_b=128
    and keep vmem_limit_bytes <= ~48-56 MiB.
    """
    B, d_in = x.shape
    d_hid_p = packed["d_hid_p"]
    d_out_p = packed["d_out_p"]
    d_out = packed["d_out"]
    wp1 = packed["p1"].shape[1]
    wp2 = packed["p2"].shape[1]

    # Balanced tiles: minimize batch padding, keep >= 2 grid steps for
    # non-trivial B so both v7x TensorCores get work, cap tile for VMEM.
    if tile_b is None:
        n_steps = max(pl.cdiv(B, max_tile_b), 2 if B > 32 else 1)
        tile_b = _round_up(pl.cdiv(B, n_steps), 16)
    else:
        tile_b = min(tile_b, _round_up(B, 16))
    b_pad = _round_up(B, tile_b)

    xp = x if b_pad == B else jnp.pad(x, ((0, b_pad - B), (0, 0)))

    kernel = functools.partial(_mlp_lora_kernel, d_hid_p=d_hid_p, d_out_p=d_out_p)

    def run(buffer_weights_once: bool):
        # Constant weight blocks: block index never changes across the grid.
        # Single-buffering halves their VMEM footprint (nothing to pipeline).
        pm = pl.Buffered(1) if buffer_weights_once else None
        def wspec(shape):
            return pl.BlockSpec(shape, lambda i: (0, 0), pipeline_mode=pm)

        return pl.pallas_call(
            kernel,
            out_shape=jax.ShapeDtypeStruct((b_pad, d_out_p), out_dtype),
            grid_spec=pltpu.PrefetchScalarGridSpec(
                num_scalar_prefetch=0,
                grid=(b_pad // tile_b,),
                in_specs=[
                    pl.BlockSpec((tile_b, d_in), lambda i: (i, 0)),  # x, batch-tiled
                    wspec((d_in, wp1)),       # [W1 | gateW1 | W_lora1]
                    wspec((1, wp1)),          # [b1 | gb1 | 0]
                    wspec((d_hid_p, wp2)),    # [W2 | gateW2 | W_lora2]
                    wspec((1, wp2)),          # [b2 | gb2 | 0]
                ],
                out_specs=pl.BlockSpec((tile_b, d_out_p), lambda i: (i, 0)),
            ),
            compiler_params=pltpu.CompilerParams(
                dimension_semantics=("parallel",),
                vmem_limit_bytes=vmem_limit_bytes,
            ),
        )(xp, packed["p1"], packed["c1"], packed["p2"], packed["c2"])

    if single_buffer_weights:
        try:
            out = run(True)
        except Exception:
            # Fallback: some JAX versions may not accept pipeline_mode on
            # top-level pallas_call BlockSpecs; default double-buffering is
            # functionally identical (just a bit more VMEM).
            out = run(False)
    else:
        out = run(False)

    return out[:B, :d_out]


def make_params(key, d_in, d_hid, d_out, r):
    """Deterministic synthetic parameters (shapes match the PyTorch module,
    weights pre-transposed to [in, out])."""
    ks = jax.random.split(key, 13)
    f32 = jnp.float32

    def u(k, shape, scale=0.2):
        return jax.random.uniform(k, shape, f32, -scale, scale)

    return {
        # fc1
        "w1":  u(ks[0], (d_in, d_hid)),
        "b1":  u(ks[1], (1, d_hid)),
        "a1":  u(ks[2], (d_in, r)),
        "bb1": u(ks[3], (r, d_hid)),     # nonzero so the LoRA path is exercised
        "gw1": u(ks[4], (d_in, d_hid)),
        "gb1": u(ks[5], (1, d_hid)),
        # fc2
        "w2":  u(ks[6], (d_hid, d_out)),
        "b2":  u(ks[7], (1, d_out)),
        "a2":  u(ks[8], (d_hid, r)),
        "bb2": u(ks[9], (r, d_out)),
        "gw2": u(ks[10], (d_hid, d_out)),
        "gb2": u(ks[11], (1, d_out)),
    }


def mlp_lora_ref(x, p, *, lora_alpha, lora_rank):
    """Pure-JAX f32 reference for correctness checking."""
    s = lora_alpha / lora_rank
    base = x @ p["w1"] + p["b1"]
    lora = (x @ p["a1"]) @ p["bb1"] * s
    gate = jax.nn.sigmoid(x @ p["gw1"] + p["gb1"])
    h = jnp.tanh(base + lora * gate)
    base = h @ p["w2"] + p["b2"]
    lora = (h @ p["a2"]) @ p["bb2"] * s
    gate = jax.nn.sigmoid(h @ p["gw2"] + p["gb2"])
    return base + lora * gate


if __name__ == "__main__":
    B, D_IN, D_HID, D_OUT, RANK = 512, 16, 32, 8, 4
    LORA_ALPHA = 32

    key = jax.random.PRNGKey(0)
    kx, kp = jax.random.split(key)
    x = jax.random.normal(kx, (B, D_IN), jnp.float32)
    params = make_params(kp, D_IN, D_HID, D_OUT, RANK)
    packed = pack_params(params, lora_alpha=LORA_ALPHA, lora_rank=RANK)

    out = mlp_lora_forward(x, packed)          # grid=(2,) -> both v7x cores busy
    out = jax.block_until_ready(out)

    ref = mlp_lora_ref(x, params, lora_alpha=LORA_ALPHA, lora_rank=RANK)
    assert out.shape == (B, D_OUT)
    out_f32 = out.astype(jnp.float32)
    max_err = float(jnp.max(jnp.abs(out_f32 - ref)))
    # bf16 weights/activations feeding the MXU, f32 accumulation + epilogue,
    # bf16 output store.
    assert jnp.allclose(out_f32, ref, atol=5e-2, rtol=5e-2), (
        f"mismatch vs reference (max abs err {max_err})")

    print("KERNEL_OK")
</pallas_src>

<mosaic_0001>
module attributes {stable_mosaic.version = 11 : i64} {
  func.func @_mlp_lora_kernel(%arg0: i32, %arg1: memref<256x16xf32, #tpu.memory_space<vmem>>, %arg2: memref<16x384xbf16, #tpu.memory_space<vmem>>, %arg3: memref<1x384xf32, #tpu.memory_space<vmem>>, %arg4: memref<128x384xbf16, #tpu.memory_space<vmem>>, %arg5: memref<1x384xf32, #tpu.memory_space<vmem>>, %arg6: memref<256x128xbf16, #tpu.memory_space<vmem>>) attributes {dimension_semantics = [#tpu.dimension_semantics<parallel>], iteration_bounds = array<i64: 2>, scalar_prefetch = 0 : i64, scratch_operands = 0 : i64, tpu.core_type = #tpu.core_type<tc>, window_params = [{transform_indices = @transform_0, window_bounds = array<i64: 256, 16>}, {pipeline_mode = #tpu.pipeline_mode<synchronous>, transform_indices = @transform_1, window_bounds = array<i64: 16, 384>}, {pipeline_mode = #tpu.pipeline_mode<synchronous>, transform_indices = @transform_2, window_bounds = array<i64: 1, 384>}, {pipeline_mode = #tpu.pipeline_mode<synchronous>, transform_indices = @transform_3, window_bounds = array<i64: 128, 384>}, {pipeline_mode = #tpu.pipeline_mode<synchronous>, transform_indices = @transform_4, window_bounds = array<i64: 1, 384>}, {transform_indices = @transform_5, window_bounds = array<i64: 256, 128>}]} {
    %c0 = arith.constant 0 : index
    %c0_0 = arith.constant 0 : index
    %0 = vector.load %arg1[%c0, %c0_0] : memref<256x16xf32, #tpu.memory_space<vmem>>, vector<256x16xf32>
    %1 = arith.truncf %0 : vector<256x16xf32> to vector<256x16xbf16>
    %c0_1 = arith.constant 0 : index
    %c0_2 = arith.constant 0 : index
    %2 = vector.load %arg2[%c0_1, %c0_2] : memref<16x384xbf16, #tpu.memory_space<vmem>>, vector<16x384xbf16>
    %cst = arith.constant dense<0.000000e+00> : vector<256x384xf32>
    %3 = tpu.matmul %1, %2, %cst {dimension_numbers = #tpu.dot_dimension_numbers<[1], [0], [0], [1], [0, 0, 1, 1], [], []>} : vector<256x16xbf16>, vector<16x384xbf16>, vector<256x384xf32> -> vector<256x384xf32>
    %c0_3 = arith.constant 0 : index
    %c0_4 = arith.constant 0 : index
    %4 = vector.load %arg3[%c0_3, %c0_4] : memref<1x384xf32, #tpu.memory_space<vmem>>, vector<1x384xf32>
    %5 = vector.broadcast %4 : vector<1x384xf32> to vector<256x384xf32>
    %6 = arith.addf %3, %5 : vector<256x384xf32>
    %7 = vector.extract_strided_slice %6 {offsets = [0, 0], sizes = [256, 128], strides = [1, 1]} : vector<256x384xf32> to vector<256x128xf32>
    %8 = vector.extract_strided_slice %6 {offsets = [0, 128], sizes = [256, 128], strides = [1, 1]} : vector<256x384xf32> to vector<256x128xf32>
    %9 = arith.negf %8 : vector<256x128xf32>
    %10 = math.exp %9 : vector<256x128xf32>
    %cst_5 = arith.constant 1.000000e+00 : f32
    %11 = vector.broadcast %cst_5 : f32 to vector<256x128xf32>
    %12 = arith.addf %11, %10 : vector<256x128xf32>
    %13 = arith.divf %11, %12 : vector<256x128xf32>
    %14 = vector.extract_strided_slice %6 {offsets = [0, 256], sizes = [256, 128], strides = [1, 1]} : vector<256x384xf32> to vector<256x128xf32>
    %15 = arith.mulf %14, %13 : vector<256x128xf32>
    %16 = arith.addf %7, %15 : vector<256x128xf32>
    %17 = math.tanh %16 : vector<256x128xf32>
    %18 = arith.truncf %17 : vector<256x128xf32> to vector<256x128xbf16>
    %c0_6 = arith.constant 0 : index
    %c0_7 = arith.constant 0 : index
    %19 = vector.load %arg4[%c0_6, %c0_7] : memref<128x384xbf16, #tpu.memory_space<vmem>>, vector<128x384xbf16>
    %cst_8 = arith.constant dense<0.000000e+00> : vector<256x384xf32>
    %20 = tpu.matmul %18, %19, %cst_8 {dimension_numbers = #tpu.dot_dimension_numbers<[1], [0], [0], [1], [0, 0, 1, 1], [], []>} : vector<256x128xbf16>, vector<128x384xbf16>, vector<256x384xf32> -> vector<256x384xf32>
    %c0_9 = arith.constant 0 : index
    %c0_10 = arith.constant 0 : index
    %21 = vector.load %arg5[%c0_9, %c0_10] : memref<1x384xf32, #tpu.memory_space<vmem>>, vector<1x384xf32>
    %22 = vector.broadcast %21 : vector<1x384xf32> to vector<256x384xf32>
    %23 = arith.addf %20, %22 : vector<256x384xf32>
    %24 = vector.extract_strided_slice %23 {offsets = [0, 0], sizes = [256, 128], strides = [1, 1]} : vector<256x384xf32> to vector<256x128xf32>
    %25 = vector.extract_strided_slice %23 {offsets = [0, 128], sizes = [256, 128], strides = [1, 1]} : vector<256x384xf32> to vector<256x128xf32>
    %26 = arith.negf %25 : vector<256x128xf32>
    %27 = math.exp %26 : vector<256x128xf32>
    %cst_11 = arith.constant 1.000000e+00 : f32
    %28 = vector.broadcast %cst_11 : f32 to vector<256x128xf32>
    %29 = arith.addf %28, %27 : vector<256x128xf32>
    %30 = arith.divf %28, %29 : vector<256x128xf32>
    %31 = vector.extract_strided_slice %23 {offsets = [0, 256], sizes = [256, 128], strides = [1, 1]} : vector<256x384xf32> to vector<256x128xf32>
    %32 = arith.mulf %31, %30 : vector<256x128xf32>
    %33 = arith.addf %24, %32 : vector<256x128xf32>
    %34 = arith.truncf %33 : vector<256x128xf32> to vector<256x128xbf16>
    %c0_12 = arith.constant 0 : index
    %c0_13 = arith.constant 0 : index
    %35 = vector.load %arg6[%c0_12, %c0_13] : memref<256x128xbf16, #tpu.memory_space<vmem>>, vector<256x128xbf16>
    tpu.vector_store %arg6[%c0_12, %c0_13], %34 {strides = array<i32>} : memref<256x128xbf16, #tpu.memory_space<vmem>>, vector<256x128xbf16>,
    return
  }
  func.func @transform_0(%arg0: i32) -> (i32, i32) {
    %c0_i32 = arith.constant 0 : i32
    %c0_i32_0 = arith.constant 0 : i32
    return %arg0, %c0_i32 : i32, i32
  }
  func.func @transform_1(%arg0: i32) -> (i32, i32) {
    %c0_i32 = arith.constant 0 : i32
    %c0_i32_0 = arith.constant 0 : i32
    %c0_i32_1 = arith.constant 0 : i32
    return %c0_i32, %c0_i32_0 : i32, i32
  }
  func.func @transform_2(%arg0: i32) -> (i32, i32) {
    %c0_i32 = arith.constant 0 : i32
    %c0_i32_0 = arith.constant 0 : i32
    %c0_i32_1 = arith.constant 0 : i32
    return %c0_i32, %c0_i32_0 : i32, i32
  }
  func.func @transform_3(%arg0: i32) -> (i32, i32) {
    %c0_i32 = arith.constant 0 : i32
    %c0_i32_0 = arith.constant 0 : i32
    %c0_i32_1 = arith.constant 0 : i32
    return %c0_i32, %c0_i32_0 : i32, i32
  }
  func.func @transform_4(%arg0: i32) -> (i32, i32) {
    %c0_i32 = arith.constant 0 : i32
    %c0_i32_0 = arith.constant 0 : i32
    %c0_i32_1 = arith.constant 0 : i32
    return %c0_i32, %c0_i32_0 : i32, i32
  }
  func.func @transform_5(%arg0: i32) -> (i32, i32) {
    %c0_i32 = arith.constant 0 : i32
    %c0_i32_0 = arith.constant 0 : i32
    return %arg0, %c0_i32 : i32, i32
  }
}

module attributes {stable_mosaic.version = 11 : i64} {
  func.func @_mlp_lora_kernel(%arg0: i32, %arg1: memref<256x16xf32, #tpu.memory_space<vmem>>, %arg2: memref<16x384xbf16, #tpu.memory_space<vmem>>, %arg3: memref<1x384xf32, #tpu.memory_space<vmem>>, %arg4: memref<128x384xbf16, #tpu.memory_space<vmem>>, %arg5: memref<1x384xf32, #tpu.memory_space<vmem>>, %arg6: memref<256x128xbf16, #tpu.memory_space<vmem>>) attributes {dimension_semantics = [#tpu.dimension_semantics<parallel>], iteration_bounds = array<i64: 2>, scalar_prefetch = 0 : i64, scratch_operands = 0 : i64, tpu.core_type = #tpu.core_type<tc>, window_params = [{transform_indices = @transform_0, window_bounds = array<i64: 256, 16>}, {pipeline_mode = #tpu.pipeline_mode<synchronous>, transform_indices = @transform_1, window_bounds = array<i64: 16, 384>}, {pipeline_mode = #tpu.pipeline_mode<synchronous>, transform_indices = @transform_2, window_bounds = array<i64: 1, 384>}, {pipeline_mode = #tpu.pipeline_mode<synchronous>, transform_indices = @transform_3, window_bounds = array<i64: 128, 384>}, {pipeline_mode = #tpu.pipeline_mode<synchronous>, transform_indices = @transform_4, window_bounds = array<i64: 1, 384>}, {transform_indices = @transform_5, window_bounds = array<i64: 256, 128>}]} {
    %c0 = arith.constant 0 : index
    %c0_0 = arith.constant 0 : index
    %0 = vector.load %arg1[%c0, %c0_0] : memref<256x16xf32, #tpu.memory_space<vmem>>, vector<256x16xf32>
    %1 = arith.truncf %0 : vector<256x16xf32> to vector<256x16xbf16>
    %c0_1 = arith.constant 0 : index
    %c0_2 = arith.constant 0 : index
    %2 = vector.load %arg2[%c0_1, %c0_2] : memref<16x384xbf16, #tpu.memory_space<vmem>>, vector<16x384xbf16>
    %cst = arith.constant dense<0.000000e+00> : vector<256x384xf32>
    %3 = tpu.matmul %1, %2, %cst {dimension_numbers = #tpu.dot_dimension_numbers<[1], [0], [0], [1], [0, 0, 1, 1], [], []>} : vector<256x16xbf16>, vector<16x384xbf16>, vector<256x384xf32> -> vector<256x384xf32>
    %c0_3 = arith.constant 0 : index
    %c0_4 = arith.constant 0 : index
    %4 = vector.load %arg3[%c0_3, %c0_4] : memref<1x384xf32, #tpu.memory_space<vmem>>, vector<1x384xf32>
    %5 = vector.broadcast %4 : vector<1x384xf32> to vector<256x384xf32>
    %6 = arith.addf %3, %5 : vector<256x384xf32>
    %7 = vector.extract_strided_slice %6 {offsets = [0, 0], sizes = [256, 128], strides = [1, 1]} : vector<256x384xf32> to vector<256x128xf32>
    %8 = vector.extract_strided_slice %6 {offsets = [0, 128], sizes = [256, 128], strides = [1, 1]} : vector<256x384xf32> to vector<256x128xf32>
    %9 = arith.negf %8 : vector<256x128xf32>
    %10 = math.exp %9 : vector<256x128xf32>
    %cst_5 = arith.constant 1.000000e+00 : f32
    %11 = vector.broadcast %cst_5 : f32 to vector<256x128xf32>
    %12 = arith.addf %11, %10 : vector<256x128xf32>
    %13 = arith.divf %11, %12 : vector<256x128xf32>
    %14 = vector.extract_strided_slice %6 {offsets = [0, 256], sizes = [256, 128], strides = [1, 1]} : vector<256x384xf32> to vector<256x128xf32>
    %15 = arith.mulf %14, %13 : vector<256x128xf32>
    %16 = arith.addf %7, %15 : vector<256x128xf32>
    %17 = math.tanh %16 : vector<256x128xf32>
    %18 = arith.truncf %17 : vector<256x128xf32> to vector<256x128xbf16>
    %c0_6 = arith.constant 0 : index
    %c0_7 = arith.constant 0 : index
    %19 = vector.load %arg4[%c0_6, %c0_7] : memref<128x384xbf16, #tpu.memory_space<vmem>>, vector<128x384xbf16>
    %cst_8 = arith.constant dense<0.000000e+00> : vector<256x384xf32>
    %20 = tpu.matmul %18, %19, %cst_8 {dimension_numbers = #tpu.dot_dimension_numbers<[1], [0], [0], [1], [0, 0, 1, 1], [], []>} : vector<256x128xbf16>, vector<128x384xbf16>, vector<256x384xf32> -> vector<256x384xf32>
    %c0_9 = arith.constant 0 : index
    %c0_10 = arith.constant 0 : index
    %21 = vector.load %arg5[%c0_9, %c0_10] : memref<1x384xf32, #tpu.memory_space<vmem>>, vector<1x384xf32>
    %22 = vector.broadcast %21 : vector<1x384xf32> to vector<256x384xf32>
    %23 = arith.addf %20, %22 : vector<256x384xf32>
    %24 = vector.extract_strided_slice %23 {offsets = [0, 0], sizes = [256, 128], strides = [1, 1]} : vector<256x384xf32> to vector<256x128xf32>
    %25 = vector.extract_strided_slice %23 {offsets = [0, 128], sizes = [256, 128], strides = [1, 1]} : vector<256x384xf32> to vector<256x128xf32>
    %26 = arith.negf %25 : vector<256x128xf32>
    %27 = math.exp %26 : vector<256x128xf32>
    %cst_11 = arith.constant 1.000000e+00 : f32
    %28 = vector.broadcast %cst_11 : f32 to vector<256x128xf32>
    %29 = arith.addf %28, %27 : vector<256x128xf32>
    %30 = arith.divf %28, %29 : vector<256x128xf32>
    %31 = vector.extract_strided_slice %23 {offsets = [0, 256], sizes = [256, 128], strides = [1, 1]} : vector<256x384xf32> to vector<256x128xf32>
    %32 = arith.mulf %31, %30 : vector<256x128xf32>
    %33 = arith.addf %24, %32 : vector<256x128xf32>
    %34 = arith.truncf %33 : vector<256x128xf32> to vector<256x128xbf16>
    %c0_12 = arith.constant 0 : index
    %c0_13 = arith.constant 0 : index
    %35 = vector.load %arg6[%c0_12, %c0_13] : memref<256x128xbf16, #tpu.memory_space<vmem>>, vector<256x128xbf16>
    tpu.vector_store %arg6[%c0_12, %c0_13], %34 {strides = array<i32>} : memref<256x128xbf16, #tpu.memory_space<vmem>>, vector<256x128xbf16>,
    return
  }
  func.func @transform_0(%arg0: i32) -> (i32, i32) {
    %c0_i32 = arith.constant 0 : i32
    %c0_i32_0 = arith.constant 0 : i32
    return %arg0, %c0_i32 : i32, i32
  }
  func.func @transform_1(%arg0: i32) -> (i32, i32) {
    %c0_i32 = arith.constant 0 : i32
    %c0_i32_0 = arith.constant 0 : i32
    %c0_i32_1 = arith.constant 0 : i32
    return %c0_i32, %c0_i32_0 : i32, i32
  }
  func.func @transform_2(%arg0: i32) -> (i32, i32) {
    %c0_i32 = arith.constant 0 : i32
    %c0_i32_0 = arith.constant 0 : i32
    %c0_i32_1 = arith.constant 0 : i32
    return %c0_i32, %c0_i32_0 : i32, i32
  }
  func.func @transform_3(%arg0: i32) -> (i32, i32) {
    %c0_i32 = arith.constant 0 : i32
    %c0_i32_0 = arith.constant 0 : i32
    %c0_i32_1 = arith.constant 0 : i32
    return %c0_i32, %c0_i32_0 : i32, i32
  }
  func.func @transform_4(%arg0: i32) -> (i32, i32) {
    %c0_i32 = arith.constant 0 : i32
    %c0_i32_0 = arith.constant 0 : i32
    %c0_i32_1 = arith.constant 0 : i32
    return %c0_i32, %c0_i32_0 : i32, i32
  }
  func.func @transform_5(%arg0: i32) -> (i32, i32) {
    %c0_i32 = arith.constant 0 : i32
    %c0_i32_0 = arith.constant 0 : i32
    return %arg0, %c0_i32 : i32, i32
  }
}

</mosaic_0001>

<bundles_post_ra>
// kernel: tpu_custom_call.1
= control target key start
LH: loop header
LB: loop body
LE: loop exit
PB: predicated region body
PF: predicated region fallthrough
CT: control target
= control target key end

     0   :  { %10 = vsyncpa [#allocation3], 0  ;;  %s3726_s0 = inlined_call_operand.vmem [shape: f32[512,16], index: 0, kind: input, shape index: {}]   ;;  %s3727_s1 = inlined_call_operand.vmem [shape: bf16[16,384], index: 1, kind: input, shape index: {}]   ;;  %s3728_s2 = inlined_call_operand.vmem [shape: f32[1,384], index: 2, kind: input, shape index: {}]   ;;  %s3729_s3 = inlined_call_operand.vmem [shape: bf16[128,384], index: 3, kind: input, shape index: {}]   ;;  %s3730_s4 = inlined_call_operand.vmem [shape: f32[1,384], index: 4, kind: input, shape index: {}]   ;;  %s3731_s5 = inlined_call_operand.hbm [shape: bf16[512,128], index: 5, kind: output, shape index: {}]  }
   0x1   :  { %12 = vsyncpa [#allocation3 + $0x1], 0  ;;  %s2954_s18 = smov 0   ;;  %s2956_s19 = smov 0  }
   0x2   :  { %s2958_s20 = smov 0   ;;  %s2960_s21 = smov 0  }
   0x3 LB: > { %s2975_s22 = sadd.s32 4294967295, %s2918_s21   ;;  %s2042_s23 = sadd.s32 4294967294, %s2918_s21   ;;  %s2918_s21 = sphi %s2960_s21, %s3737_s21   ;;  %s2914_s20 = sphi %s2958_s20, %s3736_s20   ;;  %s2910_s19 = sphi %s2956_s19, %s3735_s19   ;;  %s2906_s18 = sphi %s2954_s18, %s3734_s18  }
   0x4   : > { %s2979_s24 = sadd.s32 1, %s2918_s21   ;;  %s135_s25 = sadd.s32 1, %s2914_s20 }
   0x5   : > { %s132_s26 = ssub.s32 %s2918_s21, %s2979_s24  ;;  %p145_p0 = scmp.ne.s32.totalorder %s2914_s20, %s2910_s19 }
   0x6   : > { %p133_p1 = scmp.eq.s32.totalorder %s132_s26, 0  ;;  %p146_p2 = scmp.eq.s32.totalorder %s2975_s22, 1 }
   0x7   : > { %p151_p3 = scmp.ne.s32.totalorder %s2910_s19, %s2906_s18  ;;  %p152_p4 = scmp.eq.s32.totalorder %s2042_s23, 1 }
   0x8   : > { %s2990_s27 = scalar_select %p133_p1, %s2914_s20, %s135_s25  }
   0x9   : > { %p2992_p5 = por %p146_p2, %p145_p0  ;;  %p2996_p6 = por %p152_p4, %p151_p3 }
   0xa   : > { %p2045_p7 = scmp.ge.s32.totalorder %s2918_s21, 1  ;;  %p191_p8 = scmp.lt.s32.totalorder %s2918_s21, 3 }
   0xc   : > { %p192_p9 = pnand %p2045_p7, %p191_p8 }
   0xd   : > { %s2047_s7 = sshll.u32 (!%p192_p9), %s2975_s22, 5  ;;  %s216_s26 = sand.u32 (!%p192_p9), 1, %s2910_s19  }
   0xe   : > { %195 = sbr.rel (%p192_p9) target bundleno = 652 (0x28c), region = 40  ;;  %p220_p10 = scmp.lt.s32.totalorder (!%p192_p9), %s2047_s7, 63 }
   0xf   : > { %s2046_s30 = sshll.u32 (!%p192_p9), %s216_s26, 7  ;;  %s3686_s12 = scalar_lea.sflag (!%p192_p9), [#allocation3], %s216_s26 }
  0x10   : > { %s3495_s6 = scalar_lea.vmem (!%p192_p9), [#allocation2], %s2046_s30 }
  0x11   : > { %s1980_s8 = sshll.u32 (!%p192_p9), %s3495_s6, 4  ;;  %s3681_s8 = int_to_ptr.vmem [resolvable:$true] %s1980_s8 }
  0x12   : > { %s2858_s13 = scalar_lea.vmem (!%p192_p9), %s3681_s8, 2048 }
  0x13   : > { %v2502_v0 = vld [vmem:[%s3727_s1 + $0x4] ss:$12 sps:$4 sm:$0xff]   ;;  %v2504_v1 = vld [vmem:[%s3727_s1] ss:$12 sps:$4 sm:$0xff]   ;;  %v2920_v2 = vmov 0   ;;  %s3739_s7 = smov (!%p220_p10, %s2047_s7), 63  ;;  %p2859_p11 = scmp.ne.s32.totalorder %s3681_s8, %s2858_s13 }
  0x14   : > { %393 = vmatprep.mubr.bf16.mxu0 %v2920_v2  ;;  %375 = vmatprep.subr.bf16.mxu0 %v2502_v0  ;;  %v2505_v3 = vld [vmem:[%s3727_s1 + $0x8] ss:$12 sps:$4 sm:$0xff]   ;;  %v2508_v4 = vld [vmem:[%s3729_s3 + $0xac] ss:$12 sps:$4 sm:$0xff]   ;;  %s2048_s14 = sshll.u32 %s3739_s7, 3  ;;  %vm312_vm0 = vcmask 130048  }
  0x15   : > { %376 = vmatpush1.bf16.msra.mxu0 %v2504_v1  ;;  %2378 = vmatprep.subr.bf16.mxu1 %v2505_v3  ;;  %s3019_s17 = scalar_lea.vmem %s3726_s0, %s2048_s14  ;;  %v2506_v5 = vld [vmem:[%s3729_s3 + $0xa8] ss:$12 sps:$4 sm:$0xff]   ;;  %v2509_v54 = vld [vmem:[%s3729_s3 + $0x90] ss:$12 sps:$4 sm:$0xff]   ;;  %v2512_v56 = vld [vmem:[%s3729_s3 + $0x78] ss:$12 sps:$4 sm:$0xff]   ;;  %p2860_p12 = pnand %p2859_p11, %p2992_p5 }
  0x16   : > { %2379 = vmatpush3.bf16.msra.mxu1 %v2505_v3  ;;  %v227_v6 = vld [vmem:[%s3019_s17] sm:$0xff]  ;;  %v228_v7 = vld [vmem:[%s3019_s17 + $0x8] sm:$0xff]  ;;  %v229_v8 = vld [vmem:[%s3019_s17 + $0x10] sm:$0xff]  ;;  %s2241_s7 = sshll.u32 %s2975_s22, 11  ;;  %s2921_s22 = smov [#allocation2]  }
  0x17   : > { %1196 = vmatprep.subr.bf16.mxu1 %v2508_v4  ;;  %v259_v9 = vpack.c.bf16 %v228_v7, %v227_v6  ;;  %v230_v10 = vld [vmem:[%s3019_s17 + $0x18] sm:$0xff]  ;;  %v231_v11 = vld [vmem:[%s3019_s17 + $0x20] sm:$0xff]  ;;  %v232_v12 = vld [vmem:[%s3019_s17 + $0x28] sm:$0xff]  ;;  %s3679_s11 = scalar_lea.hbm %s3731_s5, %s2241_s7  ;;  %p2861_p13 = pneg %p2860_p12 }
  0x18   : > { %v260_v13 = vpack.c.bf16 %v230_v10, %v229_v8  ;;  %v261_v14 = vpack.c.bf16 %v232_v12, %v231_v11  ;;  %v233_v15 = vld [vmem:[%s3019_s17 + $0x30] sm:$0xff]  ;;  %v234_v16 = vld [vmem:[%s3019_s17 + $0x38] sm:$0xff]  ;;  %v235_v17 = vld [vmem:[%s3019_s17 + $0x40] sm:$0xff]  ;;  %s2862_s14 = sshll.u32 %s2921_s22, 4  ;;  %s2863_s14 = int_to_ptr.vmem [resolvable:$false] %s2862_s14 }
  0x19   : > { %2052 = vmatmul.mubr.msk.bf16.vlgmr.msra.gmra.mxu0 %vm312_vm0, %v259_v9  ;;  %2380 = vmatprep.mubr.msk.bf16.mxu1 %vm312_vm0, %v259_v9  ;;  %v236_v18 = vld [vmem:[%s3019_s17 + $0x48] sm:$0xff]  ;;  %v262_v19 = vpack.c.bf16 %v234_v16, %v233_v15  ;;  %v237_v21 = vld [vmem:[%s3019_s17 + $0x50] sm:$0xff]  ;;  %v238_v22 = vld [vmem:[%s3019_s17 + $0x58] sm:$0xff]  ;;  %s2864_s15 = scalar_lea.vmem %s2863_s14, 4096  ;;  %p2865_p0 = scmp.lt.s32.totalorder %s3681_s8, %s2863_s14 }
  0x1a   : > { %403 = vmatprep.mubr.bf16.mxu0 %v2920_v2  ;;  %2381 = vmatmul.mubr.msk.bf16.vlgmr.msra.gmra.mxu1 %vm312_vm0, %v260_v13  ;;  %v263_v20 = vpack.c.bf16 %v236_v18, %v235_v17  ;;  %v239_v23 = vld [vmem:[%s3019_s17 + $0x60] sm:$0xff]  ;;  %v240_v24 = vld [vmem:[%s3019_s17 + $0x68] sm:$0xff]  ;;  %v264_v25 = vpack.c.bf16 %v238_v22, %v237_v21  ;;  %v241_v27 = vld [vmem:[%s3019_s17 + $0x70] sm:$0xff]  ;;  %p2866_p1 = scmp.lt.s32.totalorder %s2864_s15, %s2858_s13 }
  0x1b   : > { %2384 = vmatprep.mubr.msk.bf16.mxu1 %vm312_vm0, %v261_v14  ;;  %1197 = vmatpush1.bf16.msra.mxu1 %v2506_v5  ;;  %v265_v26 = vpack.c.bf16 %v240_v24, %v239_v23  ;;  %v242_v28 = vld [vmem:[%s3019_s17 + $0x78] sm:$0xff]  ;;  %v243_v29 = vld [vmem:[%s3019_s17 + $0x80] sm:$0xff]  ;;  %v244_v30 = vld [vmem:[%s3019_s17 + $0x88] sm:$0xff] }
  0x1c   : > { %v266_v31 = vpack.c.bf16 %v242_v28, %v241_v27  ;;  %v267_v32 = vpack.c.bf16 %v244_v30, %v243_v29  ;;  %v245_v33 = vld [vmem:[%s3019_s17 + $0x90] sm:$0xff]  ;;  %v246_v34 = vld [vmem:[%s3019_s17 + $0x98] sm:$0xff]  ;;  %v247_v35 = vld [vmem:[%s3019_s17 + $0xa0] sm:$0xff]  ;;  %p2867_p2 = por %p2866_p1, %p2865_p0 }
  0x1d   : > { %v248_v36 = vld [vmem:[%s3019_s17 + $0xa8] sm:$0xff]  ;;  %v268_v37 = vpack.c.bf16 %v246_v34, %v245_v33  ;;  %v249_v39 = vld [vmem:[%s3019_s17 + $0xb0] sm:$0xff]  ;;  %v250_v40 = vld [vmem:[%s3019_s17 + $0xb8] sm:$0xff] }
  0x1e   : > { %v269_v38 = vpack.c.bf16 %v248_v36, %v247_v35  ;;  %v251_v41 = vld [vmem:[%s3019_s17 + $0xc0] sm:$0xff]  ;;  %v252_v42 = vld [vmem:[%s3019_s17 + $0xc8] sm:$0xff]  ;;  %v270_v43 = vpack.c.bf16 %v250_v40, %v249_v39  ;;  %v253_v45 = vld [vmem:[%s3019_s17 + $0xd0] sm:$0xff]  ;;  %p2868_p3 = pnand %p2867_p2, %p2861_p13 }
  0x1f   : > { %v271_v44 = vpack.c.bf16 %v252_v42, %v251_v41  ;;  %v254_v46 = vld [vmem:[%s3019_s17 + $0xd8] sm:$0xff]  ;;  %v255_v47 = vld [vmem:[%s3019_s17 + $0xe0] sm:$0xff]  ;;  %v256_v48 = vld [vmem:[%s3019_s17 + $0xe8] sm:$0xff] }
  0x20   : > { %v272_v49 = vpack.c.bf16 %v254_v46, %v253_v45  ;;  %v273_v50 = vpack.c.bf16 %v256_v48, %v255_v47  ;;  %v257_v51 = vld [vmem:[%s3019_s17 + $0xf0] sm:$0xff]  ;;  %v258_v52 = vld [vmem:[%s3019_s17 + $0xf8] sm:$0xff]  ;;  %v2515_v59 = vld [vmem:[%s3729_s3 + $0x60] ss:$12 sps:$4 sm:$0xff]  }
  0x21   : > { %2053 = vmatmul.mubr.msk.bf16.gmra.mxu0 %vm312_vm0, %v260_v13  ;;  %v274_v53 = vpack.c.bf16 %v258_v52, %v257_v51  ;;  %v2511_v55 = vld [vmem:[%s3729_s3 + $0x94] ss:$12 sps:$4 sm:$0xff]   ;;  %v2514_v57 = vld [vmem:[%s3729_s3 + $0x7c] ss:$12 sps:$4 sm:$0xff]   ;;  %v2517_v60 = vld [vmem:[%s3729_s3 + $0x64] ss:$12 sps:$4 sm:$0xff]   ;;  %v281_v13 = vlaneseq }
  0x22   : > { %413 = vmatprep.mubr.bf16.mxu0 %v2920_v2  ;;  %2385 = vmatmul.mubr.msk.bf16.gmra.mxu1 %vm312_vm0, %v262_v19  ;;  %v2521_v58 = vld [vmem:[%s3729_s3 + $0xb0] ss:$12 sps:$4 sm:$0xff]   ;;  %v2525_v61 = vld [vmem:[%s3729_s3 + $0x98] ss:$12 sps:$4 sm:$0xff]   ;;  %v2529_v63 = vld [vmem:[%s3729_s3 + $0x80] ss:$12 sps:$4 sm:$0xff]  }
  0x23   : > { %2388 = vmatprep.mubr.msk.bf16.mxu1 %vm312_vm0, %v263_v20  ;;  %1198 = vmatprep.subr.bf16.mxu1 %v2511_v55  ;;  %v2520_v62 = vld [vmem:[%s3729_s3 + $0x4c] ss:$12 sps:$4 sm:$0xff]   ;;  %v2518_v0 = vld [vmem:[%s3729_s3 + $0x48] ss:$12 sps:$4 sm:$0xff]   ;;  %v2522_v4 = vld [vmem:[%s3729_s3 + $0x30] ss:$12 sps:$4 sm:$0xff]  }
  0x24   : > { %1199 = vmatpush1.bf16.msra.mxu1 %v2509_v54  ;;  %2412 = vmatprep.subr.bf16.mxu0 %v2521_v58  ;;  %v2524_v1 = vld [vmem:[%s3729_s3 + $0x34] ss:$12 sps:$4 sm:$0xff]   ;;  %v2528_v5 = vld [vmem:[%s3729_s3 + $0x1c] ss:$12 sps:$4 sm:$0xff]   ;;  %v2526_v7 = vld [vmem:[%s3729_s3 + $0x18] ss:$12 sps:$4 sm:$0xff]  }
  0x25   : > { %1200 = vmatprep.subr.bf16.mxu1 %v2514_v57  ;;  %2413 = vmatpush3.bf16.msra.mxu0 %v2521_v58  ;;  %v2530_v3 = vld [vmem:[%s3729_s3 + $0x68] ss:$12 sps:$4 sm:$0xff]   ;;  %v2534_v6 = vld [vmem:[%s3729_s3 + $0x50] ss:$12 sps:$4 sm:$0xff]   ;;  %v2535_v9 = vld [vmem:[%s3729_s3 + $0x38] ss:$12 sps:$4 sm:$0xff]  }
  0x26   : > { %2414 = vmatprep.subr.bf16.mxu0 %v2525_v61  ;;  %v2533_v8 = vld [vmem:[%s3729_s3 + $0x4] ss:$12 sps:$4 sm:$0xff]   ;;  %v2531_v10 = vld [vmem:[%s3729_s3] ss:$12 sps:$4 sm:$0xff]   ;;  %v2537_v12 = vld [vmem:[%s3729_s3 + $0x8] ss:$12 sps:$4 sm:$0xff]  }
  0x27   : > { %v2536_v11 = vld [vmem:[%s3729_s3 + $0x20] ss:$12 sps:$4 sm:$0xff]  }
  0x28   : > { %1201 = vmatpush1.bf16.msra.mxu1 %v2512_v56  ;;  %v279_v16 = vld [vmem:[%s3728_s2] sm:$0x7] }
  0x29   : > { %2054 = vmatmul.mubr.msk.bf16.gmra.mxu0 %vm312_vm0, %v261_v14  ;;  %1202 = vmatprep.subr.bf16.mxu1 %v2517_v60  ;;  %v3170_v14 = vshrl.u32 %v281_v13, 7 }
  0x2a   : > { %423 = vmatprep.mubr.bf16.mxu0 %v2920_v2  ;;  %2389 = vmatmul.mubr.msk.bf16.gmra.mxu1 %vm312_vm0, %v264_v25 }
  0x2b   : > { %2392 = vmatprep.mubr.msk.bf16.mxu1 %vm312_vm0, %v265_v26  ;;  %2415 = vmatpush3.bf16.msra.mxu0 %v2525_v61  ;;  %v287_v15 = vsub.s32 1, %v3170_v14  ;;  %v283_v54 = vsub.s32 0, %v3170_v14 }
  0x2c   : > { %1203 = vmatpush1.bf16.msra.mxu1 %v2515_v59  ;;  %2416 = vmatprep.subr.bf16.mxu0 %v2529_v63 }
  0x2d   : > { %1204 = vmatprep.subr.bf16.mxu1 %v2520_v62  ;;  %v3178_v17 = vrot.slane %v279_v16, %v287_v15 }
  0x2f   : > { %2417 = vmatpush3.bf16.msra.mxu0 %v2529_v63  ;;  %v3214_v63 = vrot.slane %v279_v16, %v283_v54 }
  0x30   : > { %1205 = vmatpush1.bf16.msra.mxu1 %v2518_v0  ;;  %2418 = vmatprep.subr.bf16.mxu0 %v2530_v3 }
  0x31   : > { %2055 = vmatmul.mubr.msk.bf16.gmra.mxu0 %vm312_vm0, %v262_v19  ;;  %1206 = vmatprep.subr.bf16.mxu1 %v2524_v1 }
  0x32   : > { %433 = vmatprep.mubr.bf16.mxu0 %v2920_v2  ;;  %2393 = vmatmul.mubr.msk.bf16.gmra.mxu1 %vm312_vm0, %v266_v31 }
  0x33   : > { %2396 = vmatprep.mubr.msk.bf16.mxu1 %vm312_vm0, %v267_v32  ;;  %2419 = vmatpush3.bf16.msra.mxu0 %v2530_v3 }
  0x34   : > { %1207 = vmatpush1.bf16.msra.mxu1 %v2522_v4  ;;  %2420 = vmatprep.subr.bf16.mxu0 %v2534_v6 }
  0x35   : > { %1208 = vmatprep.subr.bf16.mxu1 %v2528_v5 }
  0x37   : > { %2421 = vmatpush3.bf16.msra.mxu0 %v2534_v6 }
  0x38   : > { %1209 = vmatpush1.bf16.msra.mxu1 %v2526_v7  ;;  %2422 = vmatprep.subr.bf16.mxu0 %v2535_v9 }
  0x39   : > { %2056 = vmatmul.mubr.msk.bf16.gmra.mxu0 %vm312_vm0, %v263_v20  ;;  %1210 = vmatprep.subr.bf16.mxu1 %v2533_v8 }
  0x3a   : > { %443 = vmatprep.mubr.bf16.mxu0 %v2920_v2  ;;  %2397 = vmatmul.mubr.msk.bf16.gmra.mxu1 %vm312_vm0, %v268_v37 }
  0x3b   : > { %2400 = vmatprep.mubr.msk.bf16.mxu1 %vm312_vm0, %v269_v38  ;;  %2423 = vmatpush3.bf16.msra.mxu0 %v2535_v9 }
  0x3c   : > { %1211 = vmatpush1.bf16.msra.mxu1 %v2531_v10  ;;  %2424 = vmatprep.subr.bf16.mxu0 %v2536_v11 }
  0x3f   : > { %2425 = vmatpush3.bf16.msra.mxu0 %v2536_v11 }
  0x40   : > { %2426 = vmatprep.subr.bf16.mxu0 %v2537_v12 }
  0x41   : > { %2057 = vmatmul.mubr.msk.bf16.gmra.mxu0 %vm312_vm0, %v264_v25 }
  0x42   : > { %453 = vmatprep.mubr.bf16.mxu0 %v2920_v2  ;;  %2401 = vmatmul.mubr.msk.bf16.gmra.mxu1 %vm312_vm0, %v270_v43 }
  0x43   : > { %2404 = vmatprep.mubr.msk.bf16.mxu1 %vm312_vm0, %v271_v44  ;;  %2427 = vmatpush3.bf16.msra.mxu0 %v2537_v12 }
  0x49   : > { %2058 = vmatmul.mubr.msk.bf16.gmra.mxu0 %vm312_vm0, %v265_v26 }
  0x4a   : > { %463 = vmatprep.mubr.bf16.mxu0 %v2920_v2  ;;  %2405 = vmatmul.mubr.msk.bf16.gmra.mxu1 %vm312_vm0, %v272_v49 }
  0x4b   : > { %2408 = vmatprep.mubr.msk.bf16.mxu1 %vm312_vm0, %v273_v50 }
  0x51   : > { %2059 = vmatmul.mubr.msk.bf16.gmra.mxu0 %vm312_vm0, %v266_v31 }
  0x52   : > { %473 = vmatprep.mubr.bf16.mxu0 %v2920_v2  ;;  %2409 = vmatmul.mubr.msk.bf16.gmra.mxu1 %vm312_vm0, %v274_v53 }
  0x53   : > { %1228 = vmatprep.mubr.bf16.mxu1 %v2920_v2 }
  0x59   : > { %2060 = vmatmul.mubr.msk.bf16.gmra.mxu0 %vm312_vm0, %v267_v32 }
  0x5a   : > { %483 = vmatprep.mubr.bf16.mxu0 %v2920_v2 }
  0x61   : > { %2061 = vmatmul.mubr.msk.bf16.gmra.mxu0 %vm312_vm0, %v268_v37 }
  0x62   : > { %493 = vmatprep.mubr.bf16.mxu0 %v2920_v2 }
  0x69   : > { %2062 = vmatmul.mubr.msk.bf16.gmra.mxu0 %vm312_vm0, %v269_v38 }
  0x6a   : > { %503 = vmatprep.mubr.bf16.mxu0 %v2920_v2 }
  0x71   : > { %2063 = vmatmul.mubr.msk.bf16.gmra.mxu0 %vm312_vm0, %v270_v43 }
  0x72   : > { %513 = vmatprep.mubr.bf16.mxu0 %v2920_v2 }
  0x79   : > { %2064 = vmatmul.mubr.msk.bf16.gmra.mxu0 %vm312_vm0, %v271_v44 }
  0x7a   : > { %523 = vmatprep.mubr.bf16.mxu0 %v2920_v2 }
  0x81   : > { %2065 = vmatmul.mubr.msk.bf16.gmra.mxu0 %vm312_vm0, %v272_v49 }
  0x82   : > { %533 = vmatprep.mubr.bf16.mxu0 %v2920_v2 }
  0x89   : > { %2066 = vmatmul.mubr.msk.bf16.gmra.mxu0 %vm312_vm0, %v273_v50  ;;  %v291_v50 = vsub.s32 2, %v3170_v14 }
  0x8a   : > { %543 = vmatprep.mubr.bf16.mxu0 %v2920_v2 }
  0x8b   : > { %v3207_v58 = vrot.slane %v279_v16, %v291_v50 }
  0x91   : > { %2067 = vmatmul.mubr.msk.bf16.gmra.mxu0 %vm312_vm0, %v274_v53 }
  0xd9   : > { %v3180_v18 = vpop.f32.mrf.mxu0 }
  0xda   : > { %v2382_v45 = vpop.f32.mrf.mxu1  ;;  %v396_v10 = vadd.f32 %v3180_v18, %v3214_v63 }
  0xdb   : > { %v397_v19 = vpop.f32.mrf.mxu0 }
  0xdc   : > { %v398_v20 = vadd.f32 %v397_v19, %v3178_v17  ;;  %v588_v53 = vpop.f32.mrf.mxu1 }
  0xdd   : > { %v3183_v21 = vpop.f32.mrf.mxu0  ;;  %v589_v4 = vadd.f32 %v588_v53, %v3207_v58 }
  0xde   : > { %v2084_v22 = vmul.f32 -1.442695, %v398_v20  ;;  %v2383_v61 = vpop.f32.mrf.mxu1 }
  0xdf   : > { %v401_v23 = vpop.f32.mrf.mxu0 }
  0xe0   : > { %2538 = vpow2.f32 %v2084_v22  ;;  %v402_v24 = vadd.f32 %v401_v23, %v3178_v17  ;;  %v591_v7 = vpop.f32.mrf.mxu1 }
  0xe1   : > { %v3186_v25 = vpop.f32.mrf.mxu0  ;;  %v592_v20 = vadd.f32 %v591_v7, %v3207_v58 }
  0xe2   : > { %v2085_v26 = vmul.f32 -1.442695, %v402_v24 }
  0xe3   : > { %v407_v27 = vpop.f32.mrf.mxu0 }
  0xe4   : > { %2540 = vpow2.f32 %v2085_v26  ;;  %v408_v28 = vadd.f32 %v407_v27, %v3178_v17  ;;  %v400_v27 = vadd.f32 %v3183_v21, %v3214_v63  ;;  %v406_v21 = vadd.f32 %v3186_v25, %v3214_v63 }
  0xe5   : > { %v3189_v29 = vpop.f32.mrf.mxu0 }
  0xe6   : > { %v2086_v30 = vmul.f32 -1.442695, %v408_v28  ;;  %v410_v25 = vadd.f32 %v3189_v29, %v3214_v63 }
  0xe7   : > { %v411_v31 = vpop.f32.mrf.mxu0 }
  0xe8   : > { %2542 = vpow2.f32 %v2086_v30  ;;  %v412_v32 = vadd.f32 %v411_v31, %v3178_v17  ;;  %v3228_v30 = vpop.f32.mrf.mxu1 }
  0xe9   : > { %v3192_v33 = vpop.f32.mrf.mxu0 }
  0xea   : > { %v2087_v34 = vmul.f32 -1.442695, %v412_v32 }
  0xeb   : > { %v417_v35 = vpop.f32.mrf.mxu0 }
  0xec   : > { %2544 = vpow2.f32 %v2087_v34  ;;  %v418_v36 = vadd.f32 %v417_v35, %v3178_v17  ;;  %v597_v34 = vadd.f32 %v2382_v45, %v3207_v58  ;;  %v600_v45 = vadd.f32 %v2383_v61, %v3207_v58 }
  0xed   : > { %v2539_v37 = vpop.eup %2538  ;;  %v3195_v38 = vpop.f32.mrf.mxu0 }
  0xee   : > { %v811_v39 = vadd.f32 1.0, %v2539_v37  ;;  %v2088_v40 = vmul.f32 -1.442695, %v418_v36 }
  0xef   : > { %v421_v41 = vpop.f32.mrf.mxu0 }
  0xf0   : > { %2546 = vrcp.f32 %v811_v39  ;;  %v422_v42 = vadd.f32 %v421_v41, %v3178_v17 }
  0xf1   : > { %v2541_v43 = vpop.eup %2540  ;;  %2548 = vpow2.f32 %v2088_v40  ;;  %v3198_v44 = vpop.f32.mrf.mxu0 }
  0xf2   : > { %v812_v46 = vadd.f32 1.0, %v2541_v43  ;;  %v2089_v47 = vmul.f32 -1.442695, %v422_v42  ;;  %v604_v43 = vpop.f32.mrf.mxu1 }
  0xf3   : > { %v427_v48 = vpop.f32.mrf.mxu0 }
  0xf4   : > { %2550 = vrcp.f32 %v812_v46  ;;  %v428_v49 = vadd.f32 %v427_v48, %v3178_v17 }
  0xf5   : > { %v2543_v51 = vpop.eup %2542  ;;  %2552 = vpow2.f32 %v2089_v47  ;;  %v3202_v52 = vpop.f32.mrf.mxu0 }
  0xf6   : > { %v813_v55 = vadd.f32 1.0, %v2543_v51  ;;  %v2090_v56 = vmul.f32 -1.442695, %v428_v49 }
  0xf7   : > { %v431_v57 = vpop.f32.mrf.mxu0 }
  0xf8   : > { %2554 = vrcp.f32 %v813_v55  ;;  %v432_v59 = vadd.f32 %v431_v57, %v3178_v17 }
  0xf9   : > { %v2545_v60 = vpop.eup %2544  ;;  %2556 = vpow2.f32 %v2090_v56  ;;  %v3210_v62 = vpop.f32.mrf.mxu0 }
  0xfa   : > { %v814_v0 = vadd.f32 1.0, %v2545_v60  ;;  %v2091_v1 = vmul.f32 -1.442695, %v432_v59  ;;  %v2387_v59 = vpop.f32.mrf.mxu1 }
  0xfb   : > { %v437_v3 = vpop.f32.mrf.mxu0 }
  0xfc   : > { %2558 = vrcp.f32 %v814_v0  ;;  %v438_v5 = vadd.f32 %v437_v3, %v3178_v17  ;;  %v607_v29 = vpop.f32.mrf.mxu1 }
  0xfd   : > { %v2547_v6 = vpop.eup %2546  ;;  %2560 = vpow2.f32 %v2091_v1  ;;  %v3218_v8 = vpop.f32.mrf.mxu0 }
  0xfe   : > { %v2549_v9 = vpop.eup %2548  ;;  %v907_v11 = vmul.f32 %v2547_v6, %v589_v4  ;;  %v2092_v12 = vmul.f32 -1.442695, %v438_v5  ;;  %v605_v4 = vadd.f32 %v604_v43, %v3207_v58 }
  0xff   : > { %v815_v13 = vadd.f32 1.0, %v2549_v9  ;;  %v441_v16 = vpop.f32.mrf.mxu0 }
 0x100   : > { %v939_v19 = vadd.f32 %v907_v11, %v396_v10  ;;  %2562 = vpow2.f32 %v2092_v12  ;;  %v442_v22 = vadd.f32 %v441_v16, %v3178_v17 }
 0x101   : > { %v2551_v23 = vpop.eup %2550  ;;  %2564 = vrcp.f32 %v815_v13  ;;  %v3224_v24 = vpop.f32.mrf.mxu0  ;;  %v416_v13 = vadd.f32 %v3192_v33, %v3214_v63 }
 0x102   : > { %v2553_v26 = vpop.eup %2552  ;;  %v908_v28 = vmul.f32 %v2551_v23, %v592_v20  ;;  %v2093_v18 = vmul.f32 -1.442695, %v442_v22  ;;  %2566 = vtanh.f32 %v939_v19  ;;  %v608_v20 = vadd.f32 %v607_v29, %v3207_v58  ;;  %v3252_v23 = vpop.f32.mrf.mxu1 }
 0x103   : > { %v816_v31 = vadd.f32 1.0, %v2553_v26  ;;  %v447_v32 = vpop.f32.mrf.mxu0 }
 0x104   : > { %v940_v35 = vadd.f32 %v908_v28, %v400_v27  ;;  %2568 = vpow2.f32 %v2093_v18  ;;  %v448_v36 = vadd.f32 %v447_v32, %v3178_v17  ;;  %v420_v32 = vadd.f32 %v3195_v38, %v3214_v63 }
 0x105   : > { %v2555_v37 = vpop.eup %2554  ;;  %2570 = vrcp.f32 %v816_v31  ;;  %v3232_v39 = vpop.f32.mrf.mxu0 }
 0x106   : > { %v2557_v40 = vpop.eup %2556  ;;  %v909_v41 = vmul.f32 %v2555_v37, %v597_v34  ;;  %2572 = vtanh.f32 %v940_v35  ;;  %v2094_v42 = vmul.f32 -1.442695, %v448_v36 }
 0x107   : > { %v817_v46 = vadd.f32 1.0, %v2557_v40  ;;  %v451_v47 = vpop.f32.mrf.mxu0  ;;  %v613_v40 = vadd.f32 %v3228_v30, %v3207_v58  ;;  %v426_v30 = vadd.f32 %v3198_v44, %v3214_v63 }
 0x108   : > { %v941_v48 = vadd.f32 %v909_v41, %v406_v21  ;;  %2574 = vpow2.f32 %v2094_v42  ;;  %v452_v49 = vadd.f32 %v451_v47, %v3178_v17  ;;  %v620_v42 = vpop.f32.mrf.mxu1 }
 0x109   : > { %v2559_v51 = vpop.eup %2558  ;;  %2576 = vrcp.f32 %v817_v46  ;;  %v3238_v53 = vpop.f32.mrf.mxu0 }
 0x10a   : > { %v2561_v55 = vpop.eup %2560  ;;  %v910_v56 = vmul.f32 %v2559_v51, %v600_v45  ;;  %v2095_v57 = vmul.f32 -1.442695, %v452_v49  ;;  %2578 = vtanh.f32 %v941_v48 }
 0x10b   : > { %v818_v60 = vadd.f32 1.0, %v2561_v55  ;;  %v457_v0 = vpop.f32.mrf.mxu0  ;;  %v616_v55 = vadd.f32 %v2387_v59, %v3207_v58 }
 0x10c   : > { %v942_v1 = vadd.f32 %v910_v56, %v410_v25  ;;  %2580 = vpow2.f32 %v2095_v57  ;;  %v458_v61 = vadd.f32 %v457_v0, %v3178_v17  ;;  %v3266_v25 = vpop.f32.mrf.mxu1 }
 0x10d   : > { %v2563_v3 = vpop.eup %2562  ;;  %2582 = vrcp.f32 %v818_v60  ;;  %v3244_v5 = vpop.f32.mrf.mxu0 }
 0x10e   : > { %v2565_v6 = vpop.eup %2564  ;;  %2584 = vtanh.f32 %v942_v1  ;;  %v819_v7 = vadd.f32 1.0, %v2563_v3  ;;  %v2096_v9 = vmul.f32 -1.442695, %v458_v61  ;;  %v430_v3 = vadd.f32 %v3202_v52, %v3214_v63 }
 0x10f   : > { %v911_v10 = vmul.f32 %v2565_v6, %v605_v4  ;;  %v461_v11 = vpop.f32.mrf.mxu0  ;;  %v2567_v12 = vpop.eup %2566  ;;  %v621_v6 = vadd.f32 %v620_v42, %v3207_v58  ;;  %v629_v42 = vadd.f32 %v3252_v23, %v3207_v58 }
 0x110   : > { %2586 = vrcp.f32 %v819_v7  ;;  %v462_v16 = vadd.f32 %v461_v11, %v3178_v17 }
 0x111   : > { %v2569_v19 = vpop.eup %2568  ;;  %2588 = vpow2.f32 %v2096_v9  ;;  %v3250_v22 = vpop.f32.mrf.mxu0  ;;  %v943_v28 = vadd.f32 %v911_v10, %v416_v13  ;;  %v436_v13 = vadd.f32 %v3210_v62, %v3214_v63 }
 0x112   : > { %v2571_v26 = vpop.eup %2570  ;;  %v820_v27 = vadd.f32 1.0, %v2569_v19  ;;  %v2097_v18 = vmul.f32 -1.442695, %v462_v16  ;;  %v623_v10 = vpop.f32.mrf.mxu1 }
 0x113   : > { %v2573_v31 = vpop.eup %2572  ;;  %v912_v33 = vmul.f32 %v2571_v26, %v608_v20  ;;  %v467_v34 = vpop.f32.mrf.mxu0 }
 0x114   : > { %2590 = vrcp.f32 %v820_v27  ;;  %v468_v35 = vadd.f32 %v467_v34, %v3178_v17  ;;  %v1003_v36 = vpack.c.bf16 %v2573_v31, %v2567_v12  ;;  %v624_v27 = vadd.f32 %v623_v10, %v3207_v58 }
 0x115   : > { %v2575_v37 = vpop.eup %2574  ;;  %v944_v21 = vadd.f32 %v912_v33, %v420_v32  ;;  %2592 = vpow2.f32 %v2097_v18  ;;  %v3259_v41 = vpop.f32.mrf.mxu0  ;;  %v440_v32 = vadd.f32 %v3218_v8, %v3214_v63 }
 0x116   : > { %v2577_v43 = vpop.eup %2576  ;;  %v821_v46 = vadd.f32 1.0, %v2575_v37  ;;  %2594 = vtanh.f32 %v943_v28  ;;  %v2098_v47 = vmul.f32 -1.442695, %v468_v35  ;;  %1229 = vmatmul.mubr.bf16.vlgmr.msra.gmra.mxu1 %v1003_v36  ;;  %2428 = vmatprep.mubr.bf16.mxu0 %v1003_v36  ;;  %v3285_v35 = vpop.f32.mrf.mxu1 }
 0x117   : > { %v913_v38 = vmul.f32 %v2577_v43, %v613_v40  ;;  %2596 = vtanh.f32 %v944_v21  ;;  %v471_v48 = vpop.f32.mrf.mxu0  ;;  %1238 = vmatprep.mubr.bf16.mxu1 %v2920_v2  ;;  %v2579_v45 = vpop.eup %2578 }
 0x118   : > { %2598 = vrcp.f32 %v821_v46  ;;  %v472_v49 = vadd.f32 %v471_v48, %v3178_v17 }
 0x119   : > { %v2581_v51 = vpop.eup %2580  ;;  %2600 = vpow2.f32 %v2098_v47  ;;  %v3268_v56 = vpop.f32.mrf.mxu0  ;;  %v945_v60 = vadd.f32 %v913_v38, %v426_v30 }
 0x11a   : > { %v2583_v57 = vpop.eup %2582  ;;  %v822_v0 = vadd.f32 1.0, %v2581_v51  ;;  %v2099_v1 = vmul.f32 -1.442695, %v472_v49  ;;  %v636_v51 = vpop.f32.mrf.mxu1 }
 0x11b   : > { %v2585_v61 = vpop.eup %2584  ;;  %v914_v44 = vmul.f32 %v2583_v57, %v616_v55  ;;  %v477_v4 = vpop.f32.mrf.mxu0 }
 0x11c   : > { %2602 = vrcp.f32 %v822_v0  ;;  %v478_v59 = vadd.f32 %v477_v4, %v3178_v17  ;;  %v1004_v7 = vpack.c.bf16 %v2585_v61, %v2579_v45  ;;  %v446_v45 = vadd.f32 %v3224_v24, %v3214_v63 }
 0x11d   : > { %v2587_v29 = vpop.eup %2586  ;;  %v946_v9 = vadd.f32 %v914_v44, %v430_v3  ;;  %2604 = vpow2.f32 %v2099_v1  ;;  %v3274_v11 = vpop.f32.mrf.mxu0  ;;  %v450_v3 = vadd.f32 %v3232_v39, %v3214_v63 }
 0x11e   : > { %v2589_v12 = vpop.eup %2588  ;;  %2606 = vtanh.f32 %v945_v60  ;;  %v915_v52 = vmul.f32 %v2587_v29, %v621_v6  ;;  %v2100_v16 = vmul.f32 -1.442695, %v478_v59  ;;  %1239 = vmatmul.mubr.bf16.gmra.mxu1 %v1004_v7  ;;  %2429 = vmatmul.mubr.bf16.vlgmr.msra.gmra.mxu0 %v1004_v7  ;;  %v632_v60 = vadd.f32 %v3266_v25, %v3207_v58  ;;  %v3302_v6 = vpop.f32.mrf.mxu1 }
 0x11f   : > { %2608 = vtanh.f32 %v946_v9  ;;  %v823_v19 = vadd.f32 1.0, %v2589_v12  ;;  %v481_v20 = vpop.f32.mrf.mxu0  ;;  %1248 = vmatprep.mubr.bf16.mxu1 %v2920_v2 }
 0x120   : > { %v947_v26 = vadd.f32 %v915_v52, %v436_v13  ;;  %2610 = vpow2.f32 %v2100_v16  ;;  %v482_v28 = vadd.f32 %v481_v20, %v3178_v17  ;;  %v637_v13 = vadd.f32 %v636_v51, %v3207_v58  ;;  %v639_v20 = vpop.f32.mrf.mxu1 }
 0x121   : > { %v2591_v18 = vpop.eup %2590  ;;  %2612 = vrcp.f32 %v823_v19  ;;  %v3281_v31 = vpop.f32.mrf.mxu0 }
 0x122   : > { %v2593_v62 = vpop.eup %2592  ;;  %v916_v33 = vmul.f32 %v2591_v18, %v624_v27  ;;  %v2101_v34 = vmul.f32 -1.442695, %v482_v28  ;;  %2614 = vtanh.f32 %v947_v26 }
 0x123   : > { %v2595_v36 = vpop.eup %2594  ;;  %v824_v37 = vadd.f32 1.0, %v2593_v62  ;;  %v487_v40 = vpop.f32.mrf.mxu0  ;;  %v456_v62 = vadd.f32 %v3238_v53, %v3214_v63  ;;  %v460_v53 = vadd.f32 %v3244_v5, %v3214_v63 }
 0x124   : > { %v2597_v21 = vpop.eup %2596  ;;  %v948_v43 = vadd.f32 %v916_v33, %v440_v32  ;;  %2616 = vpow2.f32 %v2101_v34  ;;  %v488_v46 = vadd.f32 %v487_v40, %v3178_v17  ;;  %v640_v34 = vadd.f32 %v639_v20, %v3207_v58 }
 0x125   : > { %v2599_v47 = vpop.eup %2598  ;;  %2618 = vrcp.f32 %v824_v37  ;;  %v3290_v38 = vpop.f32.mrf.mxu0  ;;  %v1005_v8 = vpack.c.bf16 %v2597_v21, %v2595_v36 }
 0x126   : > { %v2601_v48 = vpop.eup %2600  ;;  %v917_v30 = vmul.f32 %v2599_v47, %v629_v42  ;;  %2620 = vtanh.f32 %v948_v43  ;;  %v2102_v49 = vmul.f32 -1.442695, %v488_v46  ;;  %v3315_v37 = vpop.f32.mrf.mxu1 }
 0x127   : > { %v825_v55 = vadd.f32 1.0, %v2601_v48  ;;  %1249 = vmatmul.mubr.bf16.gmra.mxu1 %v1005_v8  ;;  %2432 = vmatprep.mubr.bf16.mxu0 %v1005_v8  ;;  %v491_v23 = vpop.f32.mrf.mxu0 }
 0x128   : > { %v949_v57 = vadd.f32 %v917_v30, %v446_v45  ;;  %2622 = vpow2.f32 %v2102_v49  ;;  %v492_v0 = vadd.f32 %v491_v23, %v3178_v17  ;;  %1258 = vmatprep.mubr.bf16.mxu1 %v2920_v2  ;;  %v645_v49 = vadd.f32 %v3285_v35, %v3207_v58  ;;  %v652_v23 = vpop.f32.mrf.mxu1 }
 0x129   : > { %v2603_v1 = vpop.eup %2602  ;;  %2624 = vrcp.f32 %v825_v55  ;;  %v3298_v24 = vpop.f32.mrf.mxu0 }
 0x12a   : > { %v2605_v61 = vpop.eup %2604  ;;  %v918_v44 = vmul.f32 %v2603_v1, %v632_v60  ;;  %v2103_v4 = vmul.f32 -1.442695, %v492_v0  ;;  %2626 = vtanh.f32 %v949_v57 }
 0x12b   : > { %v2607_v59 = vpop.eup %2606  ;;  %v826_v25 = vadd.f32 1.0, %v2605_v61  ;;  %v497_v7 = vpop.f32.mrf.mxu0 }
 0x12c   : > { %v2609_v29 = vpop.eup %2608  ;;  %v950_v9 = vadd.f32 %v918_v44, %v450_v3  ;;  %2628 = vpow2.f32 %v2103_v4  ;;  %v498_v10 = vadd.f32 %v497_v7, %v3178_v17  ;;  %v466_v3 = vadd.f32 %v3250_v22, %v3214_v63 }
 0x12d   : > { %v2611_v12 = vpop.eup %2610  ;;  %2630 = vrcp.f32 %v826_v25  ;;  %v3306_v52 = vpop.f32.mrf.mxu0  ;;  %v1006_v39 = vpack.c.bf16 %v2609_v29, %v2607_v59  ;;  %v648_v4 = vadd.f32 %v3302_v6, %v3207_v58  ;;  %v470_v22 = vadd.f32 %v3259_v41, %v3214_v63 }
 0x12e   : > { %v2613_v16 = vpop.eup %2612  ;;  %2632 = vtanh.f32 %v950_v9  ;;  %v827_v19 = vadd.f32 1.0, %v2611_v12  ;;  %v2104_v26 = vmul.f32 -1.442695, %v498_v10  ;;  %v3330_v59 = vpop.f32.mrf.mxu1 }
 0x12f   : > { %v919_v27 = vmul.f32 %v2613_v16, %v637_v13  ;;  %1259 = vmatmul.mubr.bf16.gmra.mxu1 %v1006_v39  ;;  %2433 = vmatmul.mubr.bf16.gmra.mxu0 %v1006_v39  ;;  %v501_v28 = vpop.f32.mrf.mxu0  ;;  %v2615_v18 = vpop.eup %2614  ;;  %v653_v16 = vadd.f32 %v652_v23, %v3207_v58  ;;  %v661_v23 = vadd.f32 %v3315_v37, %v3207_v58 }
 0x130   : > { %2634 = vrcp.f32 %v827_v19  ;;  %v502_v32 = vadd.f32 %v501_v28, %v3178_v17  ;;  %1268 = vmatprep.mubr.bf16.mxu1 %v2920_v2 }
 0x131   : > { %v2617_v33 = vpop.eup %2616  ;;  %2636 = vpow2.f32 %v2104_v26  ;;  %v3313_v36 = vpop.f32.mrf.mxu0  ;;  %v951_v42 = vadd.f32 %v919_v27, %v456_v62  ;;  %v476_v62 = vadd.f32 %v3268_v56, %v3214_v63 }
 0x132   : > { %v2619_v40 = vpop.eup %2618  ;;  %v828_v21 = vadd.f32 1.0, %v2617_v33  ;;  %v2105_v43 = vmul.f32 -1.442695, %v502_v32  ;;  %v655_v27 = vpop.f32.mrf.mxu1 }
 0x133   : > { %v2621_v46 = vpop.eup %2620  ;;  %v920_v47 = vmul.f32 %v2619_v40, %v640_v34  ;;  %v507_v8 = vpop.f32.mrf.mxu0 }
 0x134   : > { %2638 = vrcp.f32 %v828_v21  ;;  %v508_v48 = vadd.f32 %v507_v8, %v3178_v17  ;;  %v1007_v45 = vpack.c.bf16 %v2621_v46, %v2615_v18  ;;  %v656_v21 = vadd.f32 %v655_v27, %v3207_v58 }
 0x135   : > { %v2623_v30 = vpop.eup %2622  ;;  %v952_v51 = vadd.f32 %v920_v47, %v460_v53  ;;  %2640 = vpow2.f32 %v2105_v43  ;;  %v3322_v55 = vpop.f32.mrf.mxu0  ;;  %v480_v53 = vadd.f32 %v3274_v11, %v3214_v63 }
 0x136   : > { %v2625_v57 = vpop.eup %2624  ;;  %v829_v60 = vadd.f32 1.0, %v2623_v30  ;;  %2642 = vtanh.f32 %v951_v42  ;;  %v2106_v0 = vmul.f32 -1.442695, %v508_v48  ;;  %2436 = vmatprep.mubr.bf16.mxu0 %v1007_v45  ;;  %v3349_v48 = vpop.f32.mrf.mxu1 }
 0x137   : > { %v921_v5 = vmul.f32 %v2625_v57, %v645_v49  ;;  %2644 = vtanh.f32 %v952_v51  ;;  %1269 = vmatmul.mubr.bf16.gmra.mxu1 %v1007_v45  ;;  %v511_v1 = vpop.f32.mrf.mxu0  ;;  %v2627_v61 = vpop.eup %2626 }
 0x138   : > { %2646 = vrcp.f32 %v829_v60  ;;  %v512_v35 = vadd.f32 %v511_v1, %v3178_v17  ;;  %1278 = vmatprep.mubr.bf16.mxu1 %v2920_v2 }
 0x139   : > { %v2629_v44 = vpop.eup %2628  ;;  %2648 = vpow2.f32 %v2106_v0  ;;  %v3332_v25 = vpop.f32.mrf.mxu0  ;;  %v953_v29 = vadd.f32 %v921_v5, %v466_v3 }
 0x13a   : > { %v2631_v7 = vpop.eup %2630  ;;  %v830_v9 = vadd.f32 1.0, %v2629_v44  ;;  %v2107_v10 = vmul.f32 -1.442695, %v512_v35  ;;  %v668_v44 = vpop.f32.mrf.mxu1 }
 0x13b   : > { %v2633_v12 = vpop.eup %2632  ;;  %v922_v13 = vmul.f32 %v2631_v7, %v648_v4  ;;  %v517_v39 = vpop.f32.mrf.mxu0 }
 0x13c   : > { %2650 = vrcp.f32 %v830_v9  ;;  %v518_v6 = vadd.f32 %v517_v39, %v3178_v17  ;;  %v1008_v19 = vpack.c.bf16 %v2633_v12, %v2627_v61  ;;  %v486_v61 = vadd.f32 %v3281_v31, %v3214_v63 }
 0x13d   : > { %v2635_v20 = vpop.eup %2634  ;;  %v954_v26 = vadd.f32 %v922_v13, %v470_v22  ;;  %2652 = vpow2.f32 %v2107_v10  ;;  %v3338_v28 = vpop.f32.mrf.mxu0  ;;  %v490_v22 = vadd.f32 %v3290_v38, %v3214_v63 }
 0x13e   : > { %v2637_v18 = vpop.eup %2636  ;;  %2654 = vtanh.f32 %v953_v29  ;;  %v923_v41 = vmul.f32 %v2635_v20, %v653_v16  ;;  %v2108_v32 = vmul.f32 -1.442695, %v518_v6  ;;  %2437 = vmatmul.mubr.bf16.gmra.mxu0 %v1008_v19  ;;  %v664_v29 = vadd.f32 %v3330_v59, %v3207_v58  ;;  %v3366_v16 = vpop.f32.mrf.mxu1 }
 0x13f   : > { %2656 = vtanh.f32 %v954_v26  ;;  %v831_v33 = vadd.f32 1.0, %v2637_v18  ;;  %1279 = vmatmul.mubr.bf16.gmra.mxu1 %v1008_v19  ;;  %v521_v34 = vpop.f32.mrf.mxu0 }
 0x140   : > { %v955_v40 = vadd.f32 %v923_v41, %v476_v62  ;;  %2658 = vpow2.f32 %v2108_v32  ;;  %v522_v42 = vadd.f32 %v521_v34, %v3178_v17  ;;  %1288 = vmatprep.mubr.bf16.mxu1 %v2920_v2  ;;  %v669_v62 = vadd.f32 %v668_v44, %v3207_v58  ;;  %v671_v34 = vpop.f32.mrf.mxu1 }
 0x141   : > { %v2639_v43 = vpop.eup %2638  ;;  %2660 = vrcp.f32 %v831_v33  ;;  %v3345_v46 = vpop.f32.mrf.mxu0 }
 0x142   : > { %v2641_v56 = vpop.eup %2640  ;;  %v924_v47 = vmul.f32 %v2639_v43, %v656_v21  ;;  %v2109_v8 = vmul.f32 -1.442695, %v522_v42  ;;  %2662 = vtanh.f32 %v955_v40 }
 0x143   : > { %v2643_v45 = vpop.eup %2642  ;;  %v832_v30 = vadd.f32 1.0, %v2641_v56  ;;  %v527_v49 = vpop.f32.mrf.mxu0  ;;  %v496_v56 = vadd.f32 %v3298_v24, %v3214_v63  ;;  %v500_v24 = vadd.f32 %v3306_v52, %v3214_v63 }
 0x144   : > { %v2645_v51 = vpop.eup %2644  ;;  %v956_v57 = vadd.f32 %v924_v47, %v480_v53  ;;  %2664 = vpow2.f32 %v2109_v8  ;;  %v528_v60 = vadd.f32 %v527_v49, %v3178_v17  ;;  %v672_v8 = vadd.f32 %v671_v34, %v3207_v58 }
 0x145   : > { %v2647_v0 = vpop.eup %2646  ;;  %2666 = vrcp.f32 %v832_v30  ;;  %v3354_v5 = vpop.f32.mrf.mxu0  ;;  %v1009_v11 = vpack.c.bf16 %v2645_v51, %v2643_v45  ;;  %v516_v34 = vadd.f32 %v3332_v25, %v3214_v63 }
 0x146   : > { %v2649_v1 = vpop.eup %2648  ;;  %v925_v3 = vmul.f32 %v2647_v0, %v661_v23  ;;  %2668 = vtanh.f32 %v956_v57  ;;  %v2110_v35 = vmul.f32 -1.442695, %v528_v60  ;;  %v3379_v30 = vpop.f32.mrf.mxu1 }
 0x147   : > { %v833_v4 = vadd.f32 1.0, %v2649_v1  ;;  %1289 = vmatmul.mubr.bf16.gmra.mxu1 %v1009_v11  ;;  %2440 = vmatprep.mubr.bf16.mxu0 %v1009_v11  ;;  %v531_v37 = vpop.f32.mrf.mxu0 }
 0x148   : > { %v957_v7 = vadd.f32 %v925_v3, %v486_v61  ;;  %2670 = vpow2.f32 %v2110_v35  ;;  %v532_v9 = vadd.f32 %v531_v37, %v3178_v17  ;;  %1298 = vmatprep.mubr.bf16.mxu1 %v2920_v2  ;;  %v677_v35 = vadd.f32 %v3349_v48, %v3207_v58  ;;  %v684_v37 = vpop.f32.mrf.mxu1 }
 0x149   : > { %v2651_v10 = vpop.eup %2650  ;;  %2672 = vrcp.f32 %v833_v4  ;;  %v3362_v31 = vpop.f32.mrf.mxu0 }
 0x14a   : > { %v2653_v12 = vpop.eup %2652  ;;  %v926_v13 = vmul.f32 %v2651_v10, %v664_v29  ;;  %v2111_v39 = vmul.f32 -1.442695, %v532_v9  ;;  %2674 = vtanh.f32 %v957_v7 }
 0x14b   : > { %v2655_v6 = vpop.eup %2654  ;;  %v834_v59 = vadd.f32 1.0, %v2653_v12  ;;  %v537_v19 = vpop.f32.mrf.mxu0 }
 0x14c   : > { %v2657_v20 = vpop.eup %2656  ;;  %v958_v26 = vadd.f32 %v926_v13, %v490_v22  ;;  %2676 = vpow2.f32 %v2111_v39  ;;  %v538_v27 = vadd.f32 %v537_v19, %v3178_v17  ;;  %v506_v22 = vadd.f32 %v3313_v36, %v3214_v63 }
 0x14d   : > { %v2659_v18 = vpop.eup %2658  ;;  %2678 = vrcp.f32 %v834_v59  ;;  %v3370_v41 = vpop.f32.mrf.mxu0  ;;  %v1010_v38 = vpack.c.bf16 %v2657_v20, %v2655_v6  ;;  %v680_v39 = vadd.f32 %v3366_v16, %v3207_v58 }
 0x14e   : > { %v2661_v32 = vpop.eup %2660  ;;  %2680 = vtanh.f32 %v958_v26  ;;  %v835_v33 = vadd.f32 1.0, %v2659_v18  ;;  %v2112_v40 = vmul.f32 -1.442695, %v538_v27  ;;  %v2407_v6 = vpop.f32.mrf.mxu1  ;;  %v510_v18 = vadd.f32 %v3322_v55, %v3214_v63 }
 0x14f   : > { %v927_v21 = vmul.f32 %v2661_v32, %v669_v62  ;;  %1299 = vmatmul.mubr.bf16.gmra.mxu1 %v1010_v38  ;;  %2441 = vmatmul.mubr.bf16.gmra.mxu0 %v1010_v38  ;;  %v541_v42 = vpop.f32.mrf.mxu0  ;;  %v2663_v43 = vpop.eup %2662 }
 0x150   : > { %2682 = vrcp.f32 %v835_v33  ;;  %v542_v53 = vadd.f32 %v541_v42, %v3178_v17  ;;  %1308 = vmatprep.mubr.bf16.mxu1 %v2920_v2  ;;  %v687_v33 = vpop.f32.mrf.mxu1 }
 0x151   : > { %v2665_v47 = vpop.eup %2664  ;;  %2684 = vpow2.f32 %v2112_v40  ;;  %v3377_v45 = vpop.f32.mrf.mxu0  ;;  %v959_v23 = vadd.f32 %v927_v21, %v496_v56  ;;  %v688_v42 = vadd.f32 %v687_v33, %v3207_v58 }
 0x152   : > { %v2667_v49 = vpop.eup %2666  ;;  %v836_v51 = vadd.f32 1.0, %v2665_v47  ;;  %v2113_v57 = vmul.f32 -1.442695, %v542_v53  ;;  %v520_v53 = vadd.f32 %v3338_v28, %v3214_v63 }
 0x153   : > { %v2669_v60 = vpop.eup %2668  ;;  %v928_v0 = vmul.f32 %v2667_v49, %v672_v8  ;;  %v547_v11 = vpop.f32.mrf.mxu0 }
 0x154   : > { %2686 = vrcp.f32 %v836_v51  ;;  %v548_v1 = vadd.f32 %v547_v11, %v3178_v17  ;;  %v1011_v61 = vpack.c.bf16 %v2669_v60, %v2663_v43  ;;  %v2410_v8 = vpop.f32.mrf.mxu1  ;;  %v526_v11 = vadd.f32 %v3345_v46, %v3214_v63 }
 0x155   : > { %v2671_v3 = vpop.eup %2670  ;;  %v960_v44 = vadd.f32 %v928_v0, %v500_v24  ;;  %2688 = vpow2.f32 %v2113_v57  ;;  %v3386_v4 = vpop.f32.mrf.mxu0 }
 0x156   : > { %v2673_v7 = vpop.eup %2672  ;;  %v837_v29 = vadd.f32 1.0, %v2671_v3  ;;  %2690 = vtanh.f32 %v959_v23  ;;  %v2114_v9 = vmul.f32 -1.442695, %v548_v1  ;;  %2444 = vmatprep.mubr.bf16.mxu0 %v1011_v61  ;;  %v693_v23 = vadd.f32 %v3379_v30, %v3207_v58  ;;  %v700_v28 = vpop.f32.mrf.mxu1 }
 0x157   : > { %v929_v52 = vmul.f32 %v2673_v7, %v677_v35  ;;  %2692 = vtanh.f32 %v960_v44  ;;  %1309 = vmatmul.mubr.bf16.gmra.mxu1 %v1011_v61  ;;  %v551_v10 = vpop.f32.mrf.mxu0  ;;  %v2675_v12 = vpop.eup %2674  ;;  %v696_v35 = vadd.f32 %v2407_v6, %v3207_v58 }
 0x158   : > { %2694 = vrcp.f32 %v837_v29  ;;  %v552_v48 = vadd.f32 %v551_v10, %v3178_v17  ;;  %1318 = vmatprep.mubr.bf16.mxu1 %v2920_v2  ;;  %v685_v17 = vadd.f32 %v684_v37, %v3207_v58  ;;  %v530_v37 = vadd.f32 %v3354_v5, %v3214_v63  ;;  %v2411_v29 = vpop.f32.mrf.mxu1 }
 0x159   : > { %v2677_v13 = vpop.eup %2676  ;;  %2696 = vpow2.f32 %v2114_v9  ;;  %v961_v19 = vadd.f32 %v929_v52, %v506_v22  ;;  %v536_v5 = vadd.f32 %v3362_v31, %v3214_v63 }
 0x15a   : > { %v2679_v59 = vpop.eup %2678  ;;  %v838_v20 = vadd.f32 1.0, %v2677_v13  ;;  %v2115_v26 = vmul.f32 -1.442695, %v552_v48  ;;  %v703_v13 = vpop.f32.mrf.mxu1 }
 0x15b   : > { %v2681_v27 = vpop.eup %2680  ;;  %v930_v36 = vmul.f32 %v2679_v59, %v680_v39  ;;  %v704_v59 = vadd.f32 %v703_v13, %v3207_v58 }
 0x15c   : > { %2698 = vrcp.f32 %v838_v20  ;;  %v1012_v62 = vpack.c.bf16 %v2681_v27, %v2675_v12  ;;  %v701_v12 = vadd.f32 %v700_v28, %v3207_v58  ;;  %v540_v27 = vadd.f32 %v3370_v41, %v3214_v63 }
 0x15d   : > { %v2683_v38 = vpop.eup %2682  ;;  %v962_v32 = vadd.f32 %v930_v36, %v510_v18  ;;  %2700 = vpow2.f32 %v2115_v26 }
 0x15e   : > { %v2685_v16 = vpop.eup %2684  ;;  %2702 = vtanh.f32 %v961_v19  ;;  %v931_v40 = vmul.f32 %v2683_v38, %v685_v17  ;;  %2445 = vmatmul.mubr.bf16.gmra.mxu0 %v1012_v62  ;;  %v709_v17 = vadd.f32 %v2410_v8, %v3207_v58 }
 0x15f   : > { %2704 = vtanh.f32 %v962_v32  ;;  %v839_v21 = vadd.f32 1.0, %v2685_v16  ;;  %1319 = vmatmul.mubr.bf16.gmra.mxu1 %v1012_v62  ;;  %v546_v32 = vadd.f32 %v3377_v45, %v3214_v63  ;;  %v712_v16 = vadd.f32 %v2411_v29, %v3207_v58 }
 0x160   : > { %v963_v55 = vadd.f32 %v931_v40, %v516_v34  ;;  %1328 = vmatprep.mubr.bf16.mxu1 %v2920_v2 }
 0x161   : > { %v2687_v43 = vpop.eup %2686  ;;  %2706 = vrcp.f32 %v839_v21  ;;  %v550_v21 = vadd.f32 %v3386_v4, %v3214_v63  ;;  %v3430_v63 = vld [vmem:[%s3730_s4] sm:$0x7] }
 0x162   : > { %v2689_v56 = vpop.eup %2688  ;;  %v932_v47 = vmul.f32 %v2687_v43, %v688_v42  ;;  %2708 = vtanh.f32 %v963_v55  ;;  %v3435_v4 = vrot.slane %v3430_v63, %v287_v15 }
 0x163   : > { %v2691_v25 = vpop.eup %2690  ;;  %v840_v49 = vadd.f32 1.0, %v2689_v56 }
 0x164   : > { %v2693_v51 = vpop.eup %2692  ;;  %v964_v57 = vadd.f32 %v932_v47, %v520_v53 }
 0x165   : > { %v2695_v60 = vpop.eup %2694  ;;  %2710 = vrcp.f32 %v840_v49  ;;  %v1013_v24 = vpack.c.bf16 %v2693_v51, %v2691_v25 }
 0x166   : > { %v2697_v0 = vpop.eup %2696  ;;  %v933_v1 = vmul.f32 %v2695_v60, %v693_v23  ;;  %2712 = vtanh.f32 %v964_v57 }
 0x167   : > { %v841_v61 = vadd.f32 1.0, %v2697_v0  ;;  %1329 = vmatmul.mubr.bf16.gmra.mxu1 %v1013_v24  ;;  %2448 = vmatprep.mubr.bf16.mxu0 %v1013_v24 }
 0x168   : > { %v965_v3 = vadd.f32 %v933_v1, %v526_v11  ;;  %1338 = vmatprep.mubr.bf16.mxu1 %v2920_v2 }
 0x169   : > { %v2699_v30 = vpop.eup %2698  ;;  %2714 = vrcp.f32 %v841_v61 }
 0x16a   : > { %v2701_v44 = vpop.eup %2700  ;;  %v934_v7 = vmul.f32 %v2699_v30, %v696_v35  ;;  %2716 = vtanh.f32 %v965_v3 }
 0x16b   : > { %v2703_v46 = vpop.eup %2702  ;;  %v842_v9 = vadd.f32 1.0, %v2701_v44 }
 0x16c   : > { %v2705_v52 = vpop.eup %2704  ;;  %v966_v10 = vadd.f32 %v934_v7, %v530_v37 }
 0x16d   : > { %2718 = vrcp.f32 %v842_v9  ;;  %v1014_v22 = vpack.c.bf16 %v2705_v52, %v2703_v46 }
 0x16e   : > { %v2707_v48 = vpop.eup %2706  ;;  %2720 = vtanh.f32 %v966_v10 }
 0x16f   : > { %v935_v39 = vmul.f32 %v2707_v48, %v701_v12  ;;  %1339 = vmatmul.mubr.bf16.gmra.mxu1 %v1014_v22  ;;  %2449 = vmatmul.mubr.bf16.gmra.mxu0 %v1014_v22  ;;  %v2709_v6 = vpop.eup %2708 }
 0x170   : > { %1348 = vmatprep.mubr.bf16.mxu1 %v2920_v2 }
 0x171   : > { %v967_v20 = vadd.f32 %v935_v39, %v536_v5 }
 0x172   : > { %v2711_v19 = vpop.eup %2710 }
 0x173   : > { %v2713_v26 = vpop.eup %2712  ;;  %v936_v18 = vmul.f32 %v2711_v19, %v704_v59  ;;  %2722 = vtanh.f32 %v967_v20 }
 0x174   : > { %v1015_v36 = vpack.c.bf16 %v2713_v26, %v2709_v6 }
 0x175   : > { %v968_v62 = vadd.f32 %v936_v18, %v540_v27 }
 0x176   : > { %v2715_v38 = vpop.eup %2714  ;;  %2452 = vmatprep.mubr.bf16.mxu0 %v1015_v36 }
 0x177   : > { %v937_v31 = vmul.f32 %v2715_v38, %v709_v17  ;;  %2724 = vtanh.f32 %v968_v62  ;;  %1349 = vmatmul.mubr.bf16.gmra.mxu1 %v1015_v36  ;;  %v2717_v33 = vpop.eup %2716 }
 0x178   : > { %1358 = vmatprep.mubr.bf16.mxu1 %v2920_v2 }
 0x179   : > { %v969_v34 = vadd.f32 %v937_v31, %v546_v32 }
 0x17a   : > { %v2719_v41 = vpop.eup %2718 }
 0x17b   : > { %v2721_v40 = vpop.eup %2720  ;;  %v938_v55 = vmul.f32 %v2719_v41, %v712_v16  ;;  %2726 = vtanh.f32 %v969_v34 }
 0x17c   : > { %v1016_v42 = vpack.c.bf16 %v2721_v40, %v2717_v33  ;;  %v3466_v33 = vrot.slane %v3430_v63, %v291_v50 }
 0x17d   : > { %v970_v43 = vadd.f32 %v938_v55, %v550_v21  ;;  %v3472_v55 = vrot.slane %v3430_v63, %v283_v54 }
 0x17e   : > { %2453 = vmatmul.mubr.bf16.gmra.mxu0 %v1016_v42 }
 0x17f   : > { %2728 = vtanh.f32 %v970_v43  ;;  %1359 = vmatmul.mubr.bf16.gmra.mxu1 %v1016_v42 }
 0x180   : > { %1368 = vmatprep.mubr.bf16.mxu1 %v2920_v2  ;;  %v2723_v45 = vpop.eup %2722 }
 0x184   : > { %v2725_v56 = vpop.eup %2724 }
 0x185   : > { %v1017_v53 = vpack.c.bf16 %v2725_v56, %v2723_v45 }
 0x187   : > { %1369 = vmatmul.mubr.bf16.gmra.mxu1 %v1017_v53  ;;  %2456 = vmatprep.mubr.bf16.mxu0 %v1017_v53 }
 0x188   : > { %1378 = vmatprep.mubr.bf16.mxu1 %v2920_v2  ;;  %v2727_v58 = vpop.eup %2726 }
 0x18c   : > { %v2729_v47 = vpop.eup %2728 }
 0x18d   : > { %v1018_v8 = vpack.c.bf16 %v2729_v47, %v2727_v58 }
 0x18f   : > { %1379 = vmatmul.mubr.bf16.gmra.mxu1 %v1018_v8  ;;  %2457 = vmatmul.mubr.bf16.gmra.mxu0 %v1018_v8 }
 0x1d6   : > { %v3437_v25 = vpop.f32.mrf.mxu1 }
 0x1d7   : > { %v1231_v54 = vadd.f32 %v3437_v25, %v3472_v55 }
 0x1d8   : > { %v1232_v49 = vpop.f32.mrf.mxu1 }
 0x1d9   : > { %v1233_v2 = vadd.f32 %v1232_v49, %v3435_v4 }
 0x1da   : > { %v3440_v51 = vpop.f32.mrf.mxu1 }
 0x1db   : > { %v2140_v23 = vmul.f32 -1.442695, %v1233_v2  ;;  %v1235_v63 = vadd.f32 %v3440_v51, %v3472_v55 }
 0x1dc   : > { %v1236_v57 = vpop.f32.mrf.mxu1 }
 0x1dd   : > { %2730 = vpow2.f32 %v2140_v23  ;;  %v1237_v60 = vadd.f32 %v1236_v57, %v3435_v4 }
 0x1de   : > { %v3443_v24 = vpop.f32.mrf.mxu1  ;;  %v2430_v12 = vpop.f32.mrf.mxu0 }
 0x1df   : > { %v2141_v0 = vmul.f32 -1.442695, %v1237_v60  ;;  %v1432_v51 = vadd.f32 %v2430_v12, %v3466_v33 }
 0x1e0   : > { %v1242_v11 = vpop.f32.mrf.mxu1  ;;  %v1423_v59 = vpop.f32.mrf.mxu0 }
 0x1e1   : > { %2732 = vpow2.f32 %v2141_v0  ;;  %v1243_v15 = vadd.f32 %v1242_v11, %v3435_v4  ;;  %v1424_v42 = vadd.f32 %v1423_v59, %v3466_v33 }
 0x1e2   : > { %v3446_v1 = vpop.f32.mrf.mxu1  ;;  %v2431_v17 = vpop.f32.mrf.mxu0 }
 0x1e3   : > { %v2142_v28 = vmul.f32 -1.442695, %v1243_v15 }
 0x1e4   : > { %v1246_v61 = vpop.f32.mrf.mxu1  ;;  %v1426_v34 = vpop.f32.mrf.mxu0 }
 0x1e5   : > { %2734 = vpow2.f32 %v2142_v28  ;;  %v1247_v3 = vadd.f32 %v1246_v61, %v3435_v4  ;;  %v1427_v53 = vadd.f32 %v1426_v34, %v3466_v33 }
 0x1e7   : > { %v2143_v35 = vmul.f32 -1.442695, %v1247_v3  ;;  %v3449_v30 = vpop.f32.mrf.mxu1 }
 0x1e9   : > { %2736 = vpow2.f32 %v2143_v35  ;;  %v1252_v44 = vpop.f32.mrf.mxu1 }
 0x1ea   : > { %v2731_v37 = vpop.eup %2730  ;;  %v1253_v7 = vadd.f32 %v1252_v44, %v3435_v4 }
 0x1eb   : > { %v1646_v29 = vadd.f32 1.0, %v2731_v37  ;;  %v3452_v46 = vpop.f32.mrf.mxu1 }
 0x1ec   : > { %v2144_v9 = vmul.f32 -1.442695, %v1253_v7 }
 0x1ed   : > { %2738 = vrcp.f32 %v1646_v29  ;;  %v1256_v52 = vpop.f32.mrf.mxu1 }
 0x1ee   : > { %v2733_v10 = vpop.eup %2732  ;;  %2740 = vpow2.f32 %v2144_v9  ;;  %v1257_v22 = vadd.f32 %v1256_v52, %v3435_v4  ;;  %v1435_v9 = vadd.f32 %v2431_v17, %v3466_v33 }
 0x1ef   : > { %v1647_v48 = vadd.f32 1.0, %v2733_v10  ;;  %v3455_v13 = vpop.f32.mrf.mxu1  ;;  %v3486_v2 = vpop.f32.mrf.mxu0 }
 0x1f0   : > { %v2145_v39 = vmul.f32 -1.442695, %v1257_v22 }
 0x1f1   : > { %2742 = vrcp.f32 %v1647_v48  ;;  %v1262_v5 = vpop.f32.mrf.mxu1  ;;  %v1439_v35 = vpop.f32.mrf.mxu0  ;;  %v1241_v48 = vadd.f32 %v3443_v24, %v3472_v55 }
 0x1f2   : > { %v2735_v6 = vpop.eup %2734  ;;  %2744 = vpow2.f32 %v2145_v39  ;;  %v1263_v19 = vadd.f32 %v1262_v5, %v3435_v4  ;;  %v1245_v39 = vadd.f32 %v3446_v1, %v3472_v55 }
 0x1f3   : > { %v1648_v20 = vadd.f32 1.0, %v2735_v6  ;;  %v3458_v26 = vpop.f32.mrf.mxu1  ;;  %v2435_v6 = vpop.f32.mrf.mxu0 }
 0x1f4   : > { %v2146_v27 = vmul.f32 -1.442695, %v1263_v19 }
 0x1f5   : > { %2746 = vrcp.f32 %v1648_v20  ;;  %v1266_v18 = vpop.f32.mrf.mxu1  ;;  %v1442_v24 = vpop.f32.mrf.mxu0 }
 0x1f6   : > { %v2737_v36 = vpop.eup %2736  ;;  %2748 = vpow2.f32 %v2146_v27  ;;  %v1267_v62 = vadd.f32 %v1266_v18, %v3435_v4 }
 0x1f7   : > { %v1649_v38 = vadd.f32 1.0, %v2737_v36  ;;  %v3461_v31 = vpop.f32.mrf.mxu1 }
 0x1f8   : > { %v2147_v32 = vmul.f32 -1.442695, %v1267_v62 }
 0x1f9   : > { %2750 = vrcp.f32 %v1649_v38  ;;  %v1272_v16 = vpop.f32.mrf.mxu1 }
 0x1fa   : > { %v2739_v41 = vpop.eup %2738  ;;  %2752 = vpow2.f32 %v2147_v32  ;;  %v1273_v40 = vadd.f32 %v1272_v16, %v3435_v4  ;;  %v1440_v16 = vadd.f32 %v1439_v35, %v3466_v33 }
 0x1fb   : > { %v2741_v21 = vpop.eup %2740  ;;  %v3475_v43 = vpop.f32.mrf.mxu1  ;;  %v1742_v56 = vmul.f32 %v2739_v41, %v1424_v42  ;;  %v1443_v42 = vadd.f32 %v1442_v24, %v3466_v33 }
 0x1fc   : > { %v1650_v50 = vadd.f32 1.0, %v2741_v21  ;;  %v2148_v45 = vmul.f32 -1.442695, %v1273_v40 }
 0x1fd   : > { %v1276_v58 = vpop.f32.mrf.mxu1  ;;  %v1774_v0 = vadd.f32 %v1742_v56, %v1231_v54 }
 0x1fe   : > { %v2743_v47 = vpop.eup %2742  ;;  %2754 = vrcp.f32 %v1650_v50  ;;  %v1277_v8 = vadd.f32 %v1276_v58, %v3435_v4  ;;  %v1251_v58 = vadd.f32 %v3449_v30, %v3472_v55 }
 0x1ff   : > { %v2745_v14 = vpop.eup %2744  ;;  %v1743_v49 = vmul.f32 %v2743_v47, %v1427_v53  ;;  %2756 = vpow2.f32 %v2148_v45  ;;  %v3488_v23 = vpop.f32.mrf.mxu1  ;;  %v1255_v47 = vadd.f32 %v3452_v46, %v3472_v55  ;;  %v1448_v46 = vadd.f32 %v3486_v2, %v3466_v33 }
 0x200   : > { %v1651_v57 = vadd.f32 1.0, %v2745_v14  ;;  %v2149_v60 = vmul.f32 -1.442695, %v1277_v8  ;;  %v3518_v14 = vpop.f32.mrf.mxu0  ;;  %v1261_v2 = vadd.f32 %v3455_v13, %v3472_v55 }
 0x201   : > { %v1775_v11 = vadd.f32 %v1743_v49, %v1235_v63  ;;  %v1282_v15 = vpop.f32.mrf.mxu1 }
 0x202   : > { %v2747_v28 = vpop.eup %2746  ;;  %2758 = vrcp.f32 %v1651_v57  ;;  %v1283_v25 = vadd.f32 %v1282_v15, %v3435_v4 }
 0x203   : > { %v2749_v61 = vpop.eup %2748  ;;  %v2245_v3 = vpack.c.bf16 %v1775_v11, %v1774_v0  ;;  %2760 = vpow2.f32 %v2149_v60  ;;  %v3492_v44 = vpop.f32.mrf.mxu1  ;;  %v1744_v29 = vmul.f32 %v2747_v28, %v1432_v51 }
 0x204   : > { %v1652_v37 = vadd.f32 1.0, %v2749_v61  ;;  %v2150_v7 = vmul.f32 -1.442695, %v1283_v25  ;;  %v1455_v25 = vpop.f32.mrf.mxu0 }
 0x205   : > { %2246 = vst [vmem:[%s3495_s6] sm:$0xff] %v2245_v3   ;;  %v1286_v52 = vpop.f32.mrf.mxu1  ;;  %v1776_v27 = vadd.f32 %v1744_v29, %v1241_v48 }
 0x206   : > { %v2751_v10 = vpop.eup %2750  ;;  %2762 = vrcp.f32 %v1652_v37  ;;  %v1287_v22 = vadd.f32 %v1286_v52, %v3435_v4  ;;  %v1451_v37 = vadd.f32 %v2435_v6, %v3466_v33 }
 0x207   : > { %v2753_v12 = vpop.eup %2752  ;;  %v1745_v5 = vmul.f32 %v2751_v10, %v1435_v9  ;;  %2764 = vpow2.f32 %v2150_v7  ;;  %v3503_v59 = vpop.f32.mrf.mxu1  ;;  %v1265_v10 = vadd.f32 %v3458_v26, %v3472_v55 }
 0x208   : > { %v1653_v19 = vadd.f32 1.0, %v2753_v12  ;;  %v2151_v20 = vmul.f32 -1.442695, %v1287_v22  ;;  %v2439_v12 = vpop.f32.mrf.mxu0 }
 0x209   : > { %v1777_v18 = vadd.f32 %v1745_v5, %v1245_v39  ;;  %v1292_v36 = vpop.f32.mrf.mxu1 }
 0x20a   : > { %2766 = vrcp.f32 %v1653_v19  ;;  %v1293_v17 = vadd.f32 %v1292_v36, %v3435_v4 }
 0x20b   : > { %v2755_v62 = vpop.eup %2754  ;;  %v2250_v38 = vpack.c.bf16 %v1777_v18, %v1776_v27  ;;  %2768 = vpow2.f32 %v2151_v20  ;;  %v3506_v32 = vpop.f32.mrf.mxu1 }
 0x20c   : > { %v2757_v1 = vpop.eup %2756  ;;  %v2152_v41 = vmul.f32 -1.442695, %v1293_v17  ;;  %v1746_v21 = vmul.f32 %v2755_v62, %v1440_v16  ;;  %v1458_v17 = vpop.f32.mrf.mxu0 }
 0x20d   : > { %2322 = vst [vmem:[%s3495_s6 + $0x8] sm:$0xff] %v2250_v38   ;;  %v1654_v34 = vadd.f32 1.0, %v2757_v1  ;;  %v1296_v40 = vpop.f32.mrf.mxu1  ;;  %v1456_v38 = vadd.f32 %v1455_v25, %v3466_v33 }
 0x20e   : > { %2770 = vpow2.f32 %v2152_v41  ;;  %v1297_v50 = vadd.f32 %v1296_v40, %v3435_v4  ;;  %v1778_v57 = vadd.f32 %v1746_v21, %v1251_v58  ;;  %v1275_v58 = vadd.f32 %v3475_v43, %v3472_v55 }
 0x20f   : > { %v2759_v45 = vpop.eup %2758  ;;  %2772 = vrcp.f32 %v1654_v34  ;;  %v3512_v56 = vpop.f32.mrf.mxu1  ;;  %v1459_v34 = vadd.f32 %v1458_v17, %v3466_v33 }
 0x210   : > { %v2761_v53 = vpop.eup %2760  ;;  %v1747_v8 = vmul.f32 %v2759_v45, %v1443_v42  ;;  %v2153_v54 = vmul.f32 -1.442695, %v1297_v50  ;;  %v3541_v40 = vpop.f32.mrf.mxu0 }
 0x211   : > { %v1655_v63 = vadd.f32 1.0, %v2761_v53  ;;  %v1302_v49 = vpop.f32.mrf.mxu1  ;;  %v1271_v53 = vadd.f32 %v3461_v31, %v3472_v55  ;;  %v1464_v31 = vadd.f32 %v3518_v14, %v3466_v33  ;;  %v1281_v14 = vadd.f32 %v3488_v23, %v3472_v55 }
 0x212   : > { %v1779_v60 = vadd.f32 %v1747_v8, %v1255_v47  ;;  %2774 = vpow2.f32 %v2153_v54  ;;  %v1303_v0 = vadd.f32 %v1302_v49, %v3435_v4 }
 0x213   : > { %v2763_v11 = vpop.eup %2762  ;;  %2776 = vrcp.f32 %v1655_v63  ;;  %v3521_v15 = vpop.f32.mrf.mxu1 }
 0x214   : > { %v2765_v30 = vpop.eup %2764  ;;  %v2255_v28 = vpack.c.bf16 %v1779_v60, %v1778_v57  ;;  %v2154_v61 = vmul.f32 -1.442695, %v1303_v0  ;;  %v1748_v35 = vmul.f32 %v2763_v11, %v1448_v46  ;;  %v1471_v60 = vpop.f32.mrf.mxu0 }
 0x215   : > { %v1656_v51 = vadd.f32 1.0, %v2765_v30  ;;  %v1306_v3 = vpop.f32.mrf.mxu1 }
 0x216   : > { %2323 = vst [vmem:[%s3495_s6 + $0x10] sm:$0xff] %v2255_v28   ;;  %2778 = vpow2.f32 %v2154_v61  ;;  %v1307_v7 = vadd.f32 %v1306_v3, %v3435_v4  ;;  %v1780_v6 = vadd.f32 %v1748_v35, %v1261_v2  ;;  %v1467_v3 = vadd.f32 %v2439_v12, %v3466_v33  ;;  %v2443_v35 = vpop.f32.mrf.mxu0 }
 0x217   : > { %v2767_v29 = vpop.eup %2766  ;;  %2780 = vrcp.f32 %v1656_v51  ;;  %v3528_v9 = vpop.f32.mrf.mxu1  ;;  %v1285_v2 = vadd.f32 %v3492_v44, %v3472_v55 }
 0x218   : > { %v2769_v52 = vpop.eup %2768  ;;  %v1749_v22 = vmul.f32 %v2767_v29, %v1451_v37  ;;  %v2155_v48 = vmul.f32 -1.442695, %v1307_v7 }
 0x219   : > { %v1657_v39 = vadd.f32 1.0, %v2769_v52  ;;  %v1312_v5 = vpop.f32.mrf.mxu1 }
 0x21a   : > { %v1781_v19 = vadd.f32 %v1749_v22, %v1265_v10  ;;  %2782 = vpow2.f32 %v2155_v48  ;;  %v1313_v20 = vadd.f32 %v1312_v5, %v3435_v4 }
 0x21b   : > { %v2771_v27 = vpop.eup %2770  ;;  %2784 = vrcp.f32 %v1657_v39  ;;  %v3535_v18 = vpop.f32.mrf.mxu1 }
 0x21c   : > { %v2773_v36 = vpop.eup %2772  ;;  %v2260_v13 = vpack.c.bf16 %v1781_v19, %v1780_v6  ;;  %v1658_v62 = vadd.f32 1.0, %v2771_v27  ;;  %v2156_v26 = vmul.f32 -1.442695, %v1313_v20  ;;  %v1474_v6 = vpop.f32.mrf.mxu0  ;;  %v1472_v27 = vadd.f32 %v1471_v60, %v3466_v33 }
 0x21d   : > { %v1316_v24 = vpop.f32.mrf.mxu1  ;;  %v1750_v41 = vmul.f32 %v2773_v36, %v1456_v38 }
 0x21e   : > { %2324 = vst [vmem:[%s3495_s6 + $0x18] sm:$0xff] %v2260_v13   ;;  %2786 = vrcp.f32 %v1658_v62  ;;  %v1317_v1 = vadd.f32 %v1316_v24, %v3435_v4  ;;  %v1475_v62 = vadd.f32 %v1474_v6, %v3466_v33 }
 0x21f   : > { %v2775_v16 = vpop.eup %2774  ;;  %2788 = vpow2.f32 %v2156_v26  ;;  %v3543_v21 = vpop.f32.mrf.mxu1  ;;  %v1782_v49 = vadd.f32 %v1750_v41, %v1271_v53  ;;  %v1295_v41 = vadd.f32 %v3506_v32, %v3472_v55  ;;  %v1480_v32 = vadd.f32 %v3541_v40, %v3466_v33 }
 0x220   : > { %v2777_v42 = vpop.eup %2776  ;;  %v1659_v50 = vadd.f32 1.0, %v2775_v16  ;;  %v2157_v45 = vmul.f32 -1.442695, %v1317_v1  ;;  %v1291_v16 = vadd.f32 %v3503_v59, %v3472_v55  ;;  %v1301_v40 = vadd.f32 %v3512_v56, %v3472_v55 }
 0x221   : > { %v1751_v47 = vmul.f32 %v2777_v42, %v1459_v34  ;;  %v1322_v8 = vpop.f32.mrf.mxu1  ;;  %v3576_v42 = vpop.f32.mrf.mxu0 }
 0x222   : > { %2790 = vrcp.f32 %v1659_v50  ;;  %v1323_v54 = vadd.f32 %v1322_v8, %v3435_v4 }
 0x223   : > { %v2779_v63 = vpop.eup %2778  ;;  %v1783_v57 = vadd.f32 %v1751_v47, %v1275_v58  ;;  %2792 = vpow2.f32 %v2157_v45  ;;  %v3550_v0 = vpop.f32.mrf.mxu1 }
 0x224   : > { %v2781_v11 = vpop.eup %2780  ;;  %v1660_v30 = vadd.f32 1.0, %v2779_v63  ;;  %v2158_v46 = vmul.f32 -1.442695, %v1323_v54 }
 0x225   : > { %v2265_v43 = vpack.c.bf16 %v1783_v57, %v1782_v49  ;;  %v1326_v28 = vpop.f32.mrf.mxu1  ;;  %v1752_v51 = vmul.f32 %v2781_v11, %v1464_v31  ;;  %v1487_v57 = vpop.f32.mrf.mxu0  ;;  %v1483_v31 = vadd.f32 %v2443_v35, %v3466_v33 }
 0x226   : > { %2794 = vrcp.f32 %v1660_v30  ;;  %v1327_v25 = vadd.f32 %v1326_v28, %v3435_v4  ;;  %v1488_v6 = vadd.f32 %v1487_v57, %v3466_v33 }
 0x227   : > { %v2783_v61 = vpop.eup %2782  ;;  %2325 = vst [vmem:[%s3495_s6 + $0x20] sm:$0xff] %v2265_v43   ;;  %2796 = vpow2.f32 %v2158_v46  ;;  %v3557_v37 = vpop.f32.mrf.mxu1  ;;  %v1784_v39 = vadd.f32 %v1752_v51, %v1281_v14  ;;  %v1305_v51 = vadd.f32 %v3521_v15, %v3472_v55 }
 0x228   : > { %v2785_v7 = vpop.eup %2784  ;;  %v1661_v29 = vadd.f32 1.0, %v2783_v61  ;;  %v2159_v52 = vmul.f32 -1.442695, %v1327_v25 }
 0x229   : > { %v1753_v10 = vmul.f32 %v2785_v7, %v1467_v3  ;;  %v1332_v22 = vpop.f32.mrf.mxu1  ;;  %v2447_v7 = vpop.f32.mrf.mxu0 }
 0x22a   : > { %2798 = vrcp.f32 %v1661_v29  ;;  %v1333_v48 = vadd.f32 %v1332_v22, %v3435_v4 }
 0x22b   : > { %v2787_v12 = vpop.eup %2786  ;;  %v1785_v5 = vadd.f32 %v1753_v10, %v1285_v2  ;;  %2800 = vpow2.f32 %v2159_v52  ;;  %v3564_v19 = vpop.f32.mrf.mxu1 }
 0x22c   : > { %v2789_v20 = vpop.eup %2788  ;;  %v2160_v23 = vmul.f32 -1.442695, %v1333_v48  ;;  %v1754_v17 = vmul.f32 %v2787_v12, %v1472_v27 }
 0x22d   : > { %v2270_v36 = vpack.c.bf16 %v1785_v5, %v1784_v39  ;;  %v1662_v13 = vadd.f32 1.0, %v2789_v20  ;;  %v1336_v44 = vpop.f32.mrf.mxu1  ;;  %v1490_v39 = vpop.f32.mrf.mxu0 }
 0x22e   : > { %2802 = vpow2.f32 %v2160_v23  ;;  %v1337_v26 = vadd.f32 %v1336_v44, %v3435_v4  ;;  %v1786_v58 = vadd.f32 %v1754_v17, %v1291_v16  ;;  %v1315_v16 = vadd.f32 %v3535_v18, %v3472_v55 }
 0x22f   : > { %v2791_v38 = vpop.eup %2790  ;;  %2326 = vst [vmem:[%s3495_s6 + $0x28] sm:$0xff] %v2270_v36   ;;  %2804 = vrcp.f32 %v1662_v13  ;;  %v3570_v24 = vpop.f32.mrf.mxu1  ;;  %v1491_v13 = vadd.f32 %v1490_v39, %v3466_v33 }
 0x230   : > { %v2793_v1 = vpop.eup %2792  ;;  %v1755_v34 = vmul.f32 %v2791_v38, %v1475_v62  ;;  %v2161_v50 = vmul.f32 -1.442695, %v1337_v26  ;;  %v3599_v44 = vpop.f32.mrf.mxu0 }
 0x231   : > { %v1663_v45 = vadd.f32 1.0, %v2793_v1  ;;  %v1342_v53 = vpop.f32.mrf.mxu1  ;;  %v1311_v1 = vadd.f32 %v3528_v9, %v3472_v55  ;;  %v1496_v9 = vadd.f32 %v3576_v42, %v3466_v33  ;;  %v1321_v42 = vadd.f32 %v3543_v21, %v3472_v55 }
 0x232   : > { %v1787_v47 = vadd.f32 %v1755_v34, %v1295_v41  ;;  %2806 = vpow2.f32 %v2161_v50  ;;  %v1343_v8 = vadd.f32 %v1342_v53, %v3435_v4 }
 0x233   : > { %v2795_v54 = vpop.eup %2794  ;;  %2808 = vrcp.f32 %v1663_v45  ;;  %v3579_v63 = vpop.f32.mrf.mxu1 }
 0x234   : > { %v2797_v59 = vpop.eup %2796  ;;  %v2275_v49 = vpack.c.bf16 %v1787_v47, %v1786_v58  ;;  %v2162_v60 = vmul.f32 -1.442695, %v1343_v8  ;;  %v1756_v46 = vmul.f32 %v2795_v54, %v1480_v32  ;;  %v1503_v47 = vpop.f32.mrf.mxu0 }
 0x235   : > { %v1664_v11 = vadd.f32 1.0, %v2797_v59  ;;  %v1346_v30 = vpop.f32.mrf.mxu1 }
 0x236   : > { %2327 = vst [vmem:[%s3495_s6 + $0x30] sm:$0xff] %v2275_v49   ;;  %2810 = vpow2.f32 %v2162_v60  ;;  %v1347_v43 = vadd.f32 %v1346_v30, %v3435_v4  ;;  %v1788_v14 = vadd.f32 %v1756_v46, %v1301_v40  ;;  %v1499_v30 = vadd.f32 %v2447_v7, %v3466_v33  ;;  %v2451_v46 = vpop.f32.mrf.mxu0 }
 0x237   : > { %v2799_v28 = vpop.eup %2798  ;;  %2812 = vrcp.f32 %v1664_v11  ;;  %v3586_v25 = vpop.f32.mrf.mxu1  ;;  %v1325_v40 = vadd.f32 %v3550_v0, %v3472_v55 }
 0x238   : > { %v2801_v61 = vpop.eup %2800  ;;  %v1757_v3 = vmul.f32 %v2799_v28, %v1483_v31  ;;  %v2163_v29 = vmul.f32 -1.442695, %v1347_v43 }
 0x239   : > { %v1665_v52 = vadd.f32 1.0, %v2801_v61  ;;  %v1352_v35 = vpop.f32.mrf.mxu1 }
 0x23a   : > { %v1789_v2 = vadd.f32 %v1757_v3, %v1305_v51  ;;  %2814 = vpow2.f32 %v2163_v29  ;;  %v1353_v10 = vadd.f32 %v1352_v35, %v3435_v4 }
 0x23b   : > { %v2803_v22 = vpop.eup %2802  ;;  %2816 = vrcp.f32 %v1665_v52  ;;  %v3593_v48 = vpop.f32.mrf.mxu1 }
 0x23c   : > { %v2805_v12 = vpop.eup %2804  ;;  %v2280_v56 = vpack.c.bf16 %v1789_v2, %v1788_v14  ;;  %v1666_v5 = vadd.f32 1.0, %v2803_v22  ;;  %v2164_v15 = vmul.f32 -1.442695, %v1353_v10  ;;  %v1506_v14 = vpop.f32.mrf.mxu0  ;;  %v1504_v22 = vadd.f32 %v1503_v47, %v3466_v33 }
 0x23d   : > { %v1356_v20 = vpop.f32.mrf.mxu1  ;;  %v1758_v36 = vmul.f32 %v2805_v12, %v1488_v6 }
 0x23e   : > { %2328 = vst [vmem:[%s3495_s6 + $0x38] sm:$0xff] %v2280_v56   ;;  %2818 = vrcp.f32 %v1666_v5  ;;  %v1357_v27 = vadd.f32 %v1356_v20, %v3435_v4  ;;  %v1507_v5 = vadd.f32 %v1506_v14, %v3466_v33 }
 0x23f   : > { %v2807_v23 = vpop.eup %2806  ;;  %2820 = vpow2.f32 %v2164_v15  ;;  %v3601_v17 = vpop.f32.mrf.mxu1  ;;  %v1790_v53 = vadd.f32 %v1758_v36, %v1311_v1  ;;  %v1335_v36 = vadd.f32 %v3564_v19, %v3472_v55 }
 0x240   : > { %v2809_v62 = vpop.eup %2808  ;;  %v1667_v26 = vadd.f32 1.0, %v2807_v23  ;;  %v2165_v38 = vmul.f32 -1.442695, %v1357_v27  ;;  %v1331_v23 = vadd.f32 %v3557_v37, %v3472_v55  ;;  %v1512_v37 = vadd.f32 %v3599_v44, %v3466_v33 }
 0x241   : > { %v1759_v41 = vmul.f32 %v2809_v62, %v1491_v13  ;;  %v1362_v34 = vpop.f32.mrf.mxu1  ;;  %v2454_v62 = vpop.f32.mrf.mxu0  ;;  %v1345_v44 = vadd.f32 %v3579_v63, %v3472_v55 }
 0x242   : > { %2822 = vrcp.f32 %v1667_v26  ;;  %v1363_v50 = vadd.f32 %v1362_v34, %v3435_v4 }
 0x243   : > { %v2811_v45 = vpop.eup %2810  ;;  %v1791_v58 = vadd.f32 %v1759_v41, %v1315_v16  ;;  %2824 = vpow2.f32 %v2165_v38  ;;  %v3608_v8 = vpop.f32.mrf.mxu1 }
 0x244   : > { %v2813_v54 = vpop.eup %2812  ;;  %v1668_v59 = vadd.f32 1.0, %v2811_v45  ;;  %v2166_v32 = vmul.f32 -1.442695, %v1363_v50 }
 0x245   : > { %v2285_v18 = vpack.c.bf16 %v1791_v58, %v1790_v53  ;;  %v1366_v49 = vpop.f32.mrf.mxu1  ;;  %v1760_v11 = vmul.f32 %v2813_v54, %v1496_v9  ;;  %v1519_v58 = vpop.f32.mrf.mxu0  ;;  %v1515_v9 = vadd.f32 %v2451_v46, %v3466_v33 }
 0x246   : > { %2826 = vrcp.f32 %v1668_v59  ;;  %v1367_v57 = vadd.f32 %v1366_v49, %v3435_v4 }
 0x247   : > { %v2815_v60 = vpop.eup %2814  ;;  %2329 = vst [vmem:[%s3495_s6 + $0x40] sm:$0xff] %v2285_v18   ;;  %2828 = vpow2.f32 %v2166_v32  ;;  %v3615_v31 = vpop.f32.mrf.mxu1  ;;  %v1792_v52 = vadd.f32 %v1760_v11, %v1321_v42 }
 0x248   : > { %v2817_v43 = vpop.eup %2816  ;;  %v1669_v28 = vadd.f32 1.0, %v2815_v60  ;;  %v2167_v61 = vmul.f32 -1.442695, %v1367_v57  ;;  %v1341_v60 = vadd.f32 %v3570_v24, %v3472_v55 }
 0x249   : > { %v1761_v51 = vmul.f32 %v2817_v43, %v1499_v30  ;;  %v1372_v3 = vpop.f32.mrf.mxu1  ;;  %v2455_v30 = vpop.f32.mrf.mxu0 }
 0x24a   : > { %2830 = vrcp.f32 %v1669_v28  ;;  %v1373_v29 = vadd.f32 %v1372_v3, %v3435_v4 }
 0x24b   : > { %v2819_v7 = vpop.eup %2818  ;;  %v1793_v35 = vadd.f32 %v1761_v51, %v1325_v40  ;;  %2832 = vpow2.f32 %v2167_v61  ;;  %v3622_v2 = vpop.f32.mrf.mxu1 }
 0x24c   : > { %v2821_v10 = vpop.eup %2820  ;;  %v2168_v21 = vmul.f32 -1.442695, %v1373_v29  ;;  %v1762_v39 = vmul.f32 %v2819_v7, %v1504_v22  ;;  %v1522_v51 = vpop.f32.mrf.mxu0  ;;  %v1520_v29 = vadd.f32 %v1519_v58, %v3466_v33  ;;  %v1355_v22 = vadd.f32 %v3593_v48, %v3472_v55 }
 0x24d   : > { %v2290_v12 = vpack.c.bf16 %v1793_v35, %v1792_v52  ;;  %v1670_v56 = vadd.f32 1.0, %v2821_v10  ;;  %v1376_v0 = vpop.f32.mrf.mxu1  ;;  %v1523_v63 = vadd.f32 %v1522_v51, %v3466_v33  ;;  %v1351_v10 = vadd.f32 %v3586_v25, %v3472_v55 }
 0x24e   : > { %2834 = vpow2.f32 %v2168_v21  ;;  %v1377_v15 = vadd.f32 %v1376_v0, %v3435_v4  ;;  %v1794_v16 = vadd.f32 %v1762_v39, %v1331_v23  ;;  %v1531_v25 = vadd.f32 %v2455_v30, %v3466_v33 }
 0x24f   : > { %v2823_v6 = vpop.eup %2822  ;;  %2330 = vst [vmem:[%s3495_s6 + $0x48] sm:$0xff] %v2290_v12   ;;  %2836 = vrcp.f32 %v1670_v56  ;;  %v3628_v20 = vpop.f32.mrf.mxu1 }
 0x250   : > { %v2825_v27 = vpop.eup %2824  ;;  %v1763_v13 = vmul.f32 %v2823_v6, %v1507_v5  ;;  %v2169_v26 = vmul.f32 -1.442695, %v1377_v15  ;;  %v2458_v52 = vpop.f32.mrf.mxu0  ;;  %v1528_v6 = vadd.f32 %v2454_v62, %v3466_v33 }
 0x251   : > { %v1671_v38 = vadd.f32 1.0, %v2825_v27  ;;  %v1382_v1 = vpop.f32.mrf.mxu1 }
 0x252   : > { %v1795_v41 = vadd.f32 %v1763_v13, %v1335_v36  ;;  %2838 = vpow2.f32 %v2169_v26  ;;  %v1383_v34 = vadd.f32 %v1382_v1, %v3435_v4  ;;  %v1535_v39 = vpop.f32.mrf.mxu0  ;;  %v1365_v1 = vadd.f32 %v3608_v8, %v3472_v55 }
 0x253   : > { %v2827_v50 = vpop.eup %2826  ;;  %2840 = vrcp.f32 %v1671_v38  ;;  %v3635_v45 = vpop.f32.mrf.mxu1  ;;  %v1361_v38 = vadd.f32 %v3601_v17, %v3472_v55  ;;  %v1371_v17 = vadd.f32 %v3615_v31, %v3472_v55  ;;  %v1375_v8 = vadd.f32 %v3622_v2, %v3472_v55 }
 0x254   : > { %v2829_v53 = vpop.eup %2828  ;;  %v2295_v19 = vpack.c.bf16 %v1795_v41, %v1794_v16  ;;  %v2170_v47 = vmul.f32 -1.442695, %v1383_v34  ;;  %v1764_v32 = vmul.f32 %v2827_v50, %v1512_v37  ;;  %v2459_v13 = vpop.f32.mrf.mxu0  ;;  %v1381_v31 = vadd.f32 %v3628_v20, %v3472_v55 }
 0x255   : > { %v1672_v54 = vadd.f32 1.0, %v2829_v53  ;;  %v1386_v59 = vpop.f32.mrf.mxu1  ;;  %v1536_v53 = vadd.f32 %v1535_v39, %v3466_v33  ;;  %v1385_v2 = vadd.f32 %v3635_v45, %v3472_v55 }
 0x256   : > { %2331 = vst [vmem:[%s3495_s6 + $0x50] sm:$0xff] %v2295_v19   ;;  %2842 = vpow2.f32 %v2170_v47  ;;  %v1387_v18 = vadd.f32 %v1386_v59, %v3435_v4  ;;  %v1796_v61 = vadd.f32 %v1764_v32, %v1341_v60  ;;  %v1538_v50 = vpop.f32.mrf.mxu0  ;;  %v1547_v60 = vadd.f32 %v2459_v13, %v3466_v33 }
 0x257   : > { %v2831_v49 = vpop.eup %2830  ;;  %2844 = vrcp.f32 %v1672_v54  ;;  %v1539_v58 = vadd.f32 %v1538_v50, %v3466_v33 }
 0x258   : > { %v2833_v57 = vpop.eup %2832  ;;  %v1765_v11 = vmul.f32 %v2831_v49, %v1515_v9  ;;  %v2171_v43 = vmul.f32 -1.442695, %v1387_v18  ;;  %v1544_v18 = vadd.f32 %v2458_v52, %v3466_v33 }
 0x259   : > { %v1673_v28 = vadd.f32 1.0, %v2833_v57 }
 0x25a   : > { %v1797_v46 = vadd.f32 %v1765_v11, %v1345_v44  ;;  %2846 = vpow2.f32 %v2171_v43 }
 0x25b   : > { %v2835_v42 = vpop.eup %2834  ;;  %2848 = vrcp.f32 %v1673_v28 }
 0x25c   : > { %v2837_v4 = vpop.eup %2836  ;;  %v2300_v40 = vpack.c.bf16 %v1797_v46, %v1796_v61  ;;  %v1674_v3 = vadd.f32 1.0, %v2835_v42 }
 0x25d   : > { %v1766_v7 = vmul.f32 %v2837_v4, %v1520_v29 }
 0x25e   : > { %2332 = vst [vmem:[%s3495_s6 + $0x58] sm:$0xff] %v2300_v40   ;;  %2850 = vrcp.f32 %v1674_v3 }
 0x25f   : > { %v2839_v24 = vpop.eup %2838  ;;  %v1798_v56 = vadd.f32 %v1766_v7, %v1351_v10 }
 0x260   : > { %v2841_v35 = vpop.eup %2840  ;;  %v1675_v14 = vadd.f32 1.0, %v2839_v24 }
 0x261   : > { %v1767_v21 = vmul.f32 %v2841_v35, %v1523_v63 }
 0x262   : > { %2852 = vrcp.f32 %v1675_v14 }
 0x263   : > { %v2843_v12 = vpop.eup %2842  ;;  %v1799_v0 = vadd.f32 %v1767_v21, %v1355_v22 }
 0x264   : > { %v2845_v5 = vpop.eup %2844  ;;  %v1676_v15 = vadd.f32 1.0, %v2843_v12 }
 0x265   : > { %v2305_v27 = vpack.c.bf16 %v1799_v0, %v1798_v56  ;;  %v1768_v36 = vmul.f32 %v2845_v5, %v1528_v6 }
 0x266   : > { %2854 = vrcp.f32 %v1676_v15 }
 0x267   : > { %v2847_v23 = vpop.eup %2846  ;;  %2333 = vst [vmem:[%s3495_s6 + $0x60] sm:$0xff] %v2305_v27   ;;  %v1800_v41 = vadd.f32 %v1768_v36, %v1361_v38 }
 0x268   : > { %v2849_v48 = vpop.eup %2848  ;;  %v1677_v26 = vadd.f32 1.0, %v2847_v23 }
 0x269   : > { %v1769_v16 = vmul.f32 %v2849_v48, %v1531_v25 }
 0x26a   : > { %2856 = vrcp.f32 %v1677_v26 }
 0x26b   : > { %v2851_v62 = vpop.eup %2850  ;;  %v1801_v34 = vadd.f32 %v1769_v16, %v1365_v1 }
 0x26c   : > { %v1770_v19 = vmul.f32 %v2851_v62, %v1536_v53 }
 0x26d   : > { %v2310_v37 = vpack.c.bf16 %v1801_v34, %v1800_v41 }
 0x26e   : > { %v1802_v59 = vadd.f32 %v1770_v19, %v1371_v17 }
 0x26f   : > { %v2853_v47 = vpop.eup %2852  ;;  %2334 = vst [vmem:[%s3495_s6 + $0x68] sm:$0xff] %v2310_v37  }
 0x270   : > { %v1771_v54 = vmul.f32 %v2853_v47, %v1539_v58 }
 0x272   : > { %v1803_v32 = vadd.f32 %v1771_v54, %v1375_v8 }
 0x273   : > { %v2855_v9 = vpop.eup %2854 }
 0x274   : > { %v2315_v49 = vpack.c.bf16 %v1803_v32, %v1802_v59  ;;  %v1772_v57 = vmul.f32 %v2855_v9, %v1544_v18 }
 0x276   : > { %2335 = vst [vmem:[%s3495_s6 + $0x70] sm:$0xff] %v2315_v49   ;;  %v1804_v30 = vadd.f32 %v1772_v57, %v1381_v31 }
 0x277   : > { %v2857_v44 = vpop.eup %2856 }
 0x278   : > { %v1773_v11 = vmul.f32 %v2857_v44, %v1547_v60 }
 0x27a   : > { %v1805_v43 = vadd.f32 %v1773_v11, %v1385_v2 }
 0x27c   : > { %v2320_v33 = vpack.c.bf16 %v1805_v43, %v1804_v30 }
 0x27e   : > { %2336 = vst [vmem:[%s3495_s6 + $0x78] sm:$0xff] %v2320_v33  }
 0x27f   : > { %2871 = shalt.err (!%p2868_p3)
}
 0x280   : > { %s2872_s16 = scalar_lea.hbm %s3679_s11, 2048  ;;  %s2876_s25 = scalar_lea.hbm %s3731_s5, 4096 }
 0x281   : > { %p2873_p4 = scmp.ne.s32.totalorder %s3679_s11, %s2872_s16  ;;  %p2877_p9 = scmp.lt.s32.totalorder %s3679_s11, %s3731_s5 }
 0x282   : > { %p2878_p10 = scmp.lt.s32.totalorder %s2876_s25, %s2872_s16 }
 0x283   : > { %p2874_p7 = pnand %p2873_p4, %p2992_p5 }
 0x284   : > { %p2879_p11 = por %p2878_p10, %p2877_p9 }
 0x285   : > { %p2875_p8 = pneg %p2874_p7 }
 0x287   : > { %p2880_p12 = pnand %p2879_p11, %p2875_p8 }
 0x289   : > { %2883 = shalt.err (!%p2880_p12)
}
 0x28a   : > { %s2922_s6 = smov 64   ;;  %s2923_s7 = smov 4  }
 0x28b   : > { %2460 = dma.vmem_to_hbm [thread:$0]  (%p2992_p5), %s3681_s8, 2048, %s3679_s11, %s3686_s12, %s2922_s6, %s2922_s6, %s2923_s7  }
 0x28c PF: > { %p2466_p13 = scmp.ge.s32.totalorder %s2918_s21, 2  ;;  %s1995_s9 = sand.u32 1, %s2906_s18  }
 0x28d   : > { %s1996_s10 = scalar_lea.sflag [#allocation3], %s1995_s9 }
 0x28e   : > { %p2463_p0 = pnand %p2466_p13, %p2996_p6 }
 0x290   : > { %p2464_p1 = pneg %p2463_p0 }
 0x292   : > { %2901 = dma.done.wait (%p2464_p1), %s1996_s10, 2048  }
 0x293   : > { %2903 = vsyncadd (%p2464_p1), %s1996_s10, 4294965248  ;;  %p15_p2 = scmp.ge.s32.totalorder %s2979_s24, 4   ;;  %s3734_s18 = smov %s2910_s19 }
 0x294   : > { %s3735_s19 = smov %s2914_s20  ;;  %s3736_s20 = smov %s2990_s27 }
 0x295   : > { %s3737_s21 = smov %s2979_s24  ;;  %17 = sbr.rel (!%p15_p2) target bundleno = 3 (0x3), region = 75 }
 0x29a   :  { %2001 = vsyncpa [#allocation3], 1 }
 0x29b   :  { %2003 = vsyncpa [#allocation3 + $0x1], 1 }

// kernel: tpu_custom_call.1
= control target key start
LH: loop header
LB: loop body
LE: loop exit
PB: predicated region body
PF: predicated region fallthrough
CT: control target
= control target key end

     0   :  { %10 = vsyncpa [#allocation3], 0  ;;  %s3726_s0 = inlined_call_operand.vmem [shape: f32[512,16], index: 0, kind: input, shape index: {}]   ;;  %s3727_s1 = inlined_call_operand.vmem [shape: bf16[16,384], index: 1, kind: input, shape index: {}]   ;;  %s3728_s2 = inlined_call_operand.vmem [shape: f32[1,384], index: 2, kind: input, shape index: {}]   ;;  %s3729_s3 = inlined_call_operand.vmem [shape: bf16[128,384], index: 3, kind: input, shape index: {}]   ;;  %s3730_s4 = inlined_call_operand.vmem [shape: f32[1,384], index: 4, kind: input, shape index: {}]   ;;  %s3731_s5 = inlined_call_operand.hbm [shape: bf16[512,128], index: 5, kind: output, shape index: {}]  }
   0x1   :  { %12 = vsyncpa [#allocation3 + $0x1], 0  ;;  %s2954_s18 = smov 0   ;;  %s2956_s19 = smov 0  }
   0x2   :  { %s2958_s20 = smov 0   ;;  %s2960_s21 = smov 0  }
   0x3 LB: > { %s2975_s22 = sadd.s32 4294967295, %s2918_s21   ;;  %s2042_s23 = sadd.s32 4294967294, %s2918_s21   ;;  %s2918_s21 = sphi %s2960_s21, %s3737_s21   ;;  %s2914_s20 = sphi %s2958_s20, %s3736_s20   ;;  %s2910_s19 = sphi %s2956_s19, %s3735_s19   ;;  %s2906_s18 = sphi %s2954_s18, %s3734_s18  }
   0x4   : > { %s2979_s24 = sadd.s32 1, %s2918_s21   ;;  %s135_s25 = sadd.s32 1, %s2914_s20 }
   0x5   : > { %s132_s26 = ssub.s32 %s2918_s21, %s2979_s24  ;;  %p145_p0 = scmp.ne.s32.totalorder %s2914_s20, %s2910_s19 }
   0x6   : > { %p133_p1 = scmp.eq.s32.totalorder %s132_s26, 0  ;;  %p146_p2 = scmp.eq.s32.totalorder %s2975_s22, 1 }
   0x7   : > { %p151_p3 = scmp.ne.s32.totalorder %s2910_s19, %s2906_s18  ;;  %p152_p4 = scmp.eq.s32.totalorder %s2042_s23, 1 }
   0x8   : > { %s2990_s27 = scalar_select %p133_p1, %s2914_s20, %s135_s25  }
   0x9   : > { %p2992_p5 = por %p146_p2, %p145_p0  ;;  %p2996_p6 = por %p152_p4, %p151_p3 }
   0xa   : > { %p2045_p7 = scmp.ge.s32.totalorder %s2918_s21, 1  ;;  %p191_p8 = scmp.lt.s32.totalorder %s2918_s21, 3 }
   0xc   : > { %p192_p9 = pnand %p2045_p7, %p191_p8 }
   0xd   : > { %s2047_s7 = sshll.u32 (!%p192_p9), %s2975_s22, 5  ;;  %s216_s26 = sand.u32 (!%p192_p9), 1, %s2910_s19  }
   0xe   : > { %195 = sbr.rel (%p192_p9) target bundleno = 652 (0x28c), region = 40  ;;  %p220_p10 = scmp.lt.s32.totalorder (!%p192_p9), %s2047_s7, 63 }
   0xf   : > { %s2046_s30 = sshll.u32 (!%p192_p9), %s216_s26, 7  ;;  %s3686_s12 = scalar_lea.sflag (!%p192_p9), [#allocation3], %s216_s26 }
  0x10   : > { %s3495_s6 = scalar_lea.vmem (!%p192_p9), [#allocation2], %s2046_s30 }
  0x11   : > { %s1980_s8 = sshll.u32 (!%p192_p9), %s3495_s6, 4  ;;  %s3681_s8 = int_to_ptr.vmem [resolvable:$true] %s1980_s8 }
  0x12   : > { %s2858_s13 = scalar_lea.vmem (!%p192_p9), %s3681_s8, 2048 }
  0x13   : > { %v2502_v0 = vld [vmem:[%s3727_s1 + $0x4] ss:$12 sps:$4 sm:$0xff]   ;;  %v2504_v1 = vld [vmem:[%s3727_s1] ss:$12 sps:$4 sm:$0xff]   ;;  %v2920_v2 = vmov 0   ;;  %s3739_s7 = smov (!%p220_p10, %s2047_s7), 63  ;;  %p2859_p11 = scmp.ne.s32.totalorder %s3681_s8, %s2858_s13 }
  0x14   : > { %393 = vmatprep.mubr.bf16.mxu0 %v2920_v2  ;;  %375 = vmatprep.subr.bf16.mxu0 %v2502_v0  ;;  %v2505_v3 = vld [vmem:[%s3727_s1 + $0x8] ss:$12 sps:$4 sm:$0xff]   ;;  %v2508_v4 = vld [vmem:[%s3729_s3 + $0xac] ss:$12 sps:$4 sm:$0xff]   ;;  %s2048_s14 = sshll.u32 %s3739_s7, 3  ;;  %vm312_vm0 = vcmask 130048  }
  0x15   : > { %376 = vmatpush1.bf16.msra.mxu0 %v2504_v1  ;;  %2378 = vmatprep.subr.bf16.mxu1 %v2505_v3  ;;  %s3019_s17 = scalar_lea.vmem %s3726_s0, %s2048_s14  ;;  %v2506_v5 = vld [vmem:[%s3729_s3 + $0xa8] ss:$12 sps:$4 sm:$0xff]   ;;  %v2509_v54 = vld [vmem:[%s3729_s3 + $0x90] ss:$12 sps:$4 sm:$0xff]   ;;  %v2512_v56 = vld [vmem:[%s3729_s3 + $0x78] ss:$12 sps:$4 sm:$0xff]   ;;  %p2860_p12 = pnand %p2859_p11, %p2992_p5 }
  0x16   : > { %2379 = vmatpush3.bf16.msra.mxu1 %v2505_v3  ;;  %v227_v6 = vld [vmem:[%s3019_s17] sm:$0xff]  ;;  %v228_v7 = vld [vmem:[%s3019_s17 + $0x8] sm:$0xff]  ;;  %v229_v8 = vld [vmem:[%s3019_s17 + $0x10] sm:$0xff]  ;;  %s2241_s7 = sshll.u32 %s2975_s22, 11  ;;  %s2921_s22 = smov [#allocation2]  }
  0x17   : > { %1196 = vmatprep.subr.bf16.mxu1 %v2508_v4  ;;  %v259_v9 = vpack.c.bf16 %v228_v7, %v227_v6  ;;  %v230_v10 = vld [vmem:[%s3019_s17 + $0x18] sm:$0xff]  ;;  %v231_v11 = vld [vmem:[%s3019_s17 + $0x20] sm:$0xff]  ;;  %v232_v12 = vld [vmem:[%s3019_s17 + $0x28] sm:$0xff]  ;;  %s3679_s11 = scalar_lea.hbm %s3731_s5, %s2241_s7  ;;  %p2861_p13 = pneg %p2860_p12 }
  0x18   : > { %v260_v13 = vpack.c.bf16 %v230_v10, %v229_v8  ;;  %v261_v14 = vpack.c.bf16 %v232_v12, %v231_v11  ;;  %v233_v15 = vld [vmem:[%s3019_s17 + $0x30] sm:$0xff]  ;;  %v234_v16 = vld [vmem:[%s3019_s17 + $0x38] sm:$0xff]  ;;  %v235_v17 = vld [vmem:[%s3019_s17 + $0x40] sm:$0xff]  ;;  %s2862_s14 = sshll.u32 %s2921_s22, 4  ;;  %s2863_s14 = int_to_ptr.vmem [resolvable:$false] %s2862_s14 }
  0x19   : > { %2052 = vmatmul.mubr.msk.bf16.vlgmr.msra.gmra.mxu0 %vm312_vm0, %v259_v9  ;;  %2380 = vmatprep.mubr.msk.bf16.mxu1 %vm312_vm0, %v259_v9  ;;  %v236_v18 = vld [vmem:[%s3019_s17 + $0x48] sm:$0xff]  ;;  %v262_v19 = vpack.c.bf16 %v234_v16, %v233_v15  ;;  %v237_v21 = vld [vmem:[%s3019_s17 + $0x50] sm:$0xff]  ;;  %v238_v22 = vld [vmem:[%s3019_s17 + $0x58] sm:$0xff]  ;;  %s2864_s15 = scalar_lea.vmem %s2863_s14, 4096  ;;  %p2865_p0 = scmp.lt.s32.totalorder %s3681_s8, %s2863_s14 }
  0x1a   : > { %403 = vmatprep.mubr.bf16.mxu0 %v2920_v2  ;;  %2381 = vmatmul.mubr.msk.bf16.vlgmr.msra.gmra.mxu1 %vm312_vm0, %v260_v13  ;;  %v263_v20 = vpack.c.bf16 %v236_v18, %v235_v17  ;;  %v239_v23 = vld [vmem:[%s3019_s17 + $0x60] sm:$0xff]  ;;  %v240_v24 = vld [vmem:[%s3019_s17 + $0x68] sm:$0xff]  ;;  %v264_v25 = vpack.c.bf16 %v238_v22, %v237_v21  ;;  %v241_v27 = vld [vmem:[%s3019_s17 + $0x70] sm:$0xff]  ;;  %p2866_p1 = scmp.lt.s32.totalorder %s2864_s15, %s2858_s13 }
  0x1b   : > { %2384 = vmatprep.mubr.msk.bf16.mxu1 %vm312_vm0, %v261_v14  ;;  %1197 = vmatpush1.bf16.msra.mxu1 %v2506_v5  ;;  %v265_v26 = vpack.c.bf16 %v240_v24, %v239_v23  ;;  %v242_v28 = vld [vmem:[%s3019_s17 + $0x78] sm:$0xff]  ;;  %v243_v29 = vld [vmem:[%s3019_s17 + $0x80] sm:$0xff]  ;;  %v244_v30 = vld [vmem:[%s3019_s17 + $0x88] sm:$0xff] }
  0x1c   : > { %v266_v31 = vpack.c.bf16 %v242_v28, %v241_v27  ;;  %v267_v32 = vpack.c.bf16 %v244_v30, %v243_v29  ;;  %v245_v33 = vld [vmem:[%s3019_s17 + $0x90] sm:$0xff]  ;;  %v246_v34 = vld [vmem:[%s3019_s17 + $0x98] sm:$0xff]  ;;  %v247_v35 = vld [vmem:[%s3019_s17 + $0xa0] sm:$0xff]  ;;  %p2867_p2 = por %p2866_p1, %p2865_p0 }
  0x1d   : > { %v248_v36 = vld [vmem:[%s3019_s17 + $0xa8] sm:$0xff]  ;;  %v268_v37 = vpack.c.bf16 %v246_v34, %v245_v33  ;;  %v249_v39 = vld [vmem:[%s3019_s17 + $0xb0] sm:$0xff]  ;;  %v250_v40 = vld [vmem:[%s3019_s17 + $0xb8] sm:$0xff] }
  0x1e   : > { %v269_v38 = vpack.c.bf16 %v248_v36, %v247_v35  ;;  %v251_v41 = vld [vmem:[%s3019_s17 + $0xc0] sm:$0xff]  ;;  %v252_v42 = vld [vmem:[%s3019_s17 + $0xc8] sm:$0xff]  ;;  %v270_v43 = vpack.c.bf16 %v250_v40, %v249_v39  ;;  %v253_v45 = vld [vmem:[%s3019_s17 + $0xd0] sm:$0xff]  ;;  %p2868_p3 = pnand %p2867_p2, %p2861_p13 }
  0x1f   : > { %v271_v44 = vpack.c.bf16 %v252_v42, %v251_v41  ;;  %v254_v46 = vld [vmem:[%s3019_s17 + $0xd8] sm:$0xff]  ;;  %v255_v47 = vld [vmem:[%s3019_s17 + $0xe0] sm:$0xff]  ;;  %v256_v48 = vld [vmem:[%s3019_s17 + $0xe8] sm:$0xff] }
  0x20   : > { %v272_v49 = vpack.c.bf16 %v254_v46, %v253_v45  ;;  %v273_v50 = vpack.c.bf16 %v256_v48, %v255_v47  ;;  %v257_v51 = vld [vmem:[%s3019_s17 + $0xf0] sm:$0xff]  ;;  %v258_v52 = vld [vmem:[%s3019_s17 + $0xf8] sm:$0xff]  ;;  %v2515_v59 = vld [vmem:[%s3729_s3 + $0x60] ss:$12 sps:$4 sm:$0xff]  }
  0x21   : > { %2053 = vmatmul.mubr.msk.bf16.gmra.mxu0 %vm312_vm0, %v260_v13  ;;  %v274_v53 = vpack.c.bf16 %v258_v52, %v257_v51  ;;  %v2511_v55 = vld [vmem:[%s3729_s3 + $0x94] ss:$12 sps:$4 sm:$0xff]   ;;  %v2514_v57 = vld [vmem:[%s3729_s3 + $0x7c] ss:$12 sps:$4 sm:$0xff]   ;;  %v2517_v60 = vld [vmem:[%s3729_s3 + $0x64] ss:$12 sps:$4 sm:$0xff]   ;;  %v281_v13 = vlaneseq }
  0x22   : > { %413 = vmatprep.mubr.bf16.mxu0 %v2920_v2  ;;  %2385 = vmatmul.mubr.msk.bf16.gmra.mxu1 %vm312_vm0, %v262_v19  ;;  %v2521_v58 = vld [vmem:[%s3729_s3 + $0xb0] ss:$12 sps:$4 sm:$0xff]   ;;  %v2525_v61 = vld [vmem:[%s3729_s3 + $0x98] ss:$12 sps:$4 sm:$0xff]   ;;  %v2529_v63 = vld [vmem:[%s3729_s3 + $0x80] ss:$12 sps:$4 sm:$0xff]  }
  0x23   : > { %2388 = vmatprep.mubr.msk.bf16.mxu1 %vm312_vm0, %v263_v20  ;;  %1198 = vmatprep.subr.bf16.mxu1 %v2511_v55  ;;  %v2520_v62 = vld [vmem:[%s3729_s3 + $0x4c] ss:$12 sps:$4 sm:$0xff]   ;;  %v2518_v0 = vld [vmem:[%s3729_s3 + $0x48] ss:$12 sps:$4 sm:$0xff]   ;;  %v2522_v4 = vld [vmem:[%s3729_s3 + $0x30] ss:$12 sps:$4 sm:$0xff]  }
  0x24   : > { %1199 = vmatpush1.bf16.msra.mxu1 %v2509_v54  ;;  %2412 = vmatprep.subr.bf16.mxu0 %v2521_v58  ;;  %v2524_v1 = vld [vmem:[%s3729_s3 + $0x34] ss:$12 sps:$4 sm:$0xff]   ;;  %v2528_v5 = vld [vmem:[%s3729_s3 + $0x1c] ss:$12 sps:$4 sm:$0xff]   ;;  %v2526_v7 = vld [vmem:[%s3729_s3 + $0x18] ss:$12 sps:$4 sm:$0xff]  }
  0x25   : > { %1200 = vmatprep.subr.bf16.mxu1 %v2514_v57  ;;  %2413 = vmatpush3.bf16.msra.mxu0 %v2521_v58  ;;  %v2530_v3 = vld [vmem:[%s3729_s3 + $0x68] ss:$12 sps:$4 sm:$0xff]   ;;  %v2534_v6 = vld [vmem:[%s3729_s3 + $0x50] ss:$12 sps:$4 sm:$0xff]   ;;  %v2535_v9 = vld [vmem:[%s3729_s3 + $0x38] ss:$12 sps:$4 sm:$0xff]  }
  0x26   : > { %2414 = vmatprep.subr.bf16.mxu0 %v2525_v61  ;;  %v2533_v8 = vld [vmem:[%s3729_s3 + $0x4] ss:$12 sps:$4 sm:$0xff]   ;;  %v2531_v10 = vld [vmem:[%s3729_s3] ss:$12 sps:$4 sm:$0xff]   ;;  %v2537_v12 = vld [vmem:[%s3729_s3 + $0x8] ss:$12 sps:$4 sm:$0xff]  }
  0x27   : > { %v2536_v11 = vld [vmem:[%s3729_s3 + $0x20] ss:$12 sps:$4 sm:$0xff]  }
  0x28   : > { %1201 = vmatpush1.bf16.msra.mxu1 %v2512_v56  ;;  %v279_v16 = vld [vmem:[%s3728_s2] sm:$0x7] }
  0x29   : > { %2054 = vmatmul.mubr.msk.bf16.gmra.mxu0 %vm312_vm0, %v261_v14  ;;  %1202 = vmatprep.subr.bf16.mxu1 %v2517_v60  ;;  %v3170_v14 = vshrl.u32 %v281_v13, 7 }
  0x2a   : > { %423 = vmatprep.mubr.bf16.mxu0 %v2920_v2  ;;  %2389 = vmatmul.mubr.msk.bf16.gmra.mxu1 %vm312_vm0, %v264_v25 }
  0x2b   : > { %2392 = vmatprep.mubr.msk.bf16.mxu1 %vm312_vm0, %v265_v26  ;;  %2415 = vmatpush3.bf16.msra.mxu0 %v2525_v61  ;;  %v287_v15 = vsub.s32 1, %v3170_v14  ;;  %v283_v54 = vsub.s32 0, %v3170_v14 }
  0x2c   : > { %1203 = vmatpush1.bf16.msra.mxu1 %v2515_v59  ;;  %2416 = vmatprep.subr.bf16.mxu0 %v2529_v63 }
  0x2d   : > { %1204 = vmatprep.subr.bf16.mxu1 %v2520_v62  ;;  %v3178_v17 = vrot.slane %v279_v16, %v287_v15 }
  0x2f   : > { %2417 = vmatpush3.bf16.msra.mxu0 %v2529_v63  ;;  %v3214_v63 = vrot.slane %v279_v16, %v283_v54 }
  0x30   : > { %1205 = vmatpush1.bf16.msra.mxu1 %v2518_v0  ;;  %2418 = vmatprep.subr.bf16.mxu0 %v2530_v3 }
  0x31   : > { %2055 = vmatmul.mubr.msk.bf16.gmra.mxu0 %vm312_vm0, %v262_v19  ;;  %1206 = vmatprep.subr.bf16.mxu1 %v2524_v1 }
  0x32   : > { %433 = vmatprep.mubr.bf16.mxu0 %v2920_v2  ;;  %2393 = vmatmul.mubr.msk.bf16.gmra.mxu1 %vm312_vm0, %v266_v31 }
  0x33   : > { %2396 = vmatprep.mubr.msk.bf16.mxu1 %vm312_vm0, %v267_v32  ;;  %2419 = vmatpush3.bf16.msra.mxu0 %v2530_v3 }
  0x34   : > { %1207 = vmatpush1.bf16.msra.mxu1 %v2522_v4  ;;  %2420 = vmatprep.subr.bf16.mxu0 %v2534_v6 }
  0x35   : > { %1208 = vmatprep.subr.bf16.mxu1 %v2528_v5 }
  0x37   : > { %2421 = vmatpush3.bf16.msra.mxu0 %v2534_v6 }
  0x38   : > { %1209 = vmatpush1.bf16.msra.mxu1 %v2526_v7  ;;  %2422 = vmatprep.subr.bf16.mxu0 %v2535_v9 }
  0x39   : > { %2056 = vmatmul.mubr.msk.bf16.gmra.mxu0 %vm312_vm0, %v263_v20  ;;  %1210 = vmatprep.subr.bf16.mxu1 %v2533_v8 }
  0x3a   : > { %443 = vmatprep.mubr.bf16.mxu0 %v2920_v2  ;;  %2397 = vmatmul.mubr.msk.bf16.gmra.mxu1 %vm312_vm0, %v268_v37 }
  0x3b   : > { %2400 = vmatprep.mubr.msk.bf16.mxu1 %vm312_vm0, %v269_v38  ;;  %2423 = vmatpush3.bf16.msra.mxu0 %v2535_v9 }
  0x3c   : > { %1211 = vmatpush1.bf16.msra.mxu1 %v2531_v10  ;;  %2424 = vmatprep.subr.bf16.mxu0 %v2536_v11 }
  0x3f   : > { %2425 = vmatpush3.bf16.msra.mxu0 %v2536_v11 }
  0x40   : > { %2426 = vmatprep.subr.bf16.mxu0 %v2537_v12 }
  0x41   : > { %2057 = vmatmul.mubr.msk.bf16.gmra.mxu0 %vm312_vm0, %v264_v25 }
  0x42   : > { %453 = vmatprep.mubr.bf16.mxu0 %v2920_v2  ;;  %2401 = vmatmul.mubr.msk.bf16.gmra.mxu1 %vm312_vm0, %v270_v43 }
  0x43   : > { %2404 = vmatprep.mubr.msk.bf16.mxu1 %vm312_vm0, %v271_v44  ;;  %2427 = vmatpush3.bf16.msra.mxu0 %v2537_v12 }
  0x49   : > { %2058 = vmatmul.mubr.msk.bf16.gmra.mxu0 %vm312_vm0, %v265_v26 }
  0x4a   : > { %463 = vmatprep.mubr.bf16.mxu0 %v2920_v2  ;;  %2405 = vmatmul.mubr.msk.bf16.gmra.mxu1 %vm312_vm0, %v272_v49 }
  0x4b   : > { %2408 = vmatprep.mubr.msk.bf16.mxu1 %vm312_vm0, %v273_v50 }
  0x51   : > { %2059 = vmatmul.mubr.msk.bf16.gmra.mxu0 %vm312_vm0, %v266_v31 }
  0x52   : > { %473 = vmatprep.mubr.bf16.mxu0 %v2920_v2  ;;  %2409 = vmatmul.mubr.msk.bf16.gmra.mxu1 %vm312_vm0, %v274_v53 }
  0x53   : > { %1228 = vmatprep.mubr.bf16.mxu1 %v2920_v2 }
  0x59   : > { %2060 = vmatmul.mubr.msk.bf16.gmra.mxu0 %vm312_vm0, %v267_v32 }
  0x5a   : > { %483 = vmatprep.mubr.bf16.mxu0 %v2920_v2 }
  0x61   : > { %2061 = vmatmul.mubr.msk.bf16.gmra.mxu0 %vm312_vm0, %v268_v37 }
  0x62   : > { %493 = vmatprep.mubr.bf16.mxu0 %v2920_v2 }
  0x69   : > { %2062 = vmatmul.mubr.msk.bf16.gmra.mxu0 %vm312_vm0, %v269_v38 }
  0x6a   : > { %503 = vmatprep.mubr.bf16.mxu0 %v2920_v2 }
  0x71   : > { %2063 = vmatmul.mubr.msk.bf16.gmra.mxu0 %vm312_vm0, %v270_v43 }
  0x72   : > { %513 = vmatprep.mubr.bf16.mxu0 %v2920_v2 }
  0x79   : > { %2064 = vmatmul.mubr.msk.bf16.gmra.mxu0 %vm312_vm0, %v271_v44 }
  0x7a   : > { %523 = vmatprep.mubr.bf16.mxu0 %v2920_v2 }
  0x81   : > { %2065 = vmatmul.mubr.msk.bf16.gmra.mxu0 %vm312_vm0, %v272_v49 }
  0x82   : > { %533 = vmatprep.mubr.bf16.mxu0 %v2920_v2 }
  0x89   : > { %2066 = vmatmul.mubr.msk.bf16.gmra.mxu0 %vm312_vm0, %v273_v50  ;;  %v291_v50 = vsub.s32 2, %v3170_v14 }
  0x8a   : > { %543 = vmatprep.mubr.bf16.mxu0 %v2920_v2 }
  0x8b   : > { %v3207_v58 = vrot.slane %v279_v16, %v291_v50 }
  0x91   : > { %2067 = vmatmul.mubr.msk.bf16.gmra.mxu0 %vm312_vm0, %v274_v53 }
  0xd9   : > { %v3180_v18 = vpop.f32.mrf.mxu0 }
  0xda   : > { %v2382_v45 = vpop.f32.mrf.mxu1  ;;  %v396_v10 = vadd.f32 %v3180_v18, %v3214_v63 }
  0xdb   : > { %v397_v19 = vpop.f32.mrf.mxu0 }
  0xdc   : > { %v398_v20 = vadd.f32 %v397_v19, %v3178_v17  ;;  %v588_v53 = vpop.f32.mrf.mxu1 }
  0xdd   : > { %v3183_v21 = vpop.f32.mrf.mxu0  ;;  %v589_v4 = vadd.f32 %v588_v53, %v3207_v58 }
  0xde   : > { %v2084_v22 = vmul.f32 -1.442695, %v398_v20  ;;  %v2383_v61 = vpop.f32.mrf.mxu1 }
  0xdf   : > { %v401_v23 = vpop.f32.mrf.mxu0 }
  0xe0   : > { %2538 = vpow2.f32 %v2084_v22  ;;  %v402_v24 = vadd.f32 %v401_v23, %v3178_v17  ;;  %v591_v7 = vpop.f32.mrf.mxu1 }
  0xe1   : > { %v3186_v25 = vpop.f32.mrf.mxu0  ;;  %v592_v20 = vadd.f32 %v591_v7, %v3207_v58 }
  0xe2   : > { %v2085_v26 = vmul.f32 -1.442695, %v402_v24 }
  0xe3   : > { %v407_v27 = vpop.f32.mrf.mxu0 }
  0xe4   : > { %2540 = vpow2.f32 %v2085_v26  ;;  %v408_v28 = vadd.f32 %v407_v27, %v3178_v17  ;;  %v400_v27 = vadd.f32 %v3183_v21, %v3214_v63  ;;  %v406_v21 = vadd.f32 %v3186_v25, %v3214_v63 }
  0xe5   : > { %v3189_v29 = vpop.f32.mrf.mxu0 }
  0xe6   : > { %v2086_v30 = vmul.f32 -1.442695, %v408_v28  ;;  %v410_v25 = vadd.f32 %v3189_v29, %v3214_v63 }
  0xe7   : > { %v411_v31 = vpop.f32.mrf.mxu0 }
  0xe8   : > { %2542 = vpow2.f32 %v2086_v30  ;;  %v412_v32 = vadd.f32 %v411_v31, %v3178_v17  ;;  %v3228_v30 = vpop.f32.mrf.mxu1 }
  0xe9   : > { %v3192_v33 = vpop.f32.mrf.mxu0 }
  0xea   : > { %v2087_v34 = vmul.f32 -1.442695, %v412_v32 }
  0xeb   : > { %v417_v35 = vpop.f32.mrf.mxu0 }
  0xec   : > { %2544 = vpow2.f32 %v2087_v34  ;;  %v418_v36 = vadd.f32 %v417_v35, %v3178_v17  ;;  %v597_v34 = vadd.f32 %v2382_v45, %v3207_v58  ;;  %v600_v45 = vadd.f32 %v2383_v61, %v3207_v58 }
  0xed   : > { %v2539_v37 = vpop.eup %2538  ;;  %v3195_v38 = vpop.f32.mrf.mxu0 }
  0xee   : > { %v811_v39 = vadd.f32 1.0, %v2539_v37  ;;  %v2088_v40 = vmul.f32 -1.442695, %v418_v36 }
  0xef   : > { %v421_v41 = vpop.f32.mrf.mxu0 }
  0xf0   : > { %2546 = vrcp.f32 %v811_v39  ;;  %v422_v42 = vadd.f32 %v421_v41, %v3178_v17 }
  0xf1   : > { %v2541_v43 = vpop.eup %2540  ;;  %2548 = vpow2.f32 %v2088_v40  ;;  %v3198_v44 = vpop.f32.mrf.mxu0 }
  0xf2   : > { %v812_v46 = vadd.f32 1.0, %v2541_v43  ;;  %v2089_v47 = vmul.f32 -1.442695, %v422_v42  ;;  %v604_v43 = vpop.f32.mrf.mxu1 }
  0xf3   : > { %v427_v48 = vpop.f32.mrf.mxu0 }
  0xf4   : > { %2550 = vrcp.f32 %v812_v46  ;;  %v428_v49 = vadd.f32 %v427_v48, %v3178_v17 }
  0xf5   : > { %v2543_v51 = vpop.eup %2542  ;;  %2552 = vpow2.f32 %v2089_v47  ;;  %v3202_v52 = vpop.f32.mrf.mxu0 }
  0xf6   : > { %v813_v55 = vadd.f32 1.0, %v2543_v51  ;;  %v2090_v56 = vmul.f32 -1.442695, %v428_v49 }
  0xf7   : > { %v431_v57 = vpop.f32.mrf.mxu0 }
  0xf8   : > { %2554 = vrcp.f32 %v813_v55  ;;  %v432_v59 = vadd.f32 %v431_v57, %v3178_v17 }
  0xf9   : > { %v2545_v60 = vpop.eup %2544  ;;  %2556 = vpow2.f32 %v2090_v56  ;;  %v3210_v62 = vpop.f32.mrf.mxu0 }
  0xfa   : > { %v814_v0 = vadd.f32 1.0, %v2545_v60  ;;  %v2091_v1 = vmul.f32 -1.442695, %v432_v59  ;;  %v2387_v59 = vpop.f32.mrf.mxu1 }
  0xfb   : > { %v437_v3 = vpop.f32.mrf.mxu0 }
  0xfc   : > { %2558 = vrcp.f32 %v814_v0  ;;  %v438_v5 = vadd.f32 %v437_v3, %v3178_v17  ;;  %v607_v29 = vpop.f32.mrf.mxu1 }
  0xfd   : > { %v2547_v6 = vpop.eup %2546  ;;  %2560 = vpow2.f32 %v2091_v1  ;;  %v3218_v8 = vpop.f32.mrf.mxu0 }
  0xfe   : > { %v2549_v9 = vpop.eup %2548  ;;  %v907_v11 = vmul.f32 %v2547_v6, %v589_v4  ;;  %v2092_v12 = vmul.f32 -1.442695, %v438_v5  ;;  %v605_v4 = vadd.f32 %v604_v43, %v3207_v58 }
  0xff   : > { %v815_v13 = vadd.f32 1.0, %v2549_v9  ;;  %v441_v16 = vpop.f32.mrf.mxu0 }
 0x100   : > { %v939_v19 = vadd.f32 %v907_v11, %v396_v10  ;;  %2562 = vpow2.f32 %v2092_v12  ;;  %v442_v22 = vadd.f32 %v441_v16, %v3178_v17 }
 0x101   : > { %v2551_v23 = vpop.eup %2550  ;;  %2564 = vrcp.f32 %v815_v13  ;;  %v3224_v24 = vpop.f32.mrf.mxu0  ;;  %v416_v13 = vadd.f32 %v3192_v33, %v3214_v63 }
 0x102   : > { %v2553_v26 = vpop.eup %2552  ;;  %v908_v28 = vmul.f32 %v2551_v23, %v592_v20  ;;  %v2093_v18 = vmul.f32 -1.442695, %v442_v22  ;;  %2566 = vtanh.f32 %v939_v19  ;;  %v608_v20 = vadd.f32 %v607_v29, %v3207_v58  ;;  %v3252_v23 = vpop.f32.mrf.mxu1 }
 0x103   : > { %v816_v31 = vadd.f32 1.0, %v2553_v26  ;;  %v447_v32 = vpop.f32.mrf.mxu0 }
 0x104   : > { %v940_v35 = vadd.f32 %v908_v28, %v400_v27  ;;  %2568 = vpow2.f32 %v2093_v18  ;;  %v448_v36 = vadd.f32 %v447_v32, %v3178_v17  ;;  %v420_v32 = vadd.f32 %v3195_v38, %v3214_v63 }
 0x105   : > { %v2555_v37 = vpop.eup %2554  ;;  %2570 = vrcp.f32 %v816_v31  ;;  %v3232_v39 = vpop.f32.mrf.mxu0 }
 0x106   : > { %v2557_v40 = vpop.eup %2556  ;;  %v909_v41 = vmul.f32 %v2555_v37, %v597_v34  ;;  %2572 = vtanh.f32 %v940_v35  ;;  %v2094_v42 = vmul.f32 -1.442695, %v448_v36 }
 0x107   : > { %v817_v46 = vadd.f32 1.0, %v2557_v40  ;;  %v451_v47 = vpop.f32.mrf.mxu0  ;;  %v613_v40 = vadd.f32 %v3228_v30, %v3207_v58  ;;  %v426_v30 = vadd.f32 %v3198_v44, %v3214_v63 }
 0x108   : > { %v941_v48 = vadd.f32 %v909_v41, %v406_v21  ;;  %2574 = vpow2.f32 %v2094_v42  ;;  %v452_v49 = vadd.f32 %v451_v47, %v3178_v17  ;;  %v620_v42 = vpop.f32.mrf.mxu1 }
 0x109   : > { %v2559_v51 = vpop.eup %2558  ;;  %2576 = vrcp.f32 %v817_v46  ;;  %v3238_v53 = vpop.f32.mrf.mxu0 }
 0x10a   : > { %v2561_v55 = vpop.eup %2560  ;;  %v910_v56 = vmul.f32 %v2559_v51, %v600_v45  ;;  %v2095_v57 = vmul.f32 -1.442695, %v452_v49  ;;  %2578 = vtanh.f32 %v941_v48 }
 0x10b   : > { %v818_v60 = vadd.f32 1.0, %v2561_v55  ;;  %v457_v0 = vpop.f32.mrf.mxu0  ;;  %v616_v55 = vadd.f32 %v2387_v59, %v3207_v58 }
 0x10c   : > { %v942_v1 = vadd.f32 %v910_v56, %v410_v25  ;;  %2580 = vpow2.f32 %v2095_v57  ;;  %v458_v61 = vadd.f32 %v457_v0, %v3178_v17  ;;  %v3266_v25 = vpop.f32.mrf.mxu1 }
 0x10d   : > { %v2563_v3 = vpop.eup %2562  ;;  %2582 = vrcp.f32 %v818_v60  ;;  %v3244_v5 = vpop.f32.mrf.mxu0 }
 0x10e   : > { %v2565_v6 = vpop.eup %2564  ;;  %2584 = vtanh.f32 %v942_v1  ;;  %v819_v7 = vadd.f32 1.0, %v2563_v3  ;;  %v2096_v9 = vmul.f32 -1.442695, %v458_v61  ;;  %v430_v3 = vadd.f32 %v3202_v52, %v3214_v63 }
 0x10f   : > { %v911_v10 = vmul.f32 %v2565_v6, %v605_v4  ;;  %v461_v11 = vpop.f32.mrf.mxu0  ;;  %v2567_v12 = vpop.eup %2566  ;;  %v621_v6 = vadd.f32 %v620_v42, %v3207_v58  ;;  %v629_v42 = vadd.f32 %v3252_v23, %v3207_v58 }
 0x110   : > { %2586 = vrcp.f32 %v819_v7  ;;  %v462_v16 = vadd.f32 %v461_v11, %v3178_v17 }
 0x111   : > { %v2569_v19 = vpop.eup %2568  ;;  %2588 = vpow2.f32 %v2096_v9  ;;  %v3250_v22 = vpop.f32.mrf.mxu0  ;;  %v943_v28 = vadd.f32 %v911_v10, %v416_v13  ;;  %v436_v13 = vadd.f32 %v3210_v62, %v3214_v63 }
 0x112   : > { %v2571_v26 = vpop.eup %2570  ;;  %v820_v27 = vadd.f32 1.0, %v2569_v19  ;;  %v2097_v18 = vmul.f32 -1.442695, %v462_v16  ;;  %v623_v10 = vpop.f32.mrf.mxu1 }
 0x113   : > { %v2573_v31 = vpop.eup %2572  ;;  %v912_v33 = vmul.f32 %v2571_v26, %v608_v20  ;;  %v467_v34 = vpop.f32.mrf.mxu0 }
 0x114   : > { %2590 = vrcp.f32 %v820_v27  ;;  %v468_v35 = vadd.f32 %v467_v34, %v3178_v17  ;;  %v1003_v36 = vpack.c.bf16 %v2573_v31, %v2567_v12  ;;  %v624_v27 = vadd.f32 %v623_v10, %v3207_v58 }
 0x115   : > { %v2575_v37 = vpop.eup %2574  ;;  %v944_v21 = vadd.f32 %v912_v33, %v420_v32  ;;  %2592 = vpow2.f32 %v2097_v18  ;;  %v3259_v41 = vpop.f32.mrf.mxu0  ;;  %v440_v32 = vadd.f32 %v3218_v8, %v3214_v63 }
 0x116   : > { %v2577_v43 = vpop.eup %2576  ;;  %v821_v46 = vadd.f32 1.0, %v2575_v37  ;;  %2594 = vtanh.f32 %v943_v28  ;;  %v2098_v47 = vmul.f32 -1.442695, %v468_v35  ;;  %1229 = vmatmul.mubr.bf16.vlgmr.msra.gmra.mxu1 %v1003_v36  ;;  %2428 = vmatprep.mubr.bf16.mxu0 %v1003_v36  ;;  %v3285_v35 = vpop.f32.mrf.mxu1 }
 0x117   : > { %v913_v38 = vmul.f32 %v2577_v43, %v613_v40  ;;  %2596 = vtanh.f32 %v944_v21  ;;  %v471_v48 = vpop.f32.mrf.mxu0  ;;  %1238 = vmatprep.mubr.bf16.mxu1 %v2920_v2  ;;  %v2579_v45 = vpop.eup %2578 }
 0x118   : > { %2598 = vrcp.f32 %v821_v46  ;;  %v472_v49 = vadd.f32 %v471_v48, %v3178_v17 }
 0x119   : > { %v2581_v51 = vpop.eup %2580  ;;  %2600 = vpow2.f32 %v2098_v47  ;;  %v3268_v56 = vpop.f32.mrf.mxu0  ;;  %v945_v60 = vadd.f32 %v913_v38, %v426_v30 }
 0x11a   : > { %v2583_v57 = vpop.eup %2582  ;;  %v822_v0 = vadd.f32 1.0, %v2581_v51  ;;  %v2099_v1 = vmul.f32 -1.442695, %v472_v49  ;;  %v636_v51 = vpop.f32.mrf.mxu1 }
 0x11b   : > { %v2585_v61 = vpop.eup %2584  ;;  %v914_v44 = vmul.f32 %v2583_v57, %v616_v55  ;;  %v477_v4 = vpop.f32.mrf.mxu0 }
 0x11c   : > { %2602 = vrcp.f32 %v822_v0  ;;  %v478_v59 = vadd.f32 %v477_v4, %v3178_v17  ;;  %v1004_v7 = vpack.c.bf16 %v2585_v61, %v2579_v45  ;;  %v446_v45 = vadd.f32 %v3224_v24, %v3214_v63 }
 0x11d   : > { %v2587_v29 = vpop.eup %2586  ;;  %v946_v9 = vadd.f32 %v914_v44, %v430_v3  ;;  %2604 = vpow2.f32 %v2099_v1  ;;  %v3274_v11 = vpop.f32.mrf.mxu0  ;;  %v450_v3 = vadd.f32 %v3232_v39, %v3214_v63 }
 0x11e   : > { %v2589_v12 = vpop.eup %2588  ;;  %2606 = vtanh.f32 %v945_v60  ;;  %v915_v52 = vmul.f32 %v2587_v29, %v621_v6  ;;  %v2100_v16 = vmul.f32 -1.442695, %v478_v59  ;;  %1239 = vmatmul.mubr.bf16.gmra.mxu1 %v1004_v7  ;;  %2429 = vmatmul.mubr.bf16.vlgmr.msra.gmra.mxu0 %v1004_v7  ;;  %v632_v60 = vadd.f32 %v3266_v25, %v3207_v58  ;;  %v3302_v6 = vpop.f32.mrf.mxu1 }
 0x11f   : > { %2608 = vtanh.f32 %v946_v9  ;;  %v823_v19 = vadd.f32 1.0, %v2589_v12  ;;  %v481_v20 = vpop.f32.mrf.mxu0  ;;  %1248 = vmatprep.mubr.bf16.mxu1 %v2920_v2 }
 0x120   : > { %v947_v26 = vadd.f32 %v915_v52, %v436_v13  ;;  %2610 = vpow2.f32 %v2100_v16  ;;  %v482_v28 = vadd.f32 %v481_v20, %v3178_v17  ;;  %v637_v13 = vadd.f32 %v636_v51, %v3207_v58  ;;  %v639_v20 = vpop.f32.mrf.mxu1 }
 0x121   : > { %v2591_v18 = vpop.eup %2590  ;;  %2612 = vrcp.f32 %v823_v19  ;;  %v3281_v31 = vpop.f32.mrf.mxu0 }
 0x122   : > { %v2593_v62 = vpop.eup %2592  ;;  %v916_v33 = vmul.f32 %v2591_v18, %v624_v27  ;;  %v2101_v34 = vmul.f32 -1.442695, %v482_v28  ;;  %2614 = vtanh.f32 %v947_v26 }
 0x123   : > { %v2595_v36 = vpop.eup %2594  ;;  %v824_v37 = vadd.f32 1.0, %v2593_v62  ;;  %v487_v40 = vpop.f32.mrf.mxu0  ;;  %v456_v62 = vadd.f32 %v3238_v53, %v3214_v63  ;;  %v460_v53 = vadd.f32 %v3244_v5, %v3214_v63 }
 0x124   : > { %v2597_v21 = vpop.eup %2596  ;;  %v948_v43 = vadd.f32 %v916_v33, %v440_v32  ;;  %2616 = vpow2.f32 %v2101_v34  ;;  %v488_v46 = vadd.f32 %v487_v40, %v3178_v17  ;;  %v640_v34 = vadd.f32 %v639_v20, %v3207_v58 }
 0x125   : > { %v2599_v47 = vpop.eup %2598  ;;  %2618 = vrcp.f32 %v824_v37  ;;  %v3290_v38 = vpop.f32.mrf.mxu0  ;;  %v1005_v8 = vpack.c.bf16 %v2597_v21, %v2595_v36 }
 0x126   : > { %v2601_v48 = vpop.eup %2600  ;;  %v917_v30 = vmul.f32 %v2599_v47, %v629_v42  ;;  %2620 = vtanh.f32 %v948_v43  ;;  %v2102_v49 = vmul.f32 -1.442695, %v488_v46  ;;  %v3315_v37 = vpop.f32.mrf.mxu1 }
 0x127   : > { %v825_v55 = vadd.f32 1.0, %v2601_v48  ;;  %1249 = vmatmul.mubr.bf16.gmra.mxu1 %v1005_v8  ;;  %2432 = vmatprep.mubr.bf16.mxu0 %v1005_v8  ;;  %v491_v23 = vpop.f32.mrf.mxu0 }
 0x128   : > { %v949_v57 = vadd.f32 %v917_v30, %v446_v45  ;;  %2622 = vpow2.f32 %v2102_v49  ;;  %v492_v0 = vadd.f32 %v491_v23, %v3178_v17  ;;  %1258 = vmatprep.mubr.bf16.mxu1 %v2920_v2  ;;  %v645_v49 = vadd.f32 %v3285_v35, %v3207_v58  ;;  %v652_v23 = vpop.f32.mrf.mxu1 }
 0x129   : > { %v2603_v1 = vpop.eup %2602  ;;  %2624 = vrcp.f32 %v825_v55  ;;  %v3298_v24 = vpop.f32.mrf.mxu0 }
 0x12a   : > { %v2605_v61 = vpop.eup %2604  ;;  %v918_v44 = vmul.f32 %v2603_v1, %v632_v60  ;;  %v2103_v4 = vmul.f32 -1.442695, %v492_v0  ;;  %2626 = vtanh.f32 %v949_v57 }
 0x12b   : > { %v2607_v59 = vpop.eup %2606  ;;  %v826_v25 = vadd.f32 1.0, %v2605_v61  ;;  %v497_v7 = vpop.f32.mrf.mxu0 }
 0x12c   : > { %v2609_v29 = vpop.eup %2608  ;;  %v950_v9 = vadd.f32 %v918_v44, %v450_v3  ;;  %2628 = vpow2.f32 %v2103_v4  ;;  %v498_v10 = vadd.f32 %v497_v7, %v3178_v17  ;;  %v466_v3 = vadd.f32 %v3250_v22, %v3214_v63 }
 0x12d   : > { %v2611_v12 = vpop.eup %2610  ;;  %2630 = vrcp.f32 %v826_v25  ;;  %v3306_v52 = vpop.f32.mrf.mxu0  ;;  %v1006_v39 = vpack.c.bf16 %v2609_v29, %v2607_v59  ;;  %v648_v4 = vadd.f32 %v3302_v6, %v3207_v58  ;;  %v470_v22 = vadd.f32 %v3259_v41, %v3214_v63 }
 0x12e   : > { %v2613_v16 = vpop.eup %2612  ;;  %2632 = vtanh.f32 %v950_v9  ;;  %v827_v19 = vadd.f32 1.0, %v2611_v12  ;;  %v2104_v26 = vmul.f32 -1.442695, %v498_v10  ;;  %v3330_v59 = vpop.f32.mrf.mxu1 }
 0x12f   : > { %v919_v27 = vmul.f32 %v2613_v16, %v637_v13  ;;  %1259 = vmatmul.mubr.bf16.gmra.mxu1 %v1006_v39  ;;  %2433 = vmatmul.mubr.bf16.gmra.mxu0 %v1006_v39  ;;  %v501_v28 = vpop.f32.mrf.mxu0  ;;  %v2615_v18 = vpop.eup %2614  ;;  %v653_v16 = vadd.f32 %v652_v23, %v3207_v58  ;;  %v661_v23 = vadd.f32 %v3315_v37, %v3207_v58 }
 0x130   : > { %2634 = vrcp.f32 %v827_v19  ;;  %v502_v32 = vadd.f32 %v501_v28, %v3178_v17  ;;  %1268 = vmatprep.mubr.bf16.mxu1 %v2920_v2 }
 0x131   : > { %v2617_v33 = vpop.eup %2616  ;;  %2636 = vpow2.f32 %v2104_v26  ;;  %v3313_v36 = vpop.f32.mrf.mxu0  ;;  %v951_v42 = vadd.f32 %v919_v27, %v456_v62  ;;  %v476_v62 = vadd.f32 %v3268_v56, %v3214_v63 }
 0x132   : > { %v2619_v40 = vpop.eup %2618  ;;  %v828_v21 = vadd.f32 1.0, %v2617_v33  ;;  %v2105_v43 = vmul.f32 -1.442695, %v502_v32  ;;  %v655_v27 = vpop.f32.mrf.mxu1 }
 0x133   : > { %v2621_v46 = vpop.eup %2620  ;;  %v920_v47 = vmul.f32 %v2619_v40, %v640_v34  ;;  %v507_v8 = vpop.f32.mrf.mxu0 }
 0x134   : > { %2638 = vrcp.f32 %v828_v21  ;;  %v508_v48 = vadd.f32 %v507_v8, %v3178_v17  ;;  %v1007_v45 = vpack.c.bf16 %v2621_v46, %v2615_v18  ;;  %v656_v21 = vadd.f32 %v655_v27, %v3207_v58 }
 0x135   : > { %v2623_v30 = vpop.eup %2622  ;;  %v952_v51 = vadd.f32 %v920_v47, %v460_v53  ;;  %2640 = vpow2.f32 %v2105_v43  ;;  %v3322_v55 = vpop.f32.mrf.mxu0  ;;  %v480_v53 = vadd.f32 %v3274_v11, %v3214_v63 }
 0x136   : > { %v2625_v57 = vpop.eup %2624  ;;  %v829_v60 = vadd.f32 1.0, %v2623_v30  ;;  %2642 = vtanh.f32 %v951_v42  ;;  %v2106_v0 = vmul.f32 -1.442695, %v508_v48  ;;  %2436 = vmatprep.mubr.bf16.mxu0 %v1007_v45  ;;  %v3349_v48 = vpop.f32.mrf.mxu1 }
 0x137   : > { %v921_v5 = vmul.f32 %v2625_v57, %v645_v49  ;;  %2644 = vtanh.f32 %v952_v51  ;;  %1269 = vmatmul.mubr.bf16.gmra.mxu1 %v1007_v45  ;;  %v511_v1 = vpop.f32.mrf.mxu0  ;;  %v2627_v61 = vpop.eup %2626 }
 0x138   : > { %2646 = vrcp.f32 %v829_v60  ;;  %v512_v35 = vadd.f32 %v511_v1, %v3178_v17  ;;  %1278 = vmatprep.mubr.bf16.mxu1 %v2920_v2 }
 0x139   : > { %v2629_v44 = vpop.eup %2628  ;;  %2648 = vpow2.f32 %v2106_v0  ;;  %v3332_v25 = vpop.f32.mrf.mxu0  ;;  %v953_v29 = vadd.f32 %v921_v5, %v466_v3 }
 0x13a   : > { %v2631_v7 = vpop.eup %2630  ;;  %v830_v9 = vadd.f32 1.0, %v2629_v44  ;;  %v2107_v10 = vmul.f32 -1.442695, %v512_v35  ;;  %v668_v44 = vpop.f32.mrf.mxu1 }
 0x13b   : > { %v2633_v12 = vpop.eup %2632  ;;  %v922_v13 = vmul.f32 %v2631_v7, %v648_v4  ;;  %v517_v39 = vpop.f32.mrf.mxu0 }
 0x13c   : > { %2650 = vrcp.f32 %v830_v9  ;;  %v518_v6 = vadd.f32 %v517_v39, %v3178_v17  ;;  %v1008_v19 = vpack.c.bf16 %v2633_v12, %v2627_v61  ;;  %v486_v61 = vadd.f32 %v3281_v31, %v3214_v63 }
 0x13d   : > { %v2635_v20 = vpop.eup %2634  ;;  %v954_v26 = vadd.f32 %v922_v13, %v470_v22  ;;  %2652 = vpow2.f32 %v2107_v10  ;;  %v3338_v28 = vpop.f32.mrf.mxu0  ;;  %v490_v22 = vadd.f32 %v3290_v38, %v3214_v63 }
 0x13e   : > { %v2637_v18 = vpop.eup %2636  ;;  %2654 = vtanh.f32 %v953_v29  ;;  %v923_v41 = vmul.f32 %v2635_v20, %v653_v16  ;;  %v2108_v32 = vmul.f32 -1.442695, %v518_v6  ;;  %2437 = vmatmul.mubr.bf16.gmra.mxu0 %v1008_v19  ;;  %v664_v29 = vadd.f32 %v3330_v59, %v3207_v58  ;;  %v3366_v16 = vpop.f32.mrf.mxu1 }
 0x13f   : > { %2656 = vtanh.f32 %v954_v26  ;;  %v831_v33 = vadd.f32 1.0, %v2637_v18  ;;  %1279 = vmatmul.mubr.bf16.gmra.mxu1 %v1008_v19  ;;  %v521_v34 = vpop.f32.mrf.mxu0 }
 0x140   : > { %v955_v40 = vadd.f32 %v923_v41, %v476_v62  ;;  %2658 = vpow2.f32 %v2108_v32  ;;  %v522_v42 = vadd.f32 %v521_v34, %v3178_v17  ;;  %1288 = vmatprep.mubr.bf16.mxu1 %v2920_v2  ;;  %v669_v62 = vadd.f32 %v668_v44, %v3207_v58  ;;  %v671_v34 = vpop.f32.mrf.mxu1 }
 0x141   : > { %v2639_v43 = vpop.eup %2638  ;;  %2660 = vrcp.f32 %v831_v33  ;;  %v3345_v46 = vpop.f32.mrf.mxu0 }
 0x142   : > { %v2641_v56 = vpop.eup %2640  ;;  %v924_v47 = vmul.f32 %v2639_v43, %v656_v21  ;;  %v2109_v8 = vmul.f32 -1.442695, %v522_v42  ;;  %2662 = vtanh.f32 %v955_v40 }
 0x143   : > { %v2643_v45 = vpop.eup %2642  ;;  %v832_v30 = vadd.f32 1.0, %v2641_v56  ;;  %v527_v49 = vpop.f32.mrf.mxu0  ;;  %v496_v56 = vadd.f32 %v3298_v24, %v3214_v63  ;;  %v500_v24 = vadd.f32 %v3306_v52, %v3214_v63 }
 0x144   : > { %v2645_v51 = vpop.eup %2644  ;;  %v956_v57 = vadd.f32 %v924_v47, %v480_v53  ;;  %2664 = vpow2.f32 %v2109_v8  ;;  %v528_v60 = vadd.f32 %v527_v49, %v3178_v17  ;;  %v672_v8 = vadd.f32 %v671_v34, %v3207_v58 }
 0x145   : > { %v2647_v0 = vpop.eup %2646  ;;  %2666 = vrcp.f32 %v832_v30  ;;  %v3354_v5 = vpop.f32.mrf.mxu0  ;;  %v1009_v11 = vpack.c.bf16 %v2645_v51, %v2643_v45  ;;  %v516_v34 = vadd.f32 %v3332_v25, %v3214_v63 }
 0x146   : > { %v2649_v1 = vpop.eup %2648  ;;  %v925_v3 = vmul.f32 %v2647_v0, %v661_v23  ;;  %2668 = vtanh.f32 %v956_v57  ;;  %v2110_v35 = vmul.f32 -1.442695, %v528_v60  ;;  %v3379_v30 = vpop.f32.mrf.mxu1 }
 0x147   : > { %v833_v4 = vadd.f32 1.0, %v2649_v1  ;;  %1289 = vmatmul.mubr.bf16.gmra.mxu1 %v1009_v11  ;;  %2440 = vmatprep.mubr.bf16.mxu0 %v1009_v11  ;;  %v531_v37 = vpop.f32.mrf.mxu0 }
 0x148   : > { %v957_v7 = vadd.f32 %v925_v3, %v486_v61  ;;  %2670 = vpow2.f32 %v2110_v35  ;;  %v532_v9 = vadd.f32 %v531_v37, %v3178_v17  ;;  %1298 = vmatprep.mubr.bf16.mxu1 %v2920_v2  ;;  %v677_v35 = vadd.f32 %v3349_v48, %v3207_v58  ;;  %v684_v37 = vpop.f32.mrf.mxu1 }
 0x149   : > { %v2651_v10 = vpop.eup %2650  ;;  %2672 = vrcp.f32 %v833_v4  ;;  %v3362_v31 = vpop.f32.mrf.mxu0 }
 0x14a   : > { %v2653_v12 = vpop.eup %2652  ;;  %v926_v13 = vmul.f32 %v2651_v10, %v664_v29  ;;  %v2111_v39 = vmul.f32 -1.442695, %v532_v9  ;;  %2674 = vtanh.f32 %v957_v7 }
 0x14b   : > { %v2655_v6 = vpop.eup %2654  ;;  %v834_v59 = vadd.f32 1.0, %v2653_v12  ;;  %v537_v19 = vpop.f32.mrf.mxu0 }
 0x14c   : > { %v2657_v20 = vpop.eup %2656  ;;  %v958_v26 = vadd.f32 %v926_v13, %v490_v22  ;;  %2676 = vpow2.f32 %v2111_v39  ;;  %v538_v27 = vadd.f32 %v537_v19, %v3178_v17  ;;  %v506_v22 = vadd.f32 %v3313_v36, %v3214_v63 }
 0x14d   : > { %v2659_v18 = vpop.eup %2658  ;;  %2678 = vrcp.f32 %v834_v59  ;;  %v3370_v41 = vpop.f32.mrf.mxu0  ;;  %v1010_v38 = vpack.c.bf16 %v2657_v20, %v2655_v6  ;;  %v680_v39 = vadd.f32 %v3366_v16, %v3207_v58 }
 0x14e   : > { %v2661_v32 = vpop.eup %2660  ;;  %2680 = vtanh.f32 %v958_v26  ;;  %v835_v33 = vadd.f32 1.0, %v2659_v18  ;;  %v2112_v40 = vmul.f32 -1.442695, %v538_v27  ;;  %v2407_v6 = vpop.f32.mrf.mxu1  ;;  %v510_v18 = vadd.f32 %v3322_v55, %v3214_v63 }
 0x14f   : > { %v927_v21 = vmul.f32 %v2661_v32, %v669_v62  ;;  %1299 = vmatmul.mubr.bf16.gmra.mxu1 %v1010_v38  ;;  %2441 = vmatmul.mubr.bf16.gmra.mxu0 %v1010_v38  ;;  %v541_v42 = vpop.f32.mrf.mxu0  ;;  %v2663_v43 = vpop.eup %2662 }
 0x150   : > { %2682 = vrcp.f32 %v835_v33  ;;  %v542_v53 = vadd.f32 %v541_v42, %v3178_v17  ;;  %1308 = vmatprep.mubr.bf16.mxu1 %v2920_v2  ;;  %v687_v33 = vpop.f32.mrf.mxu1 }
 0x151   : > { %v2665_v47 = vpop.eup %2664  ;;  %2684 = vpow2.f32 %v2112_v40  ;;  %v3377_v45 = vpop.f32.mrf.mxu0  ;;  %v959_v23 = vadd.f32 %v927_v21, %v496_v56  ;;  %v688_v42 = vadd.f32 %v687_v33, %v3207_v58 }
 0x152   : > { %v2667_v49 = vpop.eup %2666  ;;  %v836_v51 = vadd.f32 1.0, %v2665_v47  ;;  %v2113_v57 = vmul.f32 -1.442695, %v542_v53  ;;  %v520_v53 = vadd.f32 %v3338_v28, %v3214_v63 }
 0x153   : > { %v2669_v60 = vpop.eup %2668  ;;  %v928_v0 = vmul.f32 %v2667_v49, %v672_v8  ;;  %v547_v11 = vpop.f32.mrf.mxu0 }
 0x154   : > { %2686 = vrcp.f32 %v836_v51  ;;  %v548_v1 = vadd.f32 %v547_v11, %v3178_v17  ;;  %v1011_v61 = vpack.c.bf16 %v2669_v60, %v2663_v43  ;;  %v2410_v8 = vpop.f32.mrf.mxu1  ;;  %v526_v11 = vadd.f32 %v3345_v46, %v3214_v63 }
 0x155   : > { %v2671_v3 = vpop.eup %2670  ;;  %v960_v44 = vadd.f32 %v928_v0, %v500_v24  ;;  %2688 = vpow2.f32 %v2113_v57  ;;  %v3386_v4 = vpop.f32.mrf.mxu0 }
 0x156   : > { %v2673_v7 = vpop.eup %2672  ;;  %v837_v29 = vadd.f32 1.0, %v2671_v3  ;;  %2690 = vtanh.f32 %v959_v23  ;;  %v2114_v9 = vmul.f32 -1.442695, %v548_v1  ;;  %2444 = vmatprep.mubr.bf16.mxu0 %v1011_v61  ;;  %v693_v23 = vadd.f32 %v3379_v30, %v3207_v58  ;;  %v700_v28 = vpop.f32.mrf.mxu1 }
 0x157   : > { %v929_v52 = vmul.f32 %v2673_v7, %v677_v35  ;;  %2692 = vtanh.f32 %v960_v44  ;;  %1309 = vmatmul.mubr.bf16.gmra.mxu1 %v1011_v61  ;;  %v551_v10 = vpop.f32.mrf.mxu0  ;;  %v2675_v12 = vpop.eup %2674  ;;  %v696_v35 = vadd.f32 %v2407_v6, %v3207_v58 }
 0x158   : > { %2694 = vrcp.f32 %v837_v29  ;;  %v552_v48 = vadd.f32 %v551_v10, %v3178_v17  ;;  %1318 = vmatprep.mubr.bf16.mxu1 %v2920_v2  ;;  %v685_v17 = vadd.f32 %v684_v37, %v3207_v58  ;;  %v530_v37 = vadd.f32 %v3354_v5, %v3214_v63  ;;  %v2411_v29 = vpop.f32.mrf.mxu1 }
 0x159   : > { %v2677_v13 = vpop.eup %2676  ;;  %2696 = vpow2.f32 %v2114_v9  ;;  %v961_v19 = vadd.f32 %v929_v52, %v506_v22  ;;  %v536_v5 = vadd.f32 %v3362_v31, %v3214_v63 }
 0x15a   : > { %v2679_v59 = vpop.eup %2678  ;;  %v838_v20 = vadd.f32 1.0, %v2677_v13  ;;  %v2115_v26 = vmul.f32 -1.442695, %v552_v48  ;;  %v703_v13 = vpop.f32.mrf.mxu1 }
 0x15b   : > { %v2681_v27 = vpop.eup %2680  ;;  %v930_v36 = vmul.f32 %v2679_v59, %v680_v39  ;;  %v704_v59 = vadd.f32 %v703_v13, %v3207_v58 }
 0x15c   : > { %2698 = vrcp.f32 %v838_v20  ;;  %v1012_v62 = vpack.c.bf16 %v2681_v27, %v2675_v12  ;;  %v701_v12 = vadd.f32 %v700_v28, %v3207_v58  ;;  %v540_v27 = vadd.f32 %v3370_v41, %v3214_v63 }
 0x15d   : > { %v2683_v38 = vpop.eup %2682  ;;  %v962_v32 = vadd.f32 %v930_v36, %v510_v18  ;;  %2700 = vpow2.f32 %v2115_v26 }
 0x15e   : > { %v2685_v16 = vpop.eup %2684  ;;  %2702 = vtanh.f32 %v961_v19  ;;  %v931_v40 = vmul.f32 %v2683_v38, %v685_v17  ;;  %2445 = vmatmul.mubr.bf16.gmra.mxu0 %v1012_v62  ;;  %v709_v17 = vadd.f32 %v2410_v8, %v3207_v58 }
 0x15f   : > { %2704 = vtanh.f32 %v962_v32  ;;  %v839_v21 = vadd.f32 1.0, %v2685_v16  ;;  %1319 = vmatmul.mubr.bf16.gmra.mxu1 %v1012_v62  ;;  %v546_v32 = vadd.f32 %v3377_v45, %v3214_v63  ;;  %v712_v16 = vadd.f32 %v2411_v29, %v3207_v58 }
 0x160   : > { %v963_v55 = vadd.f32 %v931_v40, %v516_v34  ;;  %1328 = vmatprep.mubr.bf16.mxu1 %v2920_v2 }
 0x161   : > { %v2687_v43 = vpop.eup %2686  ;;  %2706 = vrcp.f32 %v839_v21  ;;  %v550_v21 = vadd.f32 %v3386_v4, %v3214_v63  ;;  %v3430_v63 = vld [vmem:[%s3730_s4] sm:$0x7] }
 0x162   : > { %v2689_v56 = vpop.eup %2688  ;;  %v932_v47 = vmul.f32 %v2687_v43, %v688_v42  ;;  %2708 = vtanh.f32 %v963_v55  ;;  %v3435_v4 = vrot.slane %v3430_v63, %v287_v15 }
 0x163   : > { %v2691_v25 = vpop.eup %2690  ;;  %v840_v49 = vadd.f32 1.0, %v2689_v56 }
 0x164   : > { %v2693_v51 = vpop.eup %2692  ;;  %v964_v57 = vadd.f32 %v932_v47, %v520_v53 }
 0x165   : > { %v2695_v60 = vpop.eup %2694  ;;  %2710 = vrcp.f32 %v840_v49  ;;  %v1013_v24 = vpack.c.bf16 %v2693_v51, %v2691_v25 }
 0x166   : > { %v2697_v0 = vpop.eup %2696  ;;  %v933_v1 = vmul.f32 %v2695_v60, %v693_v23  ;;  %2712 = vtanh.f32 %v964_v57 }
 0x167   : > { %v841_v61 = vadd.f32 1.0, %v2697_v0  ;;  %1329 = vmatmul.mubr.bf16.gmra.mxu1 %v1013_v24  ;;  %2448 = vmatprep.mubr.bf16.mxu0 %v1013_v24 }
 0x168   : > { %v965_v3 = vadd.f32 %v933_v1, %v526_v11  ;;  %1338 = vmatprep.mubr.bf16.mxu1 %v2920_v2 }
 0x169   : > { %v2699_v30 = vpop.eup %2698  ;;  %2714 = vrcp.f32 %v841_v61 }
 0x16a   : > { %v2701_v44 = vpop.eup %2700  ;;  %v934_v7 = vmul.f32 %v2699_v30, %v696_v35  ;;  %2716 = vtanh.f32 %v965_v3 }
 0x16b   : > { %v2703_v46 = vpop.eup %2702  ;;  %v842_v9 = vadd.f32 1.0, %v2701_v44 }
 0x16c   : > { %v2705_v52 = vpop.eup %2704  ;;  %v966_v10 = vadd.f32 %v934_v7, %v530_v37 }
 0x16d   : > { %2718 = vrcp.f32 %v842_v9  ;;  %v1014_v22 = vpack.c.bf16 %v2705_v52, %v2703_v46 }
 0x16e   : > { %v2707_v48 = vpop.eup %2706  ;;  %2720 = vtanh.f32 %v966_v10 }
 0x16f   : > { %v935_v39 = vmul.f32 %v2707_v48, %v701_v12  ;;  %1339 = vmatmul.mubr.bf16.gmra.mxu1 %v1014_v22  ;;  %2449 = vmatmul.mubr.bf16.gmra.mxu0 %v1014_v22  ;;  %v2709_v6 = vpop.eup %2708 }
 0x170   : > { %1348 = vmatprep.mubr.bf16.mxu1 %v2920_v2 }
 0x171   : > { %v967_v20 = vadd.f32 %v935_v39, %v536_v5 }
 0x172   : > { %v2711_v19 = vpop.eup %2710 }
 0x173   : > { %v2713_v26 = vpop.eup %2712  ;;  %v936_v18 = vmul.f32 %v2711_v19, %v704_v59  ;;  %2722 = vtanh.f32 %v967_v20 }
 0x174   : > { %v1015_v36 = vpack.c.bf16 %v2713_v26, %v2709_v6 }
 0x175   : > { %v968_v62 = vadd.f32 %v936_v18, %v540_v27 }
 0x176   : > { %v2715_v38 = vpop.eup %2714  ;;  %2452 = vmatprep.mubr.bf16.mxu0 %v1015_v36 }
 0x177   : > { %v937_v31 = vmul.f32 %v2715_v38, %v709_v17  ;;  %2724 = vtanh.f32 %v968_v62  ;;  %1349 = vmatmul.mubr.bf16.gmra.mxu1 %v1015_v36  ;;  %v2717_v33 = vpop.eup %2716 }
 0x178   : > { %1358 = vmatprep.mubr.bf16.mxu1 %v2920_v2 }
 0x179   : > { %v969_v34 = vadd.f32 %v937_v31, %v546_v32 }
 0x17a   : > { %v2719_v41 = vpop.eup %2718 }
 0x17b   : > { %v2721_v40 = vpop.eup %2720  ;;  %v938_v55 = vmul.f32 %v2719_v41, %v712_v16  ;;  %2726 = vtanh.f32 %v969_v34 }
 0x17c   : > { %v1016_v42 = vpack.c.bf16 %v2721_v40, %v2717_v33  ;;  %v3466_v33 = vrot.slane %v3430_v63, %v291_v50 }
 0x17d   : > { %v970_v43 = vadd.f32 %v938_v55, %v550_v21  ;;  %v3472_v55 = vrot.slane %v3430_v63, %v283_v54 }
 0x17e   : > { %2453 = vmatmul.mubr.bf16.gmra.mxu0 %v1016_v42 }
 0x17f   : > { %2728 = vtanh.f32 %v970_v43  ;;  %1359 = vmatmul.mubr.bf16.gmra.mxu1 %v1016_v42 }
 0x180   : > { %1368 = vmatprep.mubr.bf16.mxu1 %v2920_v2  ;;  %v2723_v45 = vpop.eup %2722 }
 0x184   : > { %v2725_v56 = vpop.eup %2724 }
 0x185   : > { %v1017_v53 = vpack.c.bf16 %v2725_v56, %v2723_v45 }
 0x187   : > { %1369 = vmatmul.mubr.bf16.gmra.mxu1 %v1017_v53  ;;  %2456 = vmatprep.mubr.bf16.mxu0 %v1017_v53 }
 0x188   : > { %1378 = vmatprep.mubr.bf16.mxu1 %v2920_v2  ;;  %v2727_v58 = vpop.eup %2726 }
 0x18c   : > { %v2729_v47 = vpop.eup %2728 }
 0x18d   : > { %v1018_v8 = vpack.c.bf16 %v2729_v47, %v2727_v58 }
 0x18f   : > { %1379 = vmatmul.mubr.bf16.gmra.mxu1 %v1018_v8  ;;  %2457 = vmatmul.mubr.bf16.gmra.mxu0 %v1018_v8 }
 0x1d6   : > { %v3437_v25 = vpop.f32.mrf.mxu1 }
 0x1d7   : > { %v1231_v54 = vadd.f32 %v3437_v25, %v3472_v55 }
 0x1d8   : > { %v1232_v49 = vpop.f32.mrf.mxu1 }
 0x1d9   : > { %v1233_v2 = vadd.f32 %v1232_v49, %v3435_v4 }
 0x1da   : > { %v3440_v51 = vpop.f32.mrf.mxu1 }
 0x1db   : > { %v2140_v23 = vmul.f32 -1.442695, %v1233_v2  ;;  %v1235_v63 = vadd.f32 %v3440_v51, %v3472_v55 }
 0x1dc   : > { %v1236_v57 = vpop.f32.mrf.mxu1 }
 0x1dd   : > { %2730 = vpow2.f32 %v2140_v23  ;;  %v1237_v60 = vadd.f32 %v1236_v57, %v3435_v4 }
 0x1de   : > { %v3443_v24 = vpop.f32.mrf.mxu1  ;;  %v2430_v12 = vpop.f32.mrf.mxu0 }
 0x1df   : > { %v2141_v0 = vmul.f32 -1.442695, %v1237_v60  ;;  %v1432_v51 = vadd.f32 %v2430_v12, %v3466_v33 }
 0x1e0   : > { %v1242_v11 = vpop.f32.mrf.mxu1  ;;  %v1423_v59 = vpop.f32.mrf.mxu0 }
 0x1e1   : > { %2732 = vpow2.f32 %v2141_v0  ;;  %v1243_v15 = vadd.f32 %v1242_v11, %v3435_v4  ;;  %v1424_v42 = vadd.f32 %v1423_v59, %v3466_v33 }
 0x1e2   : > { %v3446_v1 = vpop.f32.mrf.mxu1  ;;  %v2431_v17 = vpop.f32.mrf.mxu0 }
 0x1e3   : > { %v2142_v28 = vmul.f32 -1.442695, %v1243_v15 }
 0x1e4   : > { %v1246_v61 = vpop.f32.mrf.mxu1  ;;  %v1426_v34 = vpop.f32.mrf.mxu0 }
 0x1e5   : > { %2734 = vpow2.f32 %v2142_v28  ;;  %v1247_v3 = vadd.f32 %v1246_v61, %v3435_v4  ;;  %v1427_v53 = vadd.f32 %v1426_v34, %v3466_v33 }
 0x1e7   : > { %v2143_v35 = vmul.f32 -1.442695, %v1247_v3  ;;  %v3449_v30 = vpop.f32.mrf.mxu1 }
 0x1e9   : > { %2736 = vpow2.f32 %v2143_v35  ;;  %v1252_v44 = vpop.f32.mrf.mxu1 }
 0x1ea   : > { %v2731_v37 = vpop.eup %2730  ;;  %v1253_v7 = vadd.f32 %v1252_v44, %v3435_v4 }
 0x1eb   : > { %v1646_v29 = vadd.f32 1.0, %v2731_v37  ;;  %v3452_v46 = vpop.f32.mrf.mxu1 }
 0x1ec   : > { %v2144_v9 = vmul.f32 -1.442695, %v1253_v7 }
 0x1ed   : > { %2738 = vrcp.f32 %v1646_v29  ;;  %v1256_v52 = vpop.f32.mrf.mxu1 }
 0x1ee   : > { %v2733_v10 = vpop.eup %2732  ;;  %2740 = vpow2.f32 %v2144_v9  ;;  %v1257_v22 = vadd.f32 %v1256_v52, %v3435_v4  ;;  %v1435_v9 = vadd.f32 %v2431_v17, %v3466_v33 }
 0x1ef   : > { %v1647_v48 = vadd.f32 1.0, %v2733_v10  ;;  %v3455_v13 = vpop.f32.mrf.mxu1  ;;  %v3486_v2 = vpop.f32.mrf.mxu0 }
 0x1f0   : > { %v2145_v39 = vmul.f32 -1.442695, %v1257_v22 }
 0x1f1   : > { %2742 = vrcp.f32 %v1647_v48  ;;  %v1262_v5 = vpop.f32.mrf.mxu1  ;;  %v1439_v35 = vpop.f32.mrf.mxu0  ;;  %v1241_v48 = vadd.f32 %v3443_v24, %v3472_v55 }
 0x1f2   : > { %v2735_v6 = vpop.eup %2734  ;;  %2744 = vpow2.f32 %v2145_v39  ;;  %v1263_v19 = vadd.f32 %v1262_v5, %v3435_v4  ;;  %v1245_v39 = vadd.f32 %v3446_v1, %v3472_v55 }
 0x1f3   : > { %v1648_v20 = vadd.f32 1.0, %v2735_v6  ;;  %v3458_v26 = vpop.f32.mrf.mxu1  ;;  %v2435_v6 = vpop.f32.mrf.mxu0 }
 0x1f4   : > { %v2146_v27 = vmul.f32 -1.442695, %v1263_v19 }
 0x1f5   : > { %2746 = vrcp.f32 %v1648_v20  ;;  %v1266_v18 = vpop.f32.mrf.mxu1  ;;  %v1442_v24 = vpop.f32.mrf.mxu0 }
 0x1f6   : > { %v2737_v36 = vpop.eup %2736  ;;  %2748 = vpow2.f32 %v2146_v27  ;;  %v1267_v62 = vadd.f32 %v1266_v18, %v3435_v4 }
 0x1f7   : > { %v1649_v38 = vadd.f32 1.0, %v2737_v36  ;;  %v3461_v31 = vpop.f32.mrf.mxu1 }
 0x1f8   : > { %v2147_v32 = vmul.f32 -1.442695, %v1267_v62 }
 0x1f9   : > { %2750 = vrcp.f32 %v1649_v38  ;;  %v1272_v16 = vpop.f32.mrf.mxu1 }
 0x1fa   : > { %v2739_v41 = vpop.eup %2738  ;;  %2752 = vpow2.f32 %v2147_v32  ;;  %v1273_v40 = vadd.f32 %v1272_v16, %v3435_v4  ;;  %v1440_v16 = vadd.f32 %v1439_v35, %v3466_v33 }
 0x1fb   : > { %v2741_v21 = vpop.eup %2740  ;;  %v3475_v43 = vpop.f32.mrf.mxu1  ;;  %v1742_v56 = vmul.f32 %v2739_v41, %v1424_v42  ;;  %v1443_v42 = vadd.f32 %v1442_v24, %v3466_v33 }
 0x1fc   : > { %v1650_v50 = vadd.f32 1.0, %v2741_v21  ;;  %v2148_v45 = vmul.f32 -1.442695, %v1273_v40 }
 0x1fd   : > { %v1276_v58 = vpop.f32.mrf.mxu1  ;;  %v1774_v0 = vadd.f32 %v1742_v56, %v1231_v54 }
 0x1fe   : > { %v2743_v47 = vpop.eup %2742  ;;  %2754 = vrcp.f32 %v1650_v50  ;;  %v1277_v8 = vadd.f32 %v1276_v58, %v3435_v4  ;;  %v1251_v58 = vadd.f32 %v3449_v30, %v3472_v55 }
 0x1ff   : > { %v2745_v14 = vpop.eup %2744  ;;  %v1743_v49 = vmul.f32 %v2743_v47, %v1427_v53  ;;  %2756 = vpow2.f32 %v2148_v45  ;;  %v3488_v23 = vpop.f32.mrf.mxu1  ;;  %v1255_v47 = vadd.f32 %v3452_v46, %v3472_v55  ;;  %v1448_v46 = vadd.f32 %v3486_v2, %v3466_v33 }
 0x200   : > { %v1651_v57 = vadd.f32 1.0, %v2745_v14  ;;  %v2149_v60 = vmul.f32 -1.442695, %v1277_v8  ;;  %v3518_v14 = vpop.f32.mrf.mxu0  ;;  %v1261_v2 = vadd.f32 %v3455_v13, %v3472_v55 }
 0x201   : > { %v1775_v11 = vadd.f32 %v1743_v49, %v1235_v63  ;;  %v1282_v15 = vpop.f32.mrf.mxu1 }
 0x202   : > { %v2747_v28 = vpop.eup %2746  ;;  %2758 = vrcp.f32 %v1651_v57  ;;  %v1283_v25 = vadd.f32 %v1282_v15, %v3435_v4 }
 0x203   : > { %v2749_v61 = vpop.eup %2748  ;;  %v2245_v3 = vpack.c.bf16 %v1775_v11, %v1774_v0  ;;  %2760 = vpow2.f32 %v2149_v60  ;;  %v3492_v44 = vpop.f32.mrf.mxu1  ;;  %v1744_v29 = vmul.f32 %v2747_v28, %v1432_v51 }
 0x204   : > { %v1652_v37 = vadd.f32 1.0, %v2749_v61  ;;  %v2150_v7 = vmul.f32 -1.442695, %v1283_v25  ;;  %v1455_v25 = vpop.f32.mrf.mxu0 }
 0x205   : > { %2246 = vst [vmem:[%s3495_s6] sm:$0xff] %v2245_v3   ;;  %v1286_v52 = vpop.f32.mrf.mxu1  ;;  %v1776_v27 = vadd.f32 %v1744_v29, %v1241_v48 }
 0x206   : > { %v2751_v10 = vpop.eup %2750  ;;  %2762 = vrcp.f32 %v1652_v37  ;;  %v1287_v22 = vadd.f32 %v1286_v52, %v3435_v4  ;;  %v1451_v37 = vadd.f32 %v2435_v6, %v3466_v33 }
 0x207   : > { %v2753_v12 = vpop.eup %2752  ;;  %v1745_v5 = vmul.f32 %v2751_v10, %v1435_v9  ;;  %2764 = vpow2.f32 %v2150_v7  ;;  %v3503_v59 = vpop.f32.mrf.mxu1  ;;  %v1265_v10 = vadd.f32 %v3458_v26, %v3472_v55 }
 0x208   : > { %v1653_v19 = vadd.f32 1.0, %v2753_v12  ;;  %v2151_v20 = vmul.f32 -1.442695, %v1287_v22  ;;  %v2439_v12 = vpop.f32.mrf.mxu0 }
 0x209   : > { %v1777_v18 = vadd.f32 %v1745_v5, %v1245_v39  ;;  %v1292_v36 = vpop.f32.mrf.mxu1 }
 0x20a   : > { %2766 = vrcp.f32 %v1653_v19  ;;  %v1293_v17 = vadd.f32 %v1292_v36, %v3435_v4 }
 0x20b   : > { %v2755_v62 = vpop.eup %2754  ;;  %v2250_v38 = vpack.c.bf16 %v1777_v18, %v1776_v27  ;;  %2768 = vpow2.f32 %v2151_v20  ;;  %v3506_v32 = vpop.f32.mrf.mxu1 }
 0x20c   : > { %v2757_v1 = vpop.eup %2756  ;;  %v2152_v41 = vmul.f32 -1.442695, %v1293_v17  ;;  %v1746_v21 = vmul.f32 %v2755_v62, %v1440_v16  ;;  %v1458_v17 = vpop.f32.mrf.mxu0 }
 0x20d   : > { %2322 = vst [vmem:[%s3495_s6 + $0x8] sm:$0xff] %v2250_v38   ;;  %v1654_v34 = vadd.f32 1.0, %v2757_v1  ;;  %v1296_v40 = vpop.f32.mrf.mxu1  ;;  %v1456_v38 = vadd.f32 %v1455_v25, %v3466_v33 }
 0x20e   : > { %2770 = vpow2.f32 %v2152_v41  ;;  %v1297_v50 = vadd.f32 %v1296_v40, %v3435_v4  ;;  %v1778_v57 = vadd.f32 %v1746_v21, %v1251_v58  ;;  %v1275_v58 = vadd.f32 %v3475_v43, %v3472_v55 }
 0x20f   : > { %v2759_v45 = vpop.eup %2758  ;;  %2772 = vrcp.f32 %v1654_v34  ;;  %v3512_v56 = vpop.f32.mrf.mxu1  ;;  %v1459_v34 = vadd.f32 %v1458_v17, %v3466_v33 }
 0x210   : > { %v2761_v53 = vpop.eup %2760  ;;  %v1747_v8 = vmul.f32 %v2759_v45, %v1443_v42  ;;  %v2153_v54 = vmul.f32 -1.442695, %v1297_v50  ;;  %v3541_v40 = vpop.f32.mrf.mxu0 }
 0x211   : > { %v1655_v63 = vadd.f32 1.0, %v2761_v53  ;;  %v1302_v49 = vpop.f32.mrf.mxu1  ;;  %v1271_v53 = vadd.f32 %v3461_v31, %v3472_v55  ;;  %v1464_v31 = vadd.f32 %v3518_v14, %v3466_v33  ;;  %v1281_v14 = vadd.f32 %v3488_v23, %v3472_v55 }
 0x212   : > { %v1779_v60 = vadd.f32 %v1747_v8, %v1255_v47  ;;  %2774 = vpow2.f32 %v2153_v54  ;;  %v1303_v0 = vadd.f32 %v1302_v49, %v3435_v4 }
 0x213   : > { %v2763_v11 = vpop.eup %2762  ;;  %2776 = vrcp.f32 %v1655_v63  ;;  %v3521_v15 = vpop.f32.mrf.mxu1 }
 0x214   : > { %v2765_v30 = vpop.eup %2764  ;;  %v2255_v28 = vpack.c.bf16 %v1779_v60, %v1778_v57  ;;  %v2154_v61 = vmul.f32 -1.442695, %v1303_v0  ;;  %v1748_v35 = vmul.f32 %v2763_v11, %v1448_v46  ;;  %v1471_v60 = vpop.f32.mrf.mxu0 }
 0x215   : > { %v1656_v51 = vadd.f32 1.0, %v2765_v30  ;;  %v1306_v3 = vpop.f32.mrf.mxu1 }
 0x216   : > { %2323 = vst [vmem:[%s3495_s6 + $0x10] sm:$0xff] %v2255_v28   ;;  %2778 = vpow2.f32 %v2154_v61  ;;  %v1307_v7 = vadd.f32 %v1306_v3, %v3435_v4  ;;  %v1780_v6 = vadd.f32 %v1748_v35, %v1261_v2  ;;  %v1467_v3 = vadd.f32 %v2439_v12, %v3466_v33  ;;  %v2443_v35 = vpop.f32.mrf.mxu0 }
 0x217   : > { %v2767_v29 = vpop.eup %2766  ;;  %2780 = vrcp.f32 %v1656_v51  ;;  %v3528_v9 = vpop.f32.mrf.mxu1  ;;  %v1285_v2 = vadd.f32 %v3492_v44, %v3472_v55 }
 0x218   : > { %v2769_v52 = vpop.eup %2768  ;;  %v1749_v22 = vmul.f32 %v2767_v29, %v1451_v37  ;;  %v2155_v48 = vmul.f32 -1.442695, %v1307_v7 }
 0x219   : > { %v1657_v39 = vadd.f32 1.0, %v2769_v52  ;;  %v1312_v5 = vpop.f32.mrf.mxu1 }
 0x21a   : > { %v1781_v19 = vadd.f32 %v1749_v22, %v1265_v10  ;;  %2782 = vpow2.f32 %v2155_v48  ;;  %v1313_v20 = vadd.f32 %v1312_v5, %v3435_v4 }
 0x21b   : > { %v2771_v27 = vpop.eup %2770  ;;  %2784 = vrcp.f32 %v1657_v39  ;;  %v3535_v18 = vpop.f32.mrf.mxu1 }
 0x21c   : > { %v2773_v36 = vpop.eup %2772  ;;  %v2260_v13 = vpack.c.bf16 %v1781_v19, %v1780_v6  ;;  %v1658_v62 = vadd.f32 1.0, %v2771_v27  ;;  %v2156_v26 = vmul.f32 -1.442695, %v1313_v20  ;;  %v1474_v6 = vpop.f32.mrf.mxu0  ;;  %v1472_v27 = vadd.f32 %v1471_v60, %v3466_v33 }
 0x21d   : > { %v1316_v24 = vpop.f32.mrf.mxu1  ;;  %v1750_v41 = vmul.f32 %v2773_v36, %v1456_v38 }
 0x21e   : > { %2324 = vst [vmem:[%s3495_s6 + $0x18] sm:$0xff] %v2260_v13   ;;  %2786 = vrcp.f32 %v1658_v62  ;;  %v1317_v1 = vadd.f32 %v1316_v24, %v3435_v4  ;;  %v1475_v62 = vadd.f32 %v1474_v6, %v3466_v33 }
 0x21f   : > { %v2775_v16 = vpop.eup %2774  ;;  %2788 = vpow2.f32 %v2156_v26  ;;  %v3543_v21 = vpop.f32.mrf.mxu1  ;;  %v1782_v49 = vadd.f32 %v1750_v41, %v1271_v53  ;;  %v1295_v41 = vadd.f32 %v3506_v32, %v3472_v55  ;;  %v1480_v32 = vadd.f32 %v3541_v40, %v3466_v33 }
 0x220   : > { %v2777_v42 = vpop.eup %2776  ;;  %v1659_v50 = vadd.f32 1.0, %v2775_v16  ;;  %v2157_v45 = vmul.f32 -1.442695, %v1317_v1  ;;  %v1291_v16 = vadd.f32 %v3503_v59, %v3472_v55  ;;  %v1301_v40 = vadd.f32 %v3512_v56, %v3472_v55 }
 0x221   : > { %v1751_v47 = vmul.f32 %v2777_v42, %v1459_v34  ;;  %v1322_v8 = vpop.f32.mrf.mxu1  ;;  %v3576_v42 = vpop.f32.mrf.mxu0 }
 0x222   : > { %2790 = vrcp.f32 %v1659_v50  ;;  %v1323_v54 = vadd.f32 %v1322_v8, %v3435_v4 }
 0x223   : > { %v2779_v63 = vpop.eup %2778  ;;  %v1783_v57 = vadd.f32 %v1751_v47, %v1275_v58  ;;  %2792 = vpow2.f32 %v2157_v45  ;;  %v3550_v0 = vpop.f32.mrf.mxu1 }
 0x224   : > { %v2781_v11 = vpop.eup %2780  ;;  %v1660_v30 = vadd.f32 1.0, %v2779_v63  ;;  %v2158_v46 = vmul.f32 -1.442695, %v1323_v54 }
 0x225   : > { %v2265_v43 = vpack.c.bf16 %v1783_v57, %v1782_v49  ;;  %v1326_v28 = vpop.f32.mrf.mxu1  ;;  %v1752_v51 = vmul.f32 %v2781_v11, %v1464_v31  ;;  %v1487_v57 = vpop.f32.mrf.mxu0  ;;  %v1483_v31 = vadd.f32 %v2443_v35, %v3466_v33 }
 0x226   : > { %2794 = vrcp.f32 %v1660_v30  ;;  %v1327_v25 = vadd.f32 %v1326_v28, %v3435_v4  ;;  %v1488_v6 = vadd.f32 %v1487_v57, %v3466_v33 }
 0x227   : > { %v2783_v61 = vpop.eup %2782  ;;  %2325 = vst [vmem:[%s3495_s6 + $0x20] sm:$0xff] %v2265_v43   ;;  %2796 = vpow2.f32 %v2158_v46  ;;  %v3557_v37 = vpop.f32.mrf.mxu1  ;;  %v1784_v39 = vadd.f32 %v1752_v51, %v1281_v14  ;;  %v1305_v51 = vadd.f32 %v3521_v15, %v3472_v55 }
 0x228   : > { %v2785_v7 = vpop.eup %2784  ;;  %v1661_v29 = vadd.f32 1.0, %v2783_v61  ;;  %v2159_v52 = vmul.f32 -1.442695, %v1327_v25 }
 0x229   : > { %v1753_v10 = vmul.f32 %v2785_v7, %v1467_v3  ;;  %v1332_v22 = vpop.f32.mrf.mxu1  ;;  %v2447_v7 = vpop.f32.mrf.mxu0 }
 0x22a   : > { %2798 = vrcp.f32 %v1661_v29  ;;  %v1333_v48 = vadd.f32 %v1332_v22, %v3435_v4 }
 0x22b   : > { %v2787_v12 = vpop.eup %2786  ;;  %v1785_v5 = vadd.f32 %v1753_v10, %v1285_v2  ;;  %2800 = vpow2.f32 %v2159_v52  ;;  %v3564_v19 = vpop.f32.mrf.mxu1 }
 0x22c   : > { %v2789_v20 = vpop.eup %2788  ;;  %v2160_v23 = vmul.f32 -1.442695, %v1333_v48  ;;  %v1754_v17 = vmul.f32 %v2787_v12, %v1472_v27 }
 0x22d   : > { %v2270_v36 = vpack.c.bf16 %v1785_v5, %v1784_v39  ;;  %v1662_v13 = vadd.f32 1.0, %v2789_v20  ;;  %v1336_v44 = vpop.f32.mrf.mxu1  ;;  %v1490_v39 = vpop.f32.mrf.mxu0 }
 0x22e   : > { %2802 = vpow2.f32 %v2160_v23  ;;  %v1337_v26 = vadd.f32 %v1336_v44, %v3435_v4  ;;  %v1786_v58 = vadd.f32 %v1754_v17, %v1291_v16  ;;  %v1315_v16 = vadd.f32 %v3535_v18, %v3472_v55 }
 0x22f   : > { %v2791_v38 = vpop.eup %2790  ;;  %2326 = vst [vmem:[%s3495_s6 + $0x28] sm:$0xff] %v2270_v36   ;;  %2804 = vrcp.f32 %v1662_v13  ;;  %v3570_v24 = vpop.f32.mrf.mxu1  ;;  %v1491_v13 = vadd.f32 %v1490_v39, %v3466_v33 }
 0x230   : > { %v2793_v1 = vpop.eup %2792  ;;  %v1755_v34 = vmul.f32 %v2791_v38, %v1475_v62  ;;  %v2161_v50 = vmul.f32 -1.442695, %v1337_v26  ;;  %v3599_v44 = vpop.f32.mrf.mxu0 }
 0x231   : > { %v1663_v45 = vadd.f32 1.0, %v2793_v1  ;;  %v1342_v53 = vpop.f32.mrf.mxu1  ;;  %v1311_v1 = vadd.f32 %v3528_v9, %v3472_v55  ;;  %v1496_v9 = vadd.f32 %v3576_v42, %v3466_v33  ;;  %v1321_v42 = vadd.f32 %v3543_v21, %v3472_v55 }
 0x232   : > { %v1787_v47 = vadd.f32 %v1755_v34, %v1295_v41  ;;  %2806 = vpow2.f32 %v2161_v50  ;;  %v1343_v8 = vadd.f32 %v1342_v53, %v3435_v4 }
 0x233   : > { %v2795_v54 = vpop.eup %2794  ;;  %2808 = vrcp.f32 %v1663_v45  ;;  %v3579_v63 = vpop.f32.mrf.mxu1 }
 0x234   : > { %v2797_v59 = vpop.eup %2796  ;;  %v2275_v49 = vpack.c.bf16 %v1787_v47, %v1786_v58  ;;  %v2162_v60 = vmul.f32 -1.442695, %v1343_v8  ;;  %v1756_v46 = vmul.f32 %v2795_v54, %v1480_v32  ;;  %v1503_v47 = vpop.f32.mrf.mxu0 }
 0x235   : > { %v1664_v11 = vadd.f32 1.0, %v2797_v59  ;;  %v1346_v30 = vpop.f32.mrf.mxu1 }
 0x236   : > { %2327 = vst [vmem:[%s3495_s6 + $0x30] sm:$0xff] %v2275_v49   ;;  %2810 = vpow2.f32 %v2162_v60  ;;  %v1347_v43 = vadd.f32 %v1346_v30, %v3435_v4  ;;  %v1788_v14 = vadd.f32 %v1756_v46, %v1301_v40  ;;  %v1499_v30 = vadd.f32 %v2447_v7, %v3466_v33  ;;  %v2451_v46 = vpop.f32.mrf.mxu0 }
 0x237   : > { %v2799_v28 = vpop.eup %2798  ;;  %2812 = vrcp.f32 %v1664_v11  ;;  %v3586_v25 = vpop.f32.mrf.mxu1  ;;  %v1325_v40 = vadd.f32 %v3550_v0, %v3472_v55 }
 0x238   : > { %v2801_v61 = vpop.eup %2800  ;;  %v1757_v3 = vmul.f32 %v2799_v28, %v1483_v31  ;;  %v2163_v29 = vmul.f32 -1.442695, %v1347_v43 }
 0x239   : > { %v1665_v52 = vadd.f32 1.0, %v2801_v61  ;;  %v1352_v35 = vpop.f32.mrf.mxu1 }
 0x23a   : > { %v1789_v2 = vadd.f32 %v1757_v3, %v1305_v51  ;;  %2814 = vpow2.f32 %v2163_v29  ;;  %v1353_v10 = vadd.f32 %v1352_v35, %v3435_v4 }
 0x23b   : > { %v2803_v22 = vpop.eup %2802  ;;  %2816 = vrcp.f32 %v1665_v52  ;;  %v3593_v48 = vpop.f32.mrf.mxu1 }
 0x23c   : > { %v2805_v12 = vpop.eup %2804  ;;  %v2280_v56 = vpack.c.bf16 %v1789_v2, %v1788_v14  ;;  %v1666_v5 = vadd.f32 1.0, %v2803_v22  ;;  %v2164_v15 = vmul.f32 -1.442695, %v1353_v10  ;;  %v1506_v14 = vpop.f32.mrf.mxu0  ;;  %v1504_v22 = vadd.f32 %v1503_v47, %v3466_v33 }
 0x23d   : > { %v1356_v20 = vpop.f32.mrf.mxu1  ;;  %v1758_v36 = vmul.f32 %v2805_v12, %v1488_v6 }
 0x23e   : > { %2328 = vst [vmem:[%s3495_s6 + $0x38] sm:$0xff] %v2280_v56   ;;  %2818 = vrcp.f32 %v1666_v5  ;;  %v1357_v27 = vadd.f32 %v1356_v20, %v3435_v4  ;;  %v1507_v5 = vadd.f32 %v1506_v14, %v3466_v33 }
 0x23f   : > { %v2807_v23 = vpop.eup %2806  ;;  %2820 = vpow2.f32 %v2164_v15  ;;  %v3601_v17 = vpop.f32.mrf.mxu1  ;;  %v1790_v53 = vadd.f32 %v1758_v36, %v1311_v1  ;;  %v1335_v36 = vadd.f32 %v3564_v19, %v3472_v55 }
 0x240   : > { %v2809_v62 = vpop.eup %2808  ;;  %v1667_v26 = vadd.f32 1.0, %v2807_v23  ;;  %v2165_v38 = vmul.f32 -1.442695, %v1357_v27  ;;  %v1331_v23 = vadd.f32 %v3557_v37, %v3472_v55  ;;  %v1512_v37 = vadd.f32 %v3599_v44, %v3466_v33 }
 0x241   : > { %v1759_v41 = vmul.f32 %v2809_v62, %v1491_v13  ;;  %v1362_v34 = vpop.f32.mrf.mxu1  ;;  %v2454_v62 = vpop.f32.mrf.mxu0  ;;  %v1345_v44 = vadd.f32 %v3579_v63, %v3472_v55 }
 0x242   : > { %2822 = vrcp.f32 %v1667_v26  ;;  %v1363_v50 = vadd.f32 %v1362_v34, %v3435_v4 }
 0x243   : > { %v2811_v45 = vpop.eup %2810  ;;  %v1791_v58 = vadd.f32 %v1759_v41, %v1315_v16  ;;  %2824 = vpow2.f32 %v2165_v38  ;;  %v3608_v8 = vpop.f32.mrf.mxu1 }
 0x244   : > { %v2813_v54 = vpop.eup %2812  ;;  %v1668_v59 = vadd.f32 1.0, %v2811_v45  ;;  %v2166_v32 = vmul.f32 -1.442695, %v1363_v50 }
 0x245   : > { %v2285_v18 = vpack.c.bf16 %v1791_v58, %v1790_v53  ;;  %v1366_v49 = vpop.f32.mrf.mxu1  ;;  %v1760_v11 = vmul.f32 %v2813_v54, %v1496_v9  ;;  %v1519_v58 = vpop.f32.mrf.mxu0  ;;  %v1515_v9 = vadd.f32 %v2451_v46, %v3466_v33 }
 0x246   : > { %2826 = vrcp.f32 %v1668_v59  ;;  %v1367_v57 = vadd.f32 %v1366_v49, %v3435_v4 }
 0x247   : > { %v2815_v60 = vpop.eup %2814  ;;  %2329 = vst [vmem:[%s3495_s6 + $0x40] sm:$0xff] %v2285_v18   ;;  %2828 = vpow2.f32 %v2166_v32  ;;  %v3615_v31 = vpop.f32.mrf.mxu1  ;;  %v1792_v52 = vadd.f32 %v1760_v11, %v1321_v42 }
 0x248   : > { %v2817_v43 = vpop.eup %2816  ;;  %v1669_v28 = vadd.f32 1.0, %v2815_v60  ;;  %v2167_v61 = vmul.f32 -1.442695, %v1367_v57  ;;  %v1341_v60 = vadd.f32 %v3570_v24, %v3472_v55 }
 0x249   : > { %v1761_v51 = vmul.f32 %v2817_v43, %v1499_v30  ;;  %v1372_v3 = vpop.f32.mrf.mxu1  ;;  %v2455_v30 = vpop.f32.mrf.mxu0 }
 0x24a   : > { %2830 = vrcp.f32 %v1669_v28  ;;  %v1373_v29 = vadd.f32 %v1372_v3, %v3435_v4 }
 0x24b   : > { %v2819_v7 = vpop.eup %2818  ;;  %v1793_v35 = vadd.f32 %v1761_v51, %v1325_v40  ;;  %2832 = vpow2.f32 %v2167_v61  ;;  %v3622_v2 = vpop.f32.mrf.mxu1 }
 0x24c   : > { %v2821_v10 = vpop.eup %2820  ;;  %v2168_v21 = vmul.f32 -1.442695, %v1373_v29  ;;  %v1762_v39 = vmul.f32 %v2819_v7, %v1504_v22  ;;  %v1522_v51 = vpop.f32.mrf.mxu0  ;;  %v1520_v29 = vadd.f32 %v1519_v58, %v3466_v33  ;;  %v1355_v22 = vadd.f32 %v3593_v48, %v3472_v55 }
 0x24d   : > { %v2290_v12 = vpack.c.bf16 %v1793_v35, %v1792_v52  ;;  %v1670_v56 = vadd.f32 1.0, %v2821_v10  ;;  %v1376_v0 = vpop.f32.mrf.mxu1  ;;  %v1523_v63 = vadd.f32 %v1522_v51, %v3466_v33  ;;  %v1351_v10 = vadd.f32 %v3586_v25, %v3472_v55 }
 0x24e   : > { %2834 = vpow2.f32 %v2168_v21  ;;  %v1377_v15 = vadd.f32 %v1376_v0, %v3435_v4  ;;  %v1794_v16 = vadd.f32 %v1762_v39, %v1331_v23  ;;  %v1531_v25 = vadd.f32 %v2455_v30, %v3466_v33 }
 0x24f   : > { %v2823_v6 = vpop.eup %2822  ;;  %2330 = vst [vmem:[%s3495_s6 + $0x48] sm:$0xff] %v2290_v12   ;;  %2836 = vrcp.f32 %v1670_v56  ;;  %v3628_v20 = vpop.f32.mrf.mxu1 }
 0x250   : > { %v2825_v27 = vpop.eup %2824  ;;  %v1763_v13 = vmul.f32 %v2823_v6, %v1507_v5  ;;  %v2169_v26 = vmul.f32 -1.442695, %v1377_v15  ;;  %v2458_v52 = vpop.f32.mrf.mxu0  ;;  %v1528_v6 = vadd.f32 %v2454_v62, %v3466_v33 }
 0x251   : > { %v1671_v38 = vadd.f32 1.0, %v2825_v27  ;;  %v1382_v1 = vpop.f32.mrf.mxu1 }
 0x252   : > { %v1795_v41 = vadd.f32 %v1763_v13, %v1335_v36  ;;  %2838 = vpow2.f32 %v2169_v26  ;;  %v1383_v34 = vadd.f32 %v1382_v1, %v3435_v4  ;;  %v1535_v39 = vpop.f32.mrf.mxu0  ;;  %v1365_v1 = vadd.f32 %v3608_v8, %v3472_v55 }
 0x253   : > { %v2827_v50 = vpop.eup %2826  ;;  %2840 = vrcp.f32 %v1671_v38  ;;  %v3635_v45 = vpop.f32.mrf.mxu1  ;;  %v1361_v38 = vadd.f32 %v3601_v17, %v3472_v55  ;;  %v1371_v17 = vadd.f32 %v3615_v31, %v3472_v55  ;;  %v1375_v8 = vadd.f32 %v3622_v2, %v3472_v55 }
 0x254   : > { %v2829_v53 = vpop.eup %2828  ;;  %v2295_v19 = vpack.c.bf16 %v1795_v41, %v1794_v16  ;;  %v2170_v47 = vmul.f32 -1.442695, %v1383_v34  ;;  %v1764_v32 = vmul.f32 %v2827_v50, %v1512_v37  ;;  %v2459_v13 = vpop.f32.mrf.mxu0  ;;  %v1381_v31 = vadd.f32 %v3628_v20, %v3472_v55 }
 0x255   : > { %v1672_v54 = vadd.f32 1.0, %v2829_v53  ;;  %v1386_v59 = vpop.f32.mrf.mxu1  ;;  %v1536_v53 = vadd.f32 %v1535_v39, %v3466_v33  ;;  %v1385_v2 = vadd.f32 %v3635_v45, %v3472_v55 }
 0x256   : > { %2331 = vst [vmem:[%s3495_s6 + $0x50] sm:$0xff] %v2295_v19   ;;  %2842 = vpow2.f32 %v2170_v47  ;;  %v1387_v18 = vadd.f32 %v1386_v59, %v3435_v4  ;;  %v1796_v61 = vadd.f32 %v1764_v32, %v1341_v60  ;;  %v1538_v50 = vpop.f32.mrf.mxu0  ;;  %v1547_v60 = vadd.f32 %v2459_v13, %v3466_v33 }
 0x257   : > { %v2831_v49 = vpop.eup %2830  ;;  %2844 = vrcp.f32 %v1672_v54  ;;  %v1539_v58 = vadd.f32 %v1538_v50, %v3466_v33 }
 0x258   : > { %v2833_v57 = vpop.eup %2832  ;;  %v1765_v11 = vmul.f32 %v2831_v49, %v1515_v9  ;;  %v2171_v43 = vmul.f32 -1.442695, %v1387_v18  ;;  %v1544_v18 = vadd.f32 %v2458_v52, %v3466_v33 }
 0x259   : > { %v1673_v28 = vadd.f32 1.0, %v2833_v57 }
 0x25a   : > { %v1797_v46 = vadd.f32 %v1765_v11, %v1345_v44  ;;  %2846 = vpow2.f32 %v2171_v43 }
 0x25b   : > { %v2835_v42 = vpop.eup %2834  ;;  %2848 = vrcp.f32 %v1673_v28 }
 0x25c   : > { %v2837_v4 = vpop.eup %2836  ;;  %v2300_v40 = vpack.c.bf16 %v1797_v46, %v1796_v61  ;;  %v1674_v3 = vadd.f32 1.0, %v2835_v42 }
 0x25d   : > { %v1766_v7 = vmul.f32 %v2837_v4, %v1520_v29 }
 0x25e   : > { %2332 = vst [vmem:[%s3495_s6 + $0x58] sm:$0xff] %v2300_v40   ;;  %2850 = vrcp.f32 %v1674_v3 }
 0x25f   : > { %v2839_v24 = vpop.eup %2838  ;;  %v1798_v56 = vadd.f32 %v1766_v7, %v1351_v10 }
 0x260   : > { %v2841_v35 = vpop.eup %2840  ;;  %v1675_v14 = vadd.f32 1.0, %v2839_v24 }
 0x261   : > { %v1767_v21 = vmul.f32 %v2841_v35, %v1523_v63 }
 0x262   : > { %2852 = vrcp.f32 %v1675_v14 }
 0x263   : > { %v2843_v12 = vpop.eup %2842  ;;  %v1799_v0 = vadd.f32 %v1767_v21, %v1355_v22 }
 0x264   : > { %v2845_v5 = vpop.eup %2844  ;;  %v1676_v15 = vadd.f32 1.0, %v2843_v12 }
 0x265   : > { %v2305_v27 = vpack.c.bf16 %v1799_v0, %v1798_v56  ;;  %v1768_v36 = vmul.f32 %v2845_v5, %v1528_v6 }
 0x266   : > { %2854 = vrcp.f32 %v1676_v15 }
 0x267   : > { %v2847_v23 = vpop.eup %2846  ;;  %2333 = vst [vmem:[%s3495_s6 + $0x60] sm:$0xff] %v2305_v27   ;;  %v1800_v41 = vadd.f32 %v1768_v36, %v1361_v38 }
 0x268   : > { %v2849_v48 = vpop.eup %2848  ;;  %v1677_v26 = vadd.f32 1.0, %v2847_v23 }
 0x269   : > { %v1769_v16 = vmul.f32 %v2849_v48, %v1531_v25 }
 0x26a   : > { %2856 = vrcp.f32 %v1677_v26 }
 0x26b   : > { %v2851_v62 = vpop.eup %2850  ;;  %v1801_v34 = vadd.f32 %v1769_v16, %v1365_v1 }
 0x26c   : > { %v1770_v19 = vmul.f32 %v2851_v62, %v1536_v53 }
 0x26d   : > { %v2310_v37 = vpack.c.bf16 %v1801_v34, %v1800_v41 }
 0x26e   : > { %v1802_v59 = vadd.f32 %v1770_v19, %v1371_v17 }
 0x26f   : > { %v2853_v47 = vpop.eup %2852  ;;  %2334 = vst [vmem:[%s3495_s6 + $0x68] sm:$0xff] %v2310_v37  }
 0x270   : > { %v1771_v54 = vmul.f32 %v2853_v47, %v1539_v58 }
 0x272   : > { %v1803_v32 = vadd.f32 %v1771_v54, %v1375_v8 }
 0x273   : > { %v2855_v9 = vpop.eup %2854 }
 0x274   : > { %v2315_v49 = vpack.c.bf16 %v1803_v32, %v1802_v59  ;;  %v1772_v57 = vmul.f32 %v2855_v9, %v1544_v18 }
 0x276   : > { %2335 = vst [vmem:[%s3495_s6 + $0x70] sm:$0xff] %v2315_v49   ;;  %v1804_v30 = vadd.f32 %v1772_v57, %v1381_v31 }
 0x277   : > { %v2857_v44 = vpop.eup %2856 }
 0x278   : > { %v1773_v11 = vmul.f32 %v2857_v44, %v1547_v60 }
 0x27a   : > { %v1805_v43 = vadd.f32 %v1773_v11, %v1385_v2 }
 0x27c   : > { %v2320_v33 = vpack.c.bf16 %v1805_v43, %v1804_v30 }
 0x27e   : > { %2336 = vst [vmem:[%s3495_s6 + $0x78] sm:$0xff] %v2320_v33  }
 0x27f   : > { %2871 = shalt.err (!%p2868_p3)
}
 0x280   : > { %s2872_s16 = scalar_lea.hbm %s3679_s11, 2048  ;;  %s2876_s25 = scalar_lea.hbm %s3731_s5, 4096 }
 0x281   : > { %p2873_p4 = scmp.ne.s32.totalorder %s3679_s11, %s2872_s16  ;;  %p2877_p9 = scmp.lt.s32.totalorder %s3679_s11, %s3731_s5 }
 0x282   : > { %p2878_p10 = scmp.lt.s32.totalorder %s2876_s25, %s2872_s16 }
 0x283   : > { %p2874_p7 = pnand %p2873_p4, %p2992_p5 }
 0x284   : > { %p2879_p11 = por %p2878_p10, %p2877_p9 }
 0x285   : > { %p2875_p8 = pneg %p2874_p7 }
 0x287   : > { %p2880_p12 = pnand %p2879_p11, %p2875_p8 }
 0x289   : > { %2883 = shalt.err (!%p2880_p12)
}
 0x28a   : > { %s2922_s6 = smov 64   ;;  %s2923_s7 = smov 4  }
 0x28b   : > { %2460 = dma.vmem_to_hbm [thread:$0]  (%p2992_p5), %s3681_s8, 2048, %s3679_s11, %s3686_s12, %s2922_s6, %s2922_s6, %s2923_s7  }
 0x28c PF: > { %p2466_p13 = scmp.ge.s32.totalorder %s2918_s21, 2  ;;  %s1995_s9 = sand.u32 1, %s2906_s18  }
 0x28d   : > { %s1996_s10 = scalar_lea.sflag [#allocation3], %s1995_s9 }
 0x28e   : > { %p2463_p0 = pnand %p2466_p13, %p2996_p6 }
 0x290   : > { %p2464_p1 = pneg %p2463_p0 }
 0x292   : > { %2901 = dma.done.wait (%p2464_p1), %s1996_s10, 2048  }
 0x293   : > { %2903 = vsyncadd (%p2464_p1), %s1996_s10, 4294965248  ;;  %p15_p2 = scmp.ge.s32.totalorder %s2979_s24, 4   ;;  %s3734_s18 = smov %s2910_s19 }
 0x294   : > { %s3735_s19 = smov %s2914_s20  ;;  %s3736_s20 = smov %s2990_s27 }
 0x295   : > { %s3737_s21 = smov %s2979_s24  ;;  %17 = sbr.rel (!%p15_p2) target bundleno = 3 (0x3), region = 75 }
 0x29a   :  { %2001 = vsyncpa [#allocation3], 1 }
 0x29b   :  { %2003 = vsyncpa [#allocation3 + $0x1], 1 }

</bundles_post_ra>
